<compile_context>
chip_gen: v6e
topology: v6e:2x2x1
jax: 0.10.0
libtpu: 0.0.40
codegen_flags: <defaults>
</compile_context>

<pallas_src>
import functools

import jax
import jax.numpy as jnp
from jax.experimental import pallas as pl
from jax.experimental.pallas import tpu as pltpu

_LANE = 128


def _conv_bn_silu_kernel(x_ref, w_ref, gamma_ref, beta_ref, o_ref,
                         sum_ref, ssq_ref, scale_ref, shift_ref,
                         *, eps, ksize, height, width, inv_count):
    p = pl.program_id(0)              # 0 = conv + stats pass, 1 = conv + normalize pass
    n = pl.program_id(1)              # image index
    n_last = pl.num_programs(1) - 1

    hw = height * width
    cin = x_ref.shape[-1]
    cout = o_ref.shape[-1]

    # ---- conv3x3 (same padding) as K*K shifted, accumulating MXU matmuls (bf16 x bf16 -> f32)
    acc = jnp.zeros((hw, cout), jnp.float32)
    for kh in range(ksize):
        for kw in range(ksize):
            win = x_ref[0, kh:kh + height, kw:kw + width, :].reshape(hw, cin)
            acc = acc + jnp.dot(win, w_ref[kh * ksize + kw],
                                preferred_element_type=jnp.float32)

    # ---- pass 0: accumulate BN batch statistics; finalize folded per-channel scale/shift
    @pl.when(p == 0)
    def _stats_pass():
        @pl.when(n == 0)
        def _init():
            sum_ref[...] = jnp.zeros_like(sum_ref)
            ssq_ref[...] = jnp.zeros_like(ssq_ref)

        sum_ref[...] += jnp.sum(acc, axis=0, keepdims=True)
        ssq_ref[...] += jnp.sum(acc * acc, axis=0, keepdims=True)

        @pl.when(n == n_last)
        def _finalize():
            mean = sum_ref[...] * inv_count
            var = jnp.maximum(ssq_ref[...] * inv_count - mean * mean, 0.0)
            scale = gamma_ref[...] * jax.lax.rsqrt(var + eps)   # gamma * rsqrt(var+eps)
            scale_ref[...] = scale
            shift_ref[...] = beta_ref[...] - mean * scale

    # ---- pass 1: normalize+affine as a single FMA, then SiLU; lane-dense store -----------
    @pl.when(p == 1)
    def _normalize_pass():
        y = acc * scale_ref[...] + shift_ref[...]
        o_ref[0] = (y * jax.nn.sigmoid(y)).astype(o_ref.dtype)
    # dropout == 0.0 -> Identity (nothing to do)


def conv2d_layer_forward(x_nchw, weight_oihw, gamma, beta, *, eps=1e-5):
    """Forward of Conv2dLayer(batchnorm=True, affine=True, activation='swish-1',
    dropout=0.0, conv_bias=False): conv3x3(same) -> BN(train batch stats) -> SiLU."""
    # TODO(synk): FiLM path (betas/gammas with affine=False) not implemented; default path only.
    N, Cin, H, W = x_nchw.shape
    Cout, _, K, _ = weight_oihw.shape
    pad = K // 2
    cout_p = ((Cout + _LANE - 1) // _LANE) * _LANE
    hw = H * W

    # Layout glue (plain JAX): NCHW -> NHWC (channels on lanes), zero-pad spatially,
    # bf16 matmul operands (f32 accumulation inside the kernel).
    x_nhwc = jnp.transpose(x_nchw, (0, 2, 3, 1)).astype(jnp.bfloat16)
    x_pad = jnp.pad(x_nhwc, ((0, 0), (pad, pad), (pad, pad), (0, 0)))

    # (Cout, Cin, K, K) -> (K*K, Cin, Cout_pad) matching the kernel's (kh, kw) loop order.
    w = jnp.transpose(weight_oihw, (2, 3, 1, 0)).reshape(K * K, Cin, Cout)
    w = jnp.pad(w, ((0, 0), (0, 0), (0, cout_p - Cout))).astype(jnp.bfloat16)
    gamma_p = jnp.pad(gamma.astype(jnp.float32), (0, cout_p - Cout)).reshape(1, cout_p)
    beta_p = jnp.pad(beta.astype(jnp.float32), (0, cout_p - Cout)).reshape(1, cout_p)

    kernel = functools.partial(
        _conv_bn_silu_kernel, eps=eps, ksize=K, height=H, width=W,
        inv_count=1.0 / float(N * hw))

    matmul_flops = 2 * N * hw * K * K * Cin * cout_p * 2    # conv recomputed in pass 1
    cost = pl.CostEstimate(
        flops=matmul_flops + 10 * N * hw * cout_p,
        transcendentals=N * hw * cout_p,
        bytes_accessed=2 * x_pad.size * x_pad.dtype.itemsize + N * hw * cout_p * 4)

    out = pl.pallas_call(
        kernel,
        out_shape=jax.ShapeDtypeStruct((N, hw, cout_p), jnp.float32),
        grid=(2, N),   # (pass, image)
        in_specs=[
            # padded image n; re-read on both passes (still far fewer bytes than im2col)
            pl.BlockSpec((1, H + 2 * pad, W + 2 * pad, Cin), lambda p, n: (n, 0, 0, 0)),
            # weights / gamma / beta: constant index_map -> resident in VMEM for the whole grid
            pl.BlockSpec((K * K, Cin, cout_p), lambda p, n: (0, 0, 0)),
            pl.BlockSpec((1, cout_p), lambda p, n: (0, 0)),
            pl.BlockSpec((1, cout_p), lambda p, n: (0, 0)),
        ],
        # During pass 0 the output index is pinned at block 0 and never written, so nothing
        # is flushed to HBM; pass 1 writes each (hw, cout_p) lane-dense block exactly once.
        out_specs=pl.BlockSpec((1, hw, cout_p), lambda p, n: (p * n, 0, 0)),
        scratch_shapes=[pltpu.VMEM((1, cout_p), jnp.float32)] * 4,  # sum, sumsq, scale, shift
        compiler_params=pltpu.CompilerParams(
            dimension_semantics=("arbitrary", "arbitrary"),
            vmem_limit_bytes=32 * 1024 * 1024,
        ),
        cost_estimate=cost,
    )(x_pad, w, gamma_p, beta_p)

    out = out[..., :Cout].reshape(N, H, W, Cout)
    return jnp.transpose(out, (0, 3, 1, 2)).astype(x_nchw.dtype)   # back to NCHW


def _reference(x_nchw, weight_oihw, gamma, beta, eps=1e-5):
    # Matches the kernel's numerics: bf16-rounded matmul operands, f32 accumulation,
    # training-mode (biased) batch statistics, affine BN, SiLU.
    xb = x_nchw.astype(jnp.bfloat16).astype(jnp.float32)
    wb = weight_oihw.astype(jnp.bfloat16).astype(jnp.float32)
    conv = jax.lax.conv_general_dilated(
        xb, wb, window_strides=(1, 1), padding="SAME",
        dimension_numbers=("NCHW", "OIHW", "NCHW"))
    mean = conv.mean(axis=(0, 2, 3), keepdims=True)
    var = ((conv - mean) ** 2).mean(axis=(0, 2, 3), keepdims=True)
    y = (conv - mean) * jax.lax.rsqrt(var + eps)
    y = y * gamma[None, :, None, None] + beta[None, :, None, None]
    return y * jax.nn.sigmoid(y)


if __name__ == "__main__":
    N, Cin, Cout, H, W, K = 2, 4, 8, 16, 16, 3

    key = jax.random.PRNGKey(0)
    kx, kw = jax.random.split(key)
    x = jax.random.normal(kx, (N, Cin, H, W), dtype=jnp.float32)
    weight = jax.random.normal(kw, (Cout, Cin, K, K), dtype=jnp.float32) * 0.1
    # non-trivial BN affine params to exercise the scale/shift fold
    gamma = jnp.linspace(0.5, 1.5, Cout, dtype=jnp.float32)
    beta = jnp.linspace(-0.2, 0.2, Cout, dtype=jnp.float32)

    out = jax.block_until_ready(jax.jit(conv2d_layer_forward)(x, weight, gamma, beta))
    ref = _reference(x, weight, gamma, beta)

    assert out.shape == (N, Cout, H, W), out.shape
    max_err = float(jnp.max(jnp.abs(out - ref)))
    assert jnp.allclose(out, ref, atol=2e-3, rtol=2e-3), max_err

    print("KERNEL_OK")
</pallas_src>

<mosaic_0001>
module attributes {stable_mosaic.version = 11 : i64} {
  func.func @_conv_bn_silu_kernel(%arg0: i32, %arg1: i32, %arg2: memref<1x18x18x4xbf16, #tpu.memory_space<vmem>>, %arg3: memref<9x4x128xbf16, #tpu.memory_space<vmem>>, %arg4: memref<1x128xf32, #tpu.memory_space<vmem>>, %arg5: memref<1x128xf32, #tpu.memory_space<vmem>>, %arg6: memref<1x256x128xf32, #tpu.memory_space<vmem>>, %arg7: memref<1x128xf32, #tpu.memory_space<vmem>>, %arg8: memref<1x128xf32, #tpu.memory_space<vmem>>, %arg9: memref<1x128xf32, #tpu.memory_space<vmem>>, %arg10: memref<1x128xf32, #tpu.memory_space<vmem>>) attributes {dimension_semantics = [#tpu.dimension_semantics<arbitrary>, #tpu.dimension_semantics<arbitrary>], iteration_bounds = array<i64: 2, 2>, scalar_prefetch = 0 : i64, scratch_operands = 4 : i64, tpu.core_type = #tpu.core_type<tc>, window_params = [{transform_indices = @transform_0, window_bounds = array<i64: 1, 18, 18, 4>}, {pipeline_mode = #tpu.pipeline_mode<synchronous>, transform_indices = @transform_1, window_bounds = array<i64: 9, 4, 128>}, {pipeline_mode = #tpu.pipeline_mode<synchronous>, transform_indices = @transform_2, window_bounds = array<i64: 1, 128>}, {pipeline_mode = #tpu.pipeline_mode<synchronous>, transform_indices = @transform_3, window_bounds = array<i64: 1, 128>}, {transform_indices = @transform_4, window_bounds = array<i64: 1, 256, 128>}]} {
    %cst = arith.constant 0.000000e+00 : f32
    %0 = vector.broadcast %cst : f32 to vector<256x128xf32>
    %c0 = arith.constant 0 : index
    %c0_0 = arith.constant 0 : index
    %c0_1 = arith.constant 0 : index
    %c0_2 = arith.constant 0 : index
    %1 = vector.load %arg2[%c0, %c0_0, %c0_1, %c0_2] : memref<1x18x18x4xbf16, #tpu.memory_space<vmem>>, vector<1x16x16x4xbf16>
    %2 = vector.shape_cast %1 : vector<1x16x16x4xbf16> to vector<16x16x4xbf16>
    %3 = vector.shape_cast %2 : vector<16x16x4xbf16> to vector<256x4xbf16>
    %c0_3 = arith.constant 0 : index
    %c0_4 = arith.constant 0 : index
    %c0_5 = arith.constant 0 : index
    %4 = vector.load %arg3[%c0_3, %c0_4, %c0_5] : memref<9x4x128xbf16, #tpu.memory_space<vmem>>, vector<1x4x128xbf16>
    %5 = vector.shape_cast %4 : vector<1x4x128xbf16> to vector<4x128xbf16>
    %cst_6 = arith.constant dense<0.000000e+00> : vector<256x128xf32>
    %6 = tpu.matmul %3, %5, %cst_6 {dimension_numbers = #tpu.dot_dimension_numbers<[1], [0], [0], [1], [0, 0, 1, 1], [], []>} : vector<256x4xbf16>, vector<4x128xbf16>, vector<256x128xf32> -> vector<256x128xf32>
    %7 = arith.addf %0, %6 : vector<256x128xf32>
    %c0_7 = arith.constant 0 : index
    %c0_8 = arith.constant 0 : index
    %c1 = arith.constant 1 : index
    %c0_9 = arith.constant 0 : index
    %8 = vector.load %arg2[%c0_7, %c0_8, %c1, %c0_9] : memref<1x18x18x4xbf16, #tpu.memory_space<vmem>>, vector<1x16x16x4xbf16>
    %9 = vector.shape_cast %8 : vector<1x16x16x4xbf16> to vector<16x16x4xbf16>
    %10 = vector.shape_cast %9 : vector<16x16x4xbf16> to vector<256x4xbf16>
    %c1_10 = arith.constant 1 : index
    %c0_11 = arith.constant 0 : index
    %c0_12 = arith.constant 0 : index
    %11 = vector.load %arg3[%c1_10, %c0_11, %c0_12] : memref<9x4x128xbf16, #tpu.memory_space<vmem>>, vector<1x4x128xbf16>
    %12 = vector.shape_cast %11 : vector<1x4x128xbf16> to vector<4x128xbf16>
    %cst_13 = arith.constant dense<0.000000e+00> : vector<256x128xf32>
    %13 = tpu.matmul %10, %12, %cst_13 {dimension_numbers = #tpu.dot_dimension_numbers<[1], [0], [0], [1], [0, 0, 1, 1], [], []>} : vector<256x4xbf16>, vector<4x128xbf16>, vector<256x128xf32> -> vector<256x128xf32>
    %14 = arith.addf %7, %13 : vector<256x128xf32>
    %c0_14 = arith.constant 0 : index
    %c0_15 = arith.constant 0 : index
    %c2 = arith.constant 2 : index
    %c0_16 = arith.constant 0 : index
    %15 = vector.load %arg2[%c0_14, %c0_15, %c2, %c0_16] : memref<1x18x18x4xbf16, #tpu.memory_space<vmem>>, vector<1x16x16x4xbf16>
    %16 = vector.shape_cast %15 : vector<1x16x16x4xbf16> to vector<16x16x4xbf16>
    %17 = vector.shape_cast %16 : vector<16x16x4xbf16> to vector<256x4xbf16>
    %c2_17 = arith.constant 2 : index
    %c0_18 = arith.constant 0 : index
    %c0_19 = arith.constant 0 : index
    %18 = vector.load %arg3[%c2_17, %c0_18, %c0_19] : memref<9x4x128xbf16, #tpu.memory_space<vmem>>, vector<1x4x128xbf16>
    %19 = vector.shape_cast %18 : vector<1x4x128xbf16> to vector<4x128xbf16>
    %cst_20 = arith.constant dense<0.000000e+00> : vector<256x128xf32>
    %20 = tpu.matmul %17, %19, %cst_20 {dimension_numbers = #tpu.dot_dimension_numbers<[1], [0], [0], [1], [0, 0, 1, 1], [], []>} : vector<256x4xbf16>, vector<4x128xbf16>, vector<256x128xf32> -> vector<256x128xf32>
    %21 = arith.addf %14, %20 : vector<256x128xf32>
    %c0_21 = arith.constant 0 : index
    %c1_22 = arith.constant 1 : index
    %c0_23 = arith.constant 0 : index
    %c0_24 = arith.constant 0 : index
    %22 = vector.load %arg2[%c0_21, %c1_22, %c0_23, %c0_24] : memref<1x18x18x4xbf16, #tpu.memory_space<vmem>>, vector<1x16x16x4xbf16>
    %23 = vector.shape_cast %22 : vector<1x16x16x4xbf16> to vector<16x16x4xbf16>
    %24 = vector.shape_cast %23 : vector<16x16x4xbf16> to vector<256x4xbf16>
    %c3 = arith.constant 3 : index
    %c0_25 = arith.constant 0 : index
    %c0_26 = arith.constant 0 : index
    %25 = vector.load %arg3[%c3, %c0_25, %c0_26] : memref<9x4x128xbf16, #tpu.memory_space<vmem>>, vector<1x4x128xbf16>
    %26 = vector.shape_cast %25 : vector<1x4x128xbf16> to vector<4x128xbf16>
    %cst_27 = arith.constant dense<0.000000e+00> : vector<256x128xf32>
    %27 = tpu.matmul %24, %26, %cst_27 {dimension_numbers = #tpu.dot_dimension_numbers<[1], [0], [0], [1], [0, 0, 1, 1], [], []>} : vector<256x4xbf16>, vector<4x128xbf16>, vector<256x128xf32> -> vector<256x128xf32>
    %28 = arith.addf %21, %27 : vector<256x128xf32>
    %c0_28 = arith.constant 0 : index
    %c1_29 = arith.constant 1 : index
    %c1_30 = arith.constant 1 : index
    %c0_31 = arith.constant 0 : index
    %29 = vector.load %arg2[%c0_28, %c1_29, %c1_30, %c0_31] : memref<1x18x18x4xbf16, #tpu.memory_space<vmem>>, vector<1x16x16x4xbf16>
    %30 = vector.shape_cast %29 : vector<1x16x16x4xbf16> to vector<16x16x4xbf16>
    %31 = vector.shape_cast %30 : vector<16x16x4xbf16> to vector<256x4xbf16>
    %c4 = arith.constant 4 : index
    %c0_32 = arith.constant 0 : index
    %c0_33 = arith.constant 0 : index
    %32 = vector.load %arg3[%c4, %c0_32, %c0_33] : memref<9x4x128xbf16, #tpu.memory_space<vmem>>, vector<1x4x128xbf16>
    %33 = vector.shape_cast %32 : vector<1x4x128xbf16> to vector<4x128xbf16>
    %cst_34 = arith.constant dense<0.000000e+00> : vector<256x128xf32>
    %34 = tpu.matmul %31, %33, %cst_34 {dimension_numbers = #tpu.dot_dimension_numbers<[1], [0], [0], [1], [0, 0, 1, 1], [], []>} : vector<256x4xbf16>, vector<4x128xbf16>, vector<256x128xf32> -> vector<256x128xf32>
    %35 = arith.addf %28, %34 : vector<256x128xf32>
    %c0_35 = arith.constant 0 : index
    %c1_36 = arith.constant 1 : index
    %c2_37 = arith.constant 2 : index
    %c0_38 = arith.constant 0 : index
    %36 = vector.load %arg2[%c0_35, %c1_36, %c2_37, %c0_38] : memref<1x18x18x4xbf16, #tpu.memory_space<vmem>>, vector<1x16x16x4xbf16>
    %37 = vector.shape_cast %36 : vector<1x16x16x4xbf16> to vector<16x16x4xbf16>
    %38 = vector.shape_cast %37 : vector<16x16x4xbf16> to vector<256x4xbf16>
    %c5 = arith.constant 5 : index
    %c0_39 = arith.constant 0 : index
    %c0_40 = arith.constant 0 : index
    %39 = vector.load %arg3[%c5, %c0_39, %c0_40] : memref<9x4x128xbf16, #tpu.memory_space<vmem>>, vector<1x4x128xbf16>
    %40 = vector.shape_cast %39 : vector<1x4x128xbf16> to vector<4x128xbf16>
    %cst_41 = arith.constant dense<0.000000e+00> : vector<256x128xf32>
    %41 = tpu.matmul %38, %40, %cst_41 {dimension_numbers = #tpu.dot_dimension_numbers<[1], [0], [0], [1], [0, 0, 1, 1], [], []>} : vector<256x4xbf16>, vector<4x128xbf16>, vector<256x128xf32> -> vector<256x128xf32>
    %42 = arith.addf %35, %41 : vector<256x128xf32>
    %c0_42 = arith.constant 0 : index
    %c2_43 = arith.constant 2 : index
    %c0_44 = arith.constant 0 : index
    %c0_45 = arith.constant 0 : index
    %43 = vector.load %arg2[%c0_42, %c2_43, %c0_44, %c0_45] : memref<1x18x18x4xbf16, #tpu.memory_space<vmem>>, vector<1x16x16x4xbf16>
    %44 = vector.shape_cast %43 : vector<1x16x16x4xbf16> to vector<16x16x4xbf16>
    %45 = vector.shape_cast %44 : vector<16x16x4xbf16> to vector<256x4xbf16>
    %c6 = arith.constant 6 : index
    %c0_46 = arith.constant 0 : index
    %c0_47 = arith.constant 0 : index
    %46 = vector.load %arg3[%c6, %c0_46, %c0_47] : memref<9x4x128xbf16, #tpu.memory_space<vmem>>, vector<1x4x128xbf16>
    %47 = vector.shape_cast %46 : vector<1x4x128xbf16> to vector<4x128xbf16>
    %cst_48 = arith.constant dense<0.000000e+00> : vector<256x128xf32>
    %48 = tpu.matmul %45, %47, %cst_48 {dimension_numbers = #tpu.dot_dimension_numbers<[1], [0], [0], [1], [0, 0, 1, 1], [], []>} : vector<256x4xbf16>, vector<4x128xbf16>, vector<256x128xf32> -> vector<256x128xf32>
    %49 = arith.addf %42, %48 : vector<256x128xf32>
    %c0_49 = arith.constant 0 : index
    %c2_50 = arith.constant 2 : index
    %c1_51 = arith.constant 1 : index
    %c0_52 = arith.constant 0 : index
    %50 = vector.load %arg2[%c0_49, %c2_50, %c1_51, %c0_52] : memref<1x18x18x4xbf16, #tpu.memory_space<vmem>>, vector<1x16x16x4xbf16>
    %51 = vector.shape_cast %50 : vector<1x16x16x4xbf16> to vector<16x16x4xbf16>
    %52 = vector.shape_cast %51 : vector<16x16x4xbf16> to vector<256x4xbf16>
    %c7 = arith.constant 7 : index
    %c0_53 = arith.constant 0 : index
    %c0_54 = arith.constant 0 : index
    %53 = vector.load %arg3[%c7, %c0_53, %c0_54] : memref<9x4x128xbf16, #tpu.memory_space<vmem>>, vector<1x4x128xbf16>
    %54 = vector.shape_cast %53 : vector<1x4x128xbf16> to vector<4x128xbf16>
    %cst_55 = arith.constant dense<0.000000e+00> : vector<256x128xf32>
    %55 = tpu.matmul %52, %54, %cst_55 {dimension_numbers = #tpu.dot_dimension_numbers<[1], [0], [0], [1], [0, 0, 1, 1], [], []>} : vector<256x4xbf16>, vector<4x128xbf16>, vector<256x128xf32> -> vector<256x128xf32>
    %56 = arith.addf %49, %55 : vector<256x128xf32>
    %c0_56 = arith.constant 0 : index
    %c2_57 = arith.constant 2 : index
    %c2_58 = arith.constant 2 : index
    %c0_59 = arith.constant 0 : index
    %57 = vector.load %arg2[%c0_56, %c2_57, %c2_58, %c0_59] : memref<1x18x18x4xbf16, #tpu.memory_space<vmem>>, vector<1x16x16x4xbf16>
    %58 = vector.shape_cast %57 : vector<1x16x16x4xbf16> to vector<16x16x4xbf16>
    %59 = vector.shape_cast %58 : vector<16x16x4xbf16> to vector<256x4xbf16>
    %c8 = arith.constant 8 : index
    %c0_60 = arith.constant 0 : index
    %c0_61 = arith.constant 0 : index
    %60 = vector.load %arg3[%c8, %c0_60, %c0_61] : memref<9x4x128xbf16, #tpu.memory_space<vmem>>, vector<1x4x128xbf16>
    %61 = vector.shape_cast %60 : vector<1x4x128xbf16> to vector<4x128xbf16>
    %cst_62 = arith.constant dense<0.000000e+00> : vector<256x128xf32>
    %62 = tpu.matmul %59, %61, %cst_62 {dimension_numbers = #tpu.dot_dimension_numbers<[1], [0], [0], [1], [0, 0, 1, 1], [], []>} : vector<256x4xbf16>, vector<4x128xbf16>, vector<256x128xf32> -> vector<256x128xf32>
    %63 = arith.addf %56, %62 : vector<256x128xf32>
    %c0_i32 = arith.constant 0 : i32
    %64 = arith.cmpi eq, %arg0, %c0_i32 : i32
    %65 = arith.extui %64 : i1 to i32
    %c0_i32_63 = arith.constant 0 : i32
    %66 = arith.cmpi ne, %65, %c0_i32_63 : i32
    scf.if %66 {
      %c0_i32_65 = arith.constant 0 : i32
      %70 = arith.cmpi eq, %arg1, %c0_i32_65 : i32
      %71 = arith.extui %70 : i1 to i32
      %c0_i32_66 = arith.constant 0 : i32
      %72 = arith.cmpi ne, %71, %c0_i32_66 : i32
      scf.if %72 {
        %cst_79 = arith.constant 0.000000e+00 : f32
        %87 = vector.broadcast %cst_79 : f32 to vector<1x128xf32>
        %c0_80 = arith.constant 0 : index
        %c0_81 = arith.constant 0 : index
        %88 = vector.load %arg7[%c0_80, %c0_81] : memref<1x128xf32, #tpu.memory_space<vmem>>, vector<1x128xf32>
        tpu.vector_store %arg7[%c0_80, %c0_81], %87 {strides = array<i32>} : memref<1x128xf32, #tpu.memory_space<vmem>>, vector<1x128xf32>,
        %cst_82 = arith.constant 0.000000e+00 : f32
        %89 = vector.broadcast %cst_82 : f32 to vector<1x128xf32>
        %c0_83 = arith.constant 0 : index
        %c0_84 = arith.constant 0 : index
        %90 = vector.load %arg8[%c0_83, %c0_84] : memref<1x128xf32, #tpu.memory_space<vmem>>, vector<1x128xf32>
        tpu.vector_store %arg8[%c0_83, %c0_84], %89 {strides = array<i32>} : memref<1x128xf32, #tpu.memory_space<vmem>>, vector<1x128xf32>,
      } else {
      }
      %c0_67 = arith.constant 0 : index
      %c0_68 = arith.constant 0 : index
      %73 = vector.load %arg7[%c0_67, %c0_68] : memref<1x128xf32, #tpu.memory_space<vmem>>, vector<1x128xf32>
      %cst_69 = arith.constant dense<0.000000e+00> : vector<128xf32>
      %74 = vector.multi_reduction <add>, %63, %cst_69 [0] : vector<256x128xf32> to vector<128xf32>
      %75 = vector.shape_cast %74 : vector<128xf32> to vector<1x128xf32>
      %76 = arith.addf %73, %75 : vector<1x128xf32>
      %c0_70 = arith.constant 0 : index
      %c0_71 = arith.constant 0 : index
      %77 = vector.load %arg7[%c0_70, %c0_71] : memref<1x128xf32, #tpu.memory_space<vmem>>, vector<1x128xf32>
      tpu.vector_store %arg7[%c0_70, %c0_71], %76 {strides = array<i32>} : memref<1x128xf32, #tpu.memory_space<vmem>>, vector<1x128xf32>,
      %c0_72 = arith.constant 0 : index
      %c0_73 = arith.constant 0 : index
      %78 = vector.load %arg8[%c0_72, %c0_73] : memref<1x128xf32, #tpu.memory_space<vmem>>, vector<1x128xf32>
      %79 = arith.mulf %63, %63 : vector<256x128xf32>
      %cst_74 = arith.constant dense<0.000000e+00> : vector<128xf32>
      %80 = vector.multi_reduction <add>, %79, %cst_74 [0] : vector<256x128xf32> to vector<128xf32>
      %81 = vector.shape_cast %80 : vector<128xf32> to vector<1x128xf32>
      %82 = arith.addf %78, %81 : vector<1x128xf32>
      %c0_75 = arith.constant 0 : index
      %c0_76 = arith.constant 0 : index
      %83 = vector.load %arg8[%c0_75, %c0_76] : memref<1x128xf32, #tpu.memory_space<vmem>>, vector<1x128xf32>
      tpu.vector_store %arg8[%c0_75, %c0_76], %82 {strides = array<i32>} : memref<1x128xf32, #tpu.memory_space<vmem>>, vector<1x128xf32>,
      %c1_i32_77 = arith.constant 1 : i32
      %84 = arith.cmpi eq, %arg1, %c1_i32_77 : i32
      %85 = arith.extui %84 : i1 to i32
      %c0_i32_78 = arith.constant 0 : i32
      %86 = arith.cmpi ne, %85, %c0_i32_78 : i32
      scf.if %86 {
        %c0_79 = arith.constant 0 : index
        %c0_80 = arith.constant 0 : index
        %87 = vector.load %arg7[%c0_79, %c0_80] : memref<1x128xf32, #tpu.memory_space<vmem>>, vector<1x128xf32>
        %cst_81 = arith.constant 0.001953125 : f32
        %88 = vector.broadcast %cst_81 : f32 to vector<1x128xf32>
        %89 = arith.mulf %87, %88 : vector<1x128xf32>
        %c0_82 = arith.constant 0 : index
        %c0_83 = arith.constant 0 : index
        %90 = vector.load %arg8[%c0_82, %c0_83] : memref<1x128xf32, #tpu.memory_space<vmem>>, vector<1x128xf32>
        %cst_84 = arith.constant 0.001953125 : f32
        %91 = vector.broadcast %cst_84 : f32 to vector<1x128xf32>
        %92 = arith.mulf %90, %91 : vector<1x128xf32>
        %93 = arith.mulf %89, %89 : vector<1x128xf32>
        %94 = arith.subf %92, %93 : vector<1x128xf32>
        %cst_85 = arith.constant 0.000000e+00 : f32
        %95 = vector.broadcast %cst_85 : f32 to vector<1x128xf32>
        %96 = arith.maximumf %94, %95 : vector<1x128xf32>
        %c0_86 = arith.constant 0 : index
        %c0_87 = arith.constant 0 : index
        %97 = vector.load %arg4[%c0_86, %c0_87] : memref<1x128xf32, #tpu.memory_space<vmem>>, vector<1x128xf32>
        %cst_88 = arith.constant 9.99999974E-6 : f32
        %98 = vector.broadcast %cst_88 : f32 to vector<1x128xf32>
        %99 = arith.addf %96, %98 : vector<1x128xf32>
        %100 = math.rsqrt %99 : vector<1x128xf32>
        %101 = arith.mulf %97, %100 : vector<1x128xf32>
        %c0_89 = arith.constant 0 : index
        %c0_90 = arith.constant 0 : index
        %102 = vector.load %arg9[%c0_89, %c0_90] : memref<1x128xf32, #tpu.memory_space<vmem>>, vector<1x128xf32>
        tpu.vector_store %arg9[%c0_89, %c0_90], %101 {strides = array<i32>} : memref<1x128xf32, #tpu.memory_space<vmem>>, vector<1x128xf32>,
        %c0_91 = arith.constant 0 : index
        %c0_92 = arith.constant 0 : index
        %103 = vector.load %arg5[%c0_91, %c0_92] : memref<1x128xf32, #tpu.memory_space<vmem>>, vector<1x128xf32>
        %104 = arith.mulf %89, %101 : vector<1x128xf32>
        %105 = arith.subf %103, %104 : vector<1x128xf32>
        %c0_93 = arith.constant 0 : index
        %c0_94 = arith.constant 0 : index
        %106 = vector.load %arg10[%c0_93, %c0_94] : memref<1x128xf32, #tpu.memory_space<vmem>>, vector<1x128xf32>
        tpu.vector_store %arg10[%c0_93, %c0_94], %105 {strides = array<i32>} : memref<1x128xf32, #tpu.memory_space<vmem>>, vector<1x128xf32>,
      } else {
      }
    } else {
    }
    %c1_i32 = arith.constant 1 : i32
    %67 = arith.cmpi eq, %arg0, %c1_i32 : i32
    %68 = arith.extui %67 : i1 to i32
    %c0_i32_64 = arith.constant 0 : i32
    %69 = arith.cmpi ne, %68, %c0_i32_64 : i32
    scf.if %69 {
      %c0_65 = arith.constant 0 : index
      %c0_66 = arith.constant 0 : index
      %70 = vector.load %arg9[%c0_65, %c0_66] : memref<1x128xf32, #tpu.memory_space<vmem>>, vector<1x128xf32>
      %71 = vector.broadcast %70 : vector<1x128xf32> to vector<256x128xf32>
      %72 = arith.mulf %63, %71 : vector<256x128xf32>
      %c0_67 = arith.constant 0 : index
      %c0_68 = arith.constant 0 : index
      %73 = vector.load %arg10[%c0_67, %c0_68] : memref<1x128xf32, #tpu.memory_space<vmem>>, vector<1x128xf32>
      %74 = vector.broadcast %73 : vector<1x128xf32> to vector<256x128xf32>
      %75 = arith.addf %72, %74 : vector<256x128xf32>
      %76 = arith.negf %75 : vector<256x128xf32>
      %77 = math.exp %76 : vector<256x128xf32>
      %cst_69 = arith.constant 1.000000e+00 : f32
      %78 = vector.broadcast %cst_69 : f32 to vector<256x128xf32>
      %79 = arith.addf %78, %77 : vector<256x128xf32>
      %80 = arith.divf %78, %79 : vector<256x128xf32>
      %81 = arith.mulf %75, %80 : vector<256x128xf32>
      %c0_70 = arith.constant 0 : index
      %c0_71 = arith.constant 0 : index
      %c0_72 = arith.constant 0 : index
      %82 = vector.load %arg6[%c0_70, %c0_71, %c0_72] : memref<1x256x128xf32, #tpu.memory_space<vmem>>, vector<1x256x128xf32>
      %83 = vector.shape_cast %82 : vector<1x256x128xf32> to vector<256x128xf32>
      %84 = vector.shape_cast %81 : vector<256x128xf32> to vector<1x256x128xf32>
      tpu.vector_store %arg6[%c0_70, %c0_71, %c0_72], %84 {strides = array<i32>} : memref<1x256x128xf32, #tpu.memory_space<vmem>>, vector<1x256x128xf32>,
    } else {
    }
    return
  }
  func.func @transform_0(%arg0: i32, %arg1: i32) -> (i32, i32, i32, i32) {
    %c0_i32 = arith.constant 0 : i32
    %c0_i32_0 = arith.constant 0 : i32
    %c0_i32_1 = arith.constant 0 : i32
    %c0_i32_2 = arith.constant 0 : i32
    return %arg1, %c0_i32, %c0_i32_0, %c0_i32_1 : i32, i32, i32, i32
  }
  func.func @transform_1(%arg0: i32, %arg1: i32) -> (i32, i32, i32) {
    %c0_i32 = arith.constant 0 : i32
    %c0_i32_0 = arith.constant 0 : i32
    %c0_i32_1 = arith.constant 0 : i32
    %c0_i32_2 = arith.constant 0 : i32
    return %c0_i32, %c0_i32_0, %c0_i32_1 : i32, i32, i32
  }
  func.func @transform_2(%arg0: i32, %arg1: i32) -> (i32, i32) {
    %c0_i32 = arith.constant 0 : i32
    %c0_i32_0 = arith.constant 0 : i32
    %c0_i32_1 = arith.constant 0 : i32
    return %c0_i32, %c0_i32_0 : i32, i32
  }
  func.func @transform_3(%arg0: i32, %arg1: i32) -> (i32, i32) {
    %c0_i32 = arith.constant 0 : i32
    %c0_i32_0 = arith.constant 0 : i32
    %c0_i32_1 = arith.constant 0 : i32
    return %c0_i32, %c0_i32_0 : i32, i32
  }
  func.func @transform_4(%arg0: i32, %arg1: i32) -> (i32, i32, i32) {
    %0 = arith.muli %arg0, %arg1 : i32
    %c0_i32 = arith.constant 0 : i32
    %c0_i32_0 = arith.constant 0 : i32
    %c0_i32_1 = arith.constant 0 : i32
    return %0, %c0_i32, %c0_i32_0 : i32, i32, i32
  }
}

</mosaic_0001>

<bundles_post_ra>
// kernel: conv2d_layer_forward.1
= control target key start
LH: loop header
LB: loop body
LE: loop exit
PB: predicated region body
PF: predicated region fallthrough
CT: control target
= control target key end

     0   :  { %s6669_s15 = smov 0   ;;  %s6671_s16 = smov 0   ;;  %s9632_s0 = inlined_call_operand.vmem [shape: bf16[2,18,18,4], index: 0, kind: input, shape index: {}]   ;;  %s9633_s1 = inlined_call_operand.vmem [shape: bf16[9,4,128], index: 1, kind: input, shape index: {}]   ;;  %s9634_s2 = inlined_call_operand.vmem [shape: f32[1,128], index: 2, kind: input, shape index: {}]   ;;  %s9635_s3 = inlined_call_operand.vmem [shape: f32[1,128], index: 3, kind: input, shape index: {}]   ;;  %s9636_s4 = inlined_call_operand.vmem [shape: f32[2,256,128], index: 4, kind: output, shape index: {}]  }
   0x1   :  { %s6673_s17 = smov 0   ;;  %s6675_s18 = smov 0  }
   0x2   :  { %s6677_s19 = smov 0  }
   0x3 LB: > { %s23_s20 = sadd.s32 1, %s6633_s17  ;;  %s26_s21 = sadd.s32 1, %s6637_s18  ;;  %s6641_s19 = sphi %s6677_s19, %s14_s19   ;;  %s6637_s18 = sphi %s6675_s18, %s9830_s18   ;;  %s6633_s17 = sphi %s6673_s17, %s9829_s17   ;;  %s6629_s16 = sphi %s6671_s16, %s9828_s16   ;;  %s6625_s15 = sphi %s6669_s15, %s9827_s15  }
   0x4   : > { %p24_p0 = scmp.ge.s32.totalorder %s23_s20, 2  ;;  %p5329_p1 = scmp.ge.s32.totalorder %s6641_s19, 1 }
   0x5   : > { %p176_p2 = scmp.lt.s32.totalorder %s6641_s19, 5 }
   0x6   : > { %s9832_s20 = smov (%p24_p0, %s23_s20), 0  ;;  %s9834_s21 = smov (!%p24_p0, %s26_s21), %s6637_s18 }
   0x7   : > { %p177_p3 = pnand %p5329_p1, %p176_p2  ;;  %p28_p4 = scmp.ge.s32.totalorder %s9834_s21, 2 }
   0x9   : > { %s9836_s21 = smov (%p28_p4, %s9834_s21), 0  ;;  %180 = sbr.rel (%p177_p3) target bundleno = 771 (0x303), region = 36 }
   0xe   : > { %v5333_v0 = vld [vmem:[%s9633_s1 + $0x2] sm:$0x3]  ;;  %vm751_vm0 = vcmask 1041408   ;;  %s208_s24 = smul.u32 %s6625_s15, %s6629_s16  ;;  %p203_p5 = scmp.lt.s32.totalorder %s6625_s15, 1  ;;  %v248_v2 = vld [vmem:[%s9633_s1] sm:$0x3] }
   0xf   : > { %6372 = vmatprep.subr.msk.bf16.mxu1 %vm751_vm0, %v5333_v0  ;;  %6371 = vmatprep.subr.msk.bf16.mxu0 %vm751_vm0, %v5333_v0  ;;  %v753_v1 = vsel %vm751_vm0, %v5333_v0, 0  ;;  %v5414_v3 = vld [vmem:[%s9633_s1 + $0x4] sm:$0x3]  ;;  %vm265_vm1 = vsmask.f32 3328  ;;  %v6732_v4 = vsel %vm751_vm0, %v248_v2, 0 }
  0x10   : > { %p209_p6 = scmp.lt.s32.totalorder %s208_s24, 1  ;;  %6370 = vmatpush3.bf16.msra.mxu1 %v753_v1  ;;  %6064 = vmatpush3.bf16.msra.mxu0 %v753_v1  ;;  %vm266_vm2 = vsmask.f32 7440  ;;  %vm702_vm3 = vcmask 31744   ;;  %v6758_v16 = vsel %vm751_vm0, %v5414_v3, 0  ;;  %vm1256_vm5 = vcmask 1042432  }
  0x11   : > { %s204_s29 = scalar_select %p203_p5, %s6625_s15, 1  ;;  %6373 = vmatprep.subr.msk.bf16.mxu1 %vm751_vm0, %v248_v2  ;;  %6374 = vmatprep.subr.msk.bf16.mxu0 %vm751_vm0, %v5414_v3  ;;  %vm6773_vm4 = vmor %vm265_vm1, %vm266_vm2  ;;  %vm1257_vm6 = vcmask 1046532  }
  0x12   : > { %s9838_s24 = smov (!%p209_p6, %s208_s24), 1  ;;  %vm7059_vm7 = vmor %vm1256_vm5, %vm1257_vm6  ;;  %p5869_p7 = scmp.ne.s32.totalorder %s6629_s16, 0 }
  0x13   : > { %s6381_s30 = smul.u32 216, %s204_s29  ;;  %s5909_s5 = sshll.u32 %s9838_s24, 8 }
  0x14   : > { %s6724_s8 = scalar_lea.vmem %s9636_s4, %s5909_s5  ;;  %p5870_p8 = scmp.ne.s32.totalorder (!%p5869_p7), %s6625_s15, 0 }
  0x15   : > { %s6729_s11 = scalar_lea.vmem %s9632_s0, %s6381_s30 }
  0x16   : > { %v6735_v5 = vld [vmem:[%s6729_s11] sm:$0xf]  ;;  %v6738_v6 = vld [vmem:[%s6729_s11 + $0x4] sm:$0xf]  ;;  %v6741_v7 = vld [vmem:[%s6729_s11 + $0x8] sm:$0x1] }
  0x17   : > { %v269_v8 = vshrl.u32 %v6735_v5, 16  ;;  %v272_v9 = vshll.u32 %v6735_v5, 16  ;;  %v278_v10 = vshll.u32 %v6738_v6, 16  ;;  %v282_v11 = vshrl.u32 %v6738_v6, 16  ;;  %v6748_v12 = vld [vmem:[%s6729_s11 + $0x60] sm:$0xf] }
  0x18   : > { %v288_v13 = vshll.u32 %v6741_v7, 16  ;;  %v6752_v14 = vld [vmem:[%s6729_s11 + $0x64] sm:$0xf]  ;;  %v6755_v15 = vld [vmem:[%s6729_s11 + $0x68] sm:$0x1]  ;;  %v461_v22 = vshrl.u32 %v6748_v12, 16 }
  0x19   : > { %v271_v17 = vrot.slane %v269_v8, 4  ;;  %v274_v18 = vrot.slane %v272_v9, 5  ;;  %v280_v19 = vrot.slane %v278_v10, 5  ;;  %v284_v20 = vrot.slane %v282_v11, 4  ;;  %v6766_v29 = vld [vmem:[%s6729_s11 + $0xc] sm:$0xf] }
  0x1a   : > { %v290_v21 = vrot.slane %v288_v13, 5  ;;  %v464_v23 = vshll.u32 %v6748_v12, 16  ;;  %v470_v24 = vshll.u32 %v6752_v14, 16  ;;  %v474_v27 = vshrl.u32 %v6752_v14, 16  ;;  %v6769_v30 = vld [vmem:[%s6729_s11 + $0x10] sm:$0xf] }
  0x1b   : > { %v275_v25 = vor.u32 %v274_v18, %v271_v17  ;;  %v285_v26 = vor.u32 %v284_v20, %v280_v19  ;;  %v480_v28 = vshll.u32 %v6755_v15, 16  ;;  %v463_v33 = vrot.slane %v461_v22, 4  ;;  %v6779_v41 = vld [vmem:[%s6729_s11 + $0x14] sm:$0x1]  ;;  %v6790_v53 = vld [vmem:[%s6729_s11 + $0x6c] sm:$0xf] }
  0x1c   : > { %v466_v34 = vrot.slane %v464_v23, 5  ;;  %v472_v35 = vrot.slane %v470_v24, 5  ;;  %v476_v38 = vrot.slane %v474_v27, 4  ;;  %v293_v42 = vshrl.u32 %v6766_v29, 16  ;;  %v6794_v58 = vld [vmem:[%s6729_s11 + $0x70] sm:$0xf] }
  0x1d   : > { %v276_v36 = vrot.slane %v275_v25, 4  ;;  %v286_v37 = vrot.slane %v285_v26, 4  ;;  %v482_v39 = vrot.slane %v480_v28, 5  ;;  %v296_v43 = vshll.u32 %v6766_v29, 16  ;;  %v6802_v63 = vld [vmem:[%s6729_s11 + $0x74] sm:$0x1] }
  0x1e   : > { %v467_v40 = vor.u32 %v466_v34, %v463_v33  ;;  %v302_v44 = vshll.u32 %v6769_v30, 16  ;;  %v477_v47 = vor.u32 %v476_v38, %v472_v35  ;;  %v306_v48 = vshrl.u32 %v6769_v30, 16  ;;  %v6808_v8 = vld [vmem:[%s6729_s11 + $0x18] sm:$0xf]  ;;  %v6821_v25 = vld [vmem:[%s6729_s11 + $0x20] sm:$0x1] }
  0x1f   : > { %v281_v45 = vsel %vm6773_vm4, %v276_v36, %v280_v19  ;;  %v291_v46 = vsel %vm6773_vm4, %v286_v37, %v290_v21  ;;  %v295_v51 = vrot.slane %v293_v42, 4  ;;  %v298_v52 = vrot.slane %v296_v43, 5  ;;  %v6815_v21 = vld [vmem:[%s6729_s11 + $0x1c] sm:$0xf] }
  0x20   : > { %v5334_v49 = vcombine.low %v281_v45, %v291_v46  ;;  %v468_v50 = vrot.slane %v467_v40, 4  ;;  %v478_v54 = vrot.slane %v477_v47, 4  ;;  %v304_v55 = vrot.slane %v302_v44, 5  ;;  %v6834_v40 = vld [vmem:[%s9633_s1 + $0x8] sm:$0x3] }
  0x21   : > { %v308_v56 = vrot.slane %v306_v48, 4  ;;  %v312_v57 = vshll.u32 %v6779_v41, 16  ;;  %v299_v60 = vor.u32 %v298_v52, %v295_v51  ;;  %v485_v3 = vshrl.u32 %v6790_v53, 16  ;;  %v6839_v46 = vld [vmem:[%s6729_s11 + $0x7c] sm:$0xf] }
  0x22   : > { %6065 = vmatprep.mubr.msk.bf16.mxu0 %vm702_vm3, %v5334_v49  ;;  %v473_v59 = vsel %vm6773_vm4, %v468_v50, %v472_v35  ;;  %v483_v0 = vsel %vm6773_vm4, %v478_v54, %v482_v39  ;;  %v488_v11 = vshll.u32 %v6790_v53, 16  ;;  %v494_v13 = vshll.u32 %v6794_v58, 16  ;;  %v6828_v35 = vld [vmem:[%s6729_s11 + $0x78] sm:$0xf] }
  0x23   : > { %v309_v1 = vor.u32 %v308_v56, %v304_v55  ;;  %v314_v2 = vrot.slane %v312_v57, 5  ;;  %v5342_v9 = vcombine.low %v473_v59, %v483_v0  ;;  %v300_v10 = vrot.slane %v299_v60, 4  ;;  %v6846_v56 = vld [vmem:[%s6729_s11 + $0x80] sm:$0x1] }
  0x24   : > { %v487_v18 = vrot.slane %v485_v3, 4  ;;  %v498_v19 = vshrl.u32 %v6794_v58, 16  ;;  %v504_v20 = vshll.u32 %v6802_v63, 16  ;;  %v490_v23 = vrot.slane %v488_v11, 5  ;;  %9672 = vst [vmem:[#allocation6_spill] sm:$0xff] %v6846_v56 }
  0x25   : > { %v310_v17 = vrot.slane %v309_v1, 4  ;;  %6081 = vmatprep.mubr.msk.bf16.mxu1 %vm702_vm3, %v5342_v9  ;;  %v305_v22 = vsel %vm6773_vm4, %v300_v10, %v304_v55  ;;  %v496_v24 = vrot.slane %v494_v13, 5  ;;  %v317_v26 = vshrl.u32 %v6808_v8, 16  ;;  %v6852_v1 = vld [vmem:[%s6729_s11 + $0x24] sm:$0xf] }
  0x26   : > { %v500_v28 = vrot.slane %v498_v19, 4  ;;  %v506_v33 = vrot.slane %v504_v20, 5  ;;  %v320_v34 = vshll.u32 %v6808_v8, 16  ;;  %v491_v37 = vor.u32 %v490_v23, %v487_v18  ;;  %v6860_v10 = vld [vmem:[%s6729_s11 + $0x28] sm:$0xf] }
  0x27   : > { %v315_v27 = vsel %vm6773_vm4, %v310_v17, %v314_v2  ;;  %v319_v38 = vrot.slane %v317_v26, 4  ;;  %v326_v39 = vshll.u32 %v6815_v21, 16  ;;  %v330_v44 = vshrl.u32 %v6815_v21, 16  ;;  %v6866_v19 = vld [vmem:[%s9633_s1 + $0x6] sm:$0x3] }
  0x28   : > { %v5335_v36 = vcombine.low %v305_v22, %v315_v27  ;;  %v501_v42 = vor.u32 %v500_v28, %v496_v24  ;;  %v322_v43 = vrot.slane %v320_v34, 5  ;;  %v336_v45 = vshll.u32 %v6821_v25, 16 }
  0x29   : > { %v492_v47 = vrot.slane %v491_v37, 4  ;;  %v328_v48 = vrot.slane %v326_v39, 5  ;;  %v509_v49 = vshrl.u32 %v6828_v35, 16  ;;  %v512_v50 = vshll.u32 %v6828_v35, 16 }
  0x2a   : > { %6066 = vmatmul.mubr.msk.bf16.vlgmr.msra.gmra.mxu0 %vm702_vm3, %v5335_v36  ;;  %v502_v51 = vrot.slane %v501_v42, 4  ;;  %v323_v52 = vor.u32 %v322_v43, %v319_v38  ;;  %v332_v54 = vrot.slane %v330_v44, 4  ;;  %v338_v55 = vrot.slane %v336_v45, 5  ;;  %v6878_v36 = vld [vmem:[%s6729_s11 + $0x84] sm:$0xf] }
  0x2b   : > { %6132 = vmatpush3.bf16.msra.mxu0 %v6758_v16  ;;  %v497_v57 = vsel %vm6773_vm4, %v492_v47, %v496_v24  ;;  %v511_v59 = vrot.slane %v509_v49, 4  ;;  %v514_v60 = vrot.slane %v512_v50, 5  ;;  %v518_v0 = vshll.u32 %v6839_v46, 16  ;;  %v6871_v24 = vld [vmem:[%s6729_s11 + $0x2c] sm:$0x1] }
  0x2c   : > { %6376 = vmatprep.subr.msk.bf16.mxu0 %vm751_vm0, %v6834_v40  ;;  %v507_v16 = vsel %vm6773_vm4, %v502_v51, %v506_v33  ;;  %v324_v2 = vrot.slane %v323_v52, 4  ;;  %v333_v3 = vor.u32 %v332_v54, %v328_v48  ;;  %v522_v9 = vshrl.u32 %v6839_v46, 16  ;;  %v6885_v43 = vld [vmem:[%s6729_s11 + $0x88] sm:$0xf]  ;;  %v6893_v51 = vld [vmem:[%s6729_s11 + $0x8c] sm:$0x1] }
  0x2d   : > { %v5343_v11 = vcombine.low %v497_v57, %v507_v16  ;;  %v515_v13 = vor.u32 %v514_v60, %v511_v59  ;;  %v520_v17 = vrot.slane %v518_v0, 5  ;;  %v528_v18 = vshll.u32 %v6846_v56, 16  ;;  %9673 = vst [vmem:[#allocation7_spill] sm:$0xff] %v6893_v51  ;;  %v6901_v60 = vld [vmem:[%s6729_s11 + $0x30] sm:$0xf] }
  0x2e   : > { %v329_v20 = vsel %vm6773_vm4, %v324_v2, %v328_v48  ;;  %v334_v22 = vrot.slane %v333_v3, 4  ;;  %v524_v23 = vrot.slane %v522_v9, 4  ;;  %v341_v26 = vshrl.u32 %v6852_v1, 16  ;;  %v6906_v9 = vld [vmem:[%s6729_s11 + $0x34] sm:$0xf] }
  0x2f   : > { %6082 = vmatmul.mubr.msk.bf16.vlgmr.msra.gmra.mxu1 %vm702_vm3, %v5343_v11  ;;  %v516_v27 = vrot.slane %v515_v13, 4  ;;  %v530_v28 = vrot.slane %v528_v18, 5  ;;  %v344_v33 = vshll.u32 %v6852_v1, 16  ;;  %v350_v34 = vshll.u32 %v6860_v10, 16 }
  0x30   : > { %6098 = vmatpush3.bf16.msra.mxu1 %v6732_v4  ;;  %v339_v37 = vsel %vm6773_vm4, %v334_v22, %v338_v55  ;;  %v525_v38 = vor.u32 %v524_v23, %v520_v17  ;;  %v343_v39 = vrot.slane %v341_v26, 4  ;;  %v354_v42 = vshrl.u32 %v6860_v10, 16 }
  0x31   : > { %v5336_v44 = vcombine.low %v329_v20, %v339_v37  ;;  %v521_v45 = vsel %vm6773_vm4, %v516_v27, %v520_v17  ;;  %v346_v47 = vrot.slane %v344_v33, 5  ;;  %v352_v48 = vrot.slane %v350_v34, 5  ;;  %6375 = vmatprep.subr.msk.bf16.mxu1 %vm751_vm0, %v6866_v19  ;;  %v6914_v33 = vld [vmem:[%s6729_s11 + $0x38] sm:$0x1] }
  0x32   : > { %v526_v4 = vrot.slane %v525_v38, 4  ;;  %v356_v49 = vrot.slane %v354_v42, 4  ;;  %v360_v50 = vshll.u32 %v6871_v24, 16  ;;  %v533_v52 = vshrl.u32 %v6878_v36, 16  ;;  %v6919_v38 = vld [vmem:[%s6729_s11 + $0x90] sm:$0xf] }
  0x33   : > { %6069 = vmatprep.mubr.msk.bf16.mxu0 %vm702_vm3, %v5336_v44  ;;  %v347_v54 = vor.u32 %v346_v47, %v343_v39  ;;  %v536_v55 = vshll.u32 %v6878_v36, 16  ;;  %v542_v57 = vshll.u32 %v6885_v43, 16  ;;  %v546_v59 = vshrl.u32 %v6885_v43, 16  ;;  %9674 = vst [vmem:[#allocation8_spill] sm:$0xff] %v6919_v38  ;;  %v6924_v47 = vld [vmem:[%s6729_s11 + $0x94] sm:$0xf] }
  0x34   : > { %v531_v0 = vsel %vm6773_vm4, %v526_v4, %v530_v28  ;;  %v357_v16 = vor.u32 %v356_v49, %v352_v48  ;;  %v362_v2 = vrot.slane %v360_v50, 5  ;;  %v535_v3 = vrot.slane %v533_v52, 4  ;;  %9675 = vst [vmem:[#allocation9_spill] sm:$0xff] %v6924_v47 }
  0x35   : > { %v5344_v11 = vcombine.low %v521_v45, %v531_v0  ;;  %v348_v13 = vrot.slane %v347_v54, 4  ;;  %v538_v17 = vrot.slane %v536_v55, 5  ;;  %v544_v18 = vrot.slane %v542_v57, 5 }
  0x36   : > { %v358_v20 = vrot.slane %v357_v16, 4  ;;  %v548_v22 = vrot.slane %v546_v59, 4  ;;  %v552_v23 = vshll.u32 %v6893_v51, 16  ;;  %v365_v26 = vshrl.u32 %v6901_v60, 16  ;;  %v6933_v16 = vld [vmem:[%s6729_s11 + $0x98] sm:$0x1] }
  0x37   : > { %6085 = vmatprep.mubr.msk.bf16.mxu1 %vm702_vm3, %v5344_v11  ;;  %v353_v27 = vsel %vm6773_vm4, %v348_v13, %v352_v48  ;;  %v539_v28 = vor.u32 %v538_v17, %v535_v3  ;;  %v368_v34 = vshll.u32 %v6901_v60, 16  ;;  %v374_v37 = vshll.u32 %v6906_v9, 16  ;;  %9676 = vst [vmem:[#allocation10_spill] sm:$0xff] %v6933_v16  ;;  %v6938_v11 = vld [vmem:[%s6729_s11 + $0x3c] sm:$0xf] }
  0x38   : > { %v363_v39 = vsel %vm6773_vm4, %v358_v20, %v362_v2  ;;  %v549_v42 = vor.u32 %v548_v22, %v544_v18  ;;  %v554_v44 = vrot.slane %v552_v23, 5  ;;  %v367_v45 = vrot.slane %v365_v26, 4  ;;  %v6943_v23 = vld [vmem:[%s6729_s11 + $0x40] sm:$0xf]  ;;  %v1209_v51 = vld [vmem:[%s6729_s11 + $0xc] sm:$0xe] }
  0x39   : > { %v5337_v48 = vcombine.low %v353_v27, %v363_v39  ;;  %v540_v4 = vrot.slane %v539_v28, 4  ;;  %v370_v49 = vrot.slane %v368_v34, 5  ;;  %v376_v50 = vrot.slane %v374_v37, 5 }
  0x3a   : > { %v550_v52 = vrot.slane %v549_v42, 4  ;;  %v378_v54 = vshrl.u32 %v6906_v9, 16  ;;  %v384_v55 = vshll.u32 %v6914_v33, 16  ;;  %v557_v57 = vshrl.u32 %v6919_v38, 16 }
  0x3b   : > { %6070 = vmatmul.mubr.msk.bf16.gmra.mxu0 %vm702_vm3, %v5337_v48  ;;  %v545_v59 = vsel %vm6773_vm4, %v540_v4, %v544_v18  ;;  %v371_v0 = vor.u32 %v370_v49, %v367_v45  ;;  %v560_v2 = vshll.u32 %v6919_v38, 16  ;;  %v566_v3 = vshll.u32 %v6924_v47, 16  ;;  %v6952_v48 = vld [vmem:[%s6729_s11 + $0x44] sm:$0x1] }
  0x3c   : > { %v555_v13 = vsel %vm6773_vm4, %v550_v52, %v554_v44  ;;  %v380_v17 = vrot.slane %v378_v54, 4  ;;  %v386_v20 = vrot.slane %v384_v55, 5  ;;  %v559_v22 = vrot.slane %v557_v57, 4  ;;  %v6957_v52 = vld [vmem:[%s6729_s11 + $0x9c] sm:$0xf] }
  0x3d   : > { %v5345_v18 = vcombine.low %v545_v59, %v555_v13  ;;  %v372_v26 = vrot.slane %v371_v0, 4  ;;  %v562_v27 = vrot.slane %v560_v2, 5  ;;  %v568_v28 = vrot.slane %v566_v3, 5  ;;  %9677 = vst [vmem:[#allocation11_spill] sm:$0xff] %v6957_v52  ;;  %v6961_v13 = vld [vmem:[%s6729_s11 + $0xa0] sm:$0xf] }
  0x3e   : > { %v381_v34 = vor.u32 %v380_v17, %v376_v50  ;;  %v570_v37 = vshrl.u32 %v6924_v47, 16  ;;  %v576_v39 = vshll.u32 %v6933_v16, 16  ;;  %v389_v42 = vshrl.u32 %v6938_v11, 16  ;;  %9678 = vst [vmem:[#allocation12_spill] sm:$0xff] %v6961_v13 }
  0x3f   : > { %6086 = vmatmul.mubr.msk.bf16.gmra.mxu1 %vm702_vm3, %v5345_v18  ;;  %v377_v44 = vsel %vm6773_vm4, %v372_v26, %v376_v50  ;;  %v563_v45 = vor.u32 %v562_v27, %v559_v22  ;;  %v392_v4 = vshll.u32 %v6938_v11, 16  ;;  %v398_v49 = vshll.u32 %v6943_v23, 16  ;;  %v6967_v26 = vld [vmem:[%s6729_s11 + $0xa4] sm:$0x1] }
  0x40   : > { %v382_v54 = vrot.slane %v381_v34, 4  ;;  %v572_v55 = vrot.slane %v570_v37, 4  ;;  %v578_v57 = vrot.slane %v576_v39, 5  ;;  %v391_v59 = vrot.slane %v389_v42, 4  ;;  %9679 = vst [vmem:[#allocation13_spill] sm:$0xff] %v6967_v26 }
  0x41   : > { %v564_v0 = vrot.slane %v563_v45, 4  ;;  %v394_v2 = vrot.slane %v392_v4, 5  ;;  %v400_v3 = vrot.slane %v398_v49, 5  ;;  %v402_v50 = vshrl.u32 %v6943_v23, 16  ;;  %v6971_v34 = vld [vmem:[%s6729_s11 + $0x48] sm:$0xf] }
  0x42   : > { %v387_v17 = vsel %vm6773_vm4, %v382_v54, %v386_v20  ;;  %v573_v22 = vor.u32 %v572_v55, %v568_v28  ;;  %v408_v18 = vshll.u32 %v6952_v48, 16  ;;  %v581_v27 = vshrl.u32 %v6957_v52, 16 }
  0x43   : > { %v5338_v37 = vcombine.low %v377_v44, %v387_v17  ;;  %v569_v39 = vsel %vm6773_vm4, %v564_v0, %v568_v28  ;;  %v395_v42 = vor.u32 %v394_v2, %v391_v59  ;;  %v404_v45 = vrot.slane %v402_v50, 4  ;;  %v6980_v17 = vld [vmem:[%s6729_s11 + $0x4c] sm:$0xf]  ;;  %v6986_v2 = vld [vmem:[%s6729_s11 + $0x50] sm:$0x1] }
  0x44   : > { %v574_v4 = vrot.slane %v573_v22, 4  ;;  %v410_v49 = vrot.slane %v408_v18, 5  ;;  %v583_v20 = vrot.slane %v581_v27, 4  ;;  %v584_v54 = vshll.u32 %v6957_v52, 16 }
  0x45   : > { %6073 = vmatprep.mubr.msk.bf16.mxu0 %vm702_vm3, %v5338_v37  ;;  %v396_v55 = vrot.slane %v395_v42, 4  ;;  %v405_v62 = vor.u32 %v404_v45, %v400_v3  ;;  %v590_v32 = vshll.u32 %v6961_v13, 16  ;;  %v594_v44 = vshrl.u32 %v6961_v13, 16  ;;  %v6992_v42 = vld [vmem:[%s6729_s11 + $0xa8] sm:$0xf] }
  0x46   : > { %v579_v28 = vsel %vm6773_vm4, %v574_v4, %v578_v57  ;;  %v586_v59 = vrot.slane %v584_v54, 5  ;;  %v600_v0 = vshll.u32 %v6967_v26, 16  ;;  %v413_v50 = vshrl.u32 %v6971_v34, 16  ;;  %9680 = vst [vmem:[#allocation14_spill] sm:$0xff] %v6992_v42 }
  0x47   : > { %v5346_v22 = vcombine.low %v569_v39, %v579_v28  ;;  %v401_v18 = vsel %vm6773_vm4, %v396_v55, %v400_v3  ;;  %v406_v27 = vrot.slane %v405_v62, 4  ;;  %v592_v37 = vrot.slane %v590_v32, 5 }
  0x48   : > { %v587_v45 = vor.u32 %v586_v59, %v583_v20  ;;  %v596_v61 = vrot.slane %v594_v44, 4  ;;  %v602_v57 = vrot.slane %v600_v0, 5  ;;  %v415_v4 = vrot.slane %v413_v50, 4  ;;  %v7002_v44 = vld [vmem:[%s6729_s11 + $0xac] sm:$0xf] }
  0x49   : > { %6089 = vmatprep.mubr.msk.bf16.mxu1 %vm702_vm3, %v5346_v22  ;;  %v411_v54 = vsel %vm6773_vm4, %v406_v27, %v410_v49  ;;  %v416_v39 = vshll.u32 %v6971_v34, 16  ;;  %v422_v28 = vshll.u32 %v6980_v17, 16  ;;  %v426_v62 = vshrl.u32 %v6980_v17, 16  ;;  %9681 = vst [vmem:[#allocation15_spill] sm:$0xff] %v7002_v44  ;;  %v7005_v22 = vld [vmem:[%s6729_s11 + $0xb0] sm:$0x1] }
  0x4a   : > { %v5339_v3 = vcombine.low %v401_v18, %v411_v54  ;;  %v588_v32 = vrot.slane %v587_v45, 4  ;;  %v597_v55 = vor.u32 %v596_v61, %v592_v37  ;;  %v432_v20 = vshll.u32 %v6986_v2, 16  ;;  %9682 = vst [vmem:[#allocation16_spill] sm:$0xff] %v7005_v22 }
  0x4b   : > { %v418_v59 = vrot.slane %v416_v39, 5  ;;  %v424_v0 = vrot.slane %v422_v28, 5  ;;  %v428_v50 = vrot.slane %v426_v62, 4  ;;  %v605_v49 = vshrl.u32 %v6992_v42, 16  ;;  %v7014_v62 = vld [vmem:[%s6729_s11 + $0x54] sm:$0xf] }
  0x4c   : > { %6074 = vmatmul.mubr.msk.bf16.gmra.mxu0 %vm702_vm3, %v5339_v3  ;;  %v593_v18 = vsel %vm6773_vm4, %v588_v32, %v592_v37  ;;  %v598_v27 = vrot.slane %v597_v55, 4  ;;  %v434_v61 = vrot.slane %v432_v20, 5  ;;  %v608_v45 = vshll.u32 %v6992_v42, 16  ;;  %v7021_v55 = vld [vmem:[%s6729_s11 + $0x58] sm:$0xf] }
  0x4d   : > { %v419_v54 = vor.u32 %v418_v59, %v415_v4  ;;  %v429_v56 = vor.u32 %v428_v50, %v424_v0  ;;  %v607_v39 = vrot.slane %v605_v49, 4  ;;  %v614_v28 = vshll.u32 %v7002_v44, 16  ;;  %v7024_v49 = vld [vmem:[%s6729_s11 + $0x5c] sm:$0x1] }
  0x4e   : > { %v603_v3 = vsel %vm6773_vm4, %v598_v27, %v602_v57  ;;  %v610_v26 = vrot.slane %v608_v45, 5  ;;  %v618_v37 = vshrl.u32 %v7002_v44, 16  ;;  %v624_v32 = vshll.u32 %v7005_v22, 16  ;;  %v1208_v22 = vld [vmem:[%s6729_s11] sm:$0xe] }
  0x4f   : > { %v5347_v4 = vcombine.low %v593_v18, %v603_v3  ;;  %v420_v20 = vrot.slane %v419_v54, 4  ;;  %v430_v59 = vrot.slane %v429_v56, 4  ;;  %v616_v50 = vrot.slane %v614_v28, 5  ;;  %v7035_v54 = vld [vmem:[%s6729_s11 + $0xb4] sm:$0xf] }
  0x50   : > { %v611_v42 = vor.u32 %v610_v26, %v607_v39  ;;  %v620_v52 = vrot.slane %v618_v37, 4  ;;  %v626_v13 = vrot.slane %v624_v32, 5  ;;  %v437_v57 = vshrl.u32 %v7014_v62, 16  ;;  %9683 = vst [vmem:[#allocation17_spill] sm:$0xff] %v7035_v54  ;;  %v7038_v37 = vld [vmem:[%s6729_s11 + $0xb8] sm:$0xf] }
  0x51   : > { %6090 = vmatmul.mubr.msk.bf16.gmra.mxu1 %vm702_vm3, %v5347_v4  ;;  %v425_v27 = vsel %vm6773_vm4, %v420_v20, %v424_v0  ;;  %v435_v18 = vsel %vm6773_vm4, %v430_v59, %v434_v61  ;;  %v440_v56 = vshll.u32 %v7014_v62, 16  ;;  %v446_v45 = vshll.u32 %v7021_v55, 16  ;;  %v7043_v61 = vld [vmem:[%s6729_s11 + $0xbc] sm:$0x1] }
  0x52   : > { %v5340_v26 = vcombine.low %v425_v27, %v435_v18  ;;  %v612_v39 = vrot.slane %v611_v42, 4  ;;  %v621_v28 = vor.u32 %v620_v52, %v616_v50  ;;  %v439_v3 = vrot.slane %v437_v57, 4 }
  0x53   : > { %v442_v32 = vrot.slane %v440_v56, 5  ;;  %v448_v4 = vrot.slane %v446_v45, 5  ;;  %v450_v0 = vshrl.u32 %v7021_v55, 16  ;;  %v456_v20 = vshll.u32 %v7024_v49, 16 }
  0x54   : > { %6077 = vmatprep.mubr.msk.bf16.mxu0 %vm702_vm3, %v5340_v26  ;;  %v617_v59 = vsel %vm6773_vm4, %v612_v39, %v616_v50  ;;  %v622_v27 = vrot.slane %v621_v28, 4  ;;  %v629_v52 = vshrl.u32 %v7035_v54, 16  ;;  %v632_v42 = vshll.u32 %v7035_v54, 16 }
  0x55   : > { %v443_v57 = vor.u32 %v442_v32, %v439_v3  ;;  %v452_v18 = vrot.slane %v450_v0, 4  ;;  %v458_v56 = vrot.slane %v456_v20, 5  ;;  %v638_v45 = vshll.u32 %v7038_v37, 16 }
  0x56   : > { %v627_v44 = vsel %vm6773_vm4, %v622_v27, %v626_v13  ;;  %v631_v16 = vrot.slane %v629_v52, 4  ;;  %v634_v26 = vrot.slane %v632_v42, 5  ;;  %v642_v38 = vshrl.u32 %v7038_v37, 16 }
  0x57   : > { %v5348_v50 = vcombine.low %v617_v59, %v627_v44  ;;  %v444_v39 = vrot.slane %v443_v57, 4  ;;  %v453_v28 = vor.u32 %v452_v18, %v448_v4  ;;  %v640_v47 = vrot.slane %v638_v45, 5  ;;  %v1210_v57 = vld [vmem:[%s6729_s11 + $0x18] sm:$0xe] }
  0x58   : > { %v635_v54 = vor.u32 %v634_v26, %v631_v16  ;;  %v644_v3 = vrot.slane %v642_v38, 4  ;;  %v648_v32 = vshll.u32 %v7043_v61, 16  ;;  %v5398_v13 = vrot.slane %v1208_v22, 9 }
  0x59   : > { %6093 = vmatprep.mubr.msk.bf16.mxu1 %vm702_vm3, %v5348_v50  ;;  %v449_v44 = vsel %vm6773_vm4, %v444_v39, %v448_v4  ;;  %v454_v20 = vrot.slane %v453_v28, 4  ;;  %v1261_v59 = vrot.slane %v6738_v6, 5  ;;  %v5367_v38 = vcombine.low %v6766_v29, %v6769_v30 }
  0x5a   : > { %v636_v16 = vrot.slane %v635_v54, 4  ;;  %v645_v27 = vor.u32 %v644_v3, %v640_v47  ;;  %v650_v52 = vrot.slane %v648_v32, 5  ;;  %v5399_v42 = vrot.slane %v1209_v51, 9 }
  0x5b   : > { %v459_v18 = vsel %vm6773_vm4, %v454_v20, %v458_v56  ;;  %v1262_v22 = vsel %vm7059_vm7, %v5398_v13, %v1261_v59  ;;  %v1263_v45 = vrot.slane %v1261_v59, 4  ;;  %v9686_v4 = vrot.slane %v6769_v30, 5 }
  0x5c   : > { %v5341_v50 = vcombine.low %v449_v44, %v459_v18  ;;  %v641_v54 = vsel %vm6773_vm4, %v636_v16, %v640_v47  ;;  %v646_v39 = vrot.slane %v645_v27, 4  ;;  %v5366_v51 = vcombine.low %v6735_v5, %v6738_v6  ;;  %v1211_v27 = vld [vmem:[%s6729_s11 + $0x24] sm:$0xe] }
  0x5d   : > { %v1270_v26 = vrot.slane %v9686_v4, 4  ;;  %v9687_v28 = vrot.slane %v6741_v7, 5  ;;  %v9688_v3 = vmov %v9686_v4  ;;  %v5368_v13 = vcombine.low %v6808_v8, %v6815_v21  ;;  %v1213_v4 = vld [vmem:[%s6729_s11 + $0x3c] sm:$0xe] }
  0x5e   : > { %v1269_v32 = vsel %vm7059_vm7, %v5399_v42, %v9688_v3  ;;  %v5400_v44 = vrot.slane %v1210_v57, 9  ;;  %6078 = vmatmul.mubr.msk.bf16.gmra.mxu0 %vm702_vm3, %v5341_v50  ;;  %v651_v47 = vsel %vm6773_vm4, %v646_v39, %v650_v52  ;;  %v9689_v6 = vrot.slane %v6779_v41, 5  ;;  %v1212_v42 = vld [vmem:[%s6729_s11 + $0x30] sm:$0xe]  ;;  %v1214_v39 = vld [vmem:[%s6729_s11 + $0x48] sm:$0xe] }
  0x5f   : > { %v1265_v56 = vsel %vm7059_vm7, %v1263_v45, %v9687_v28  ;;  %v1275_v20 = vrot.slane %v6815_v21, 5  ;;  %v5349_v59 = vcombine.low %v641_v54, %v651_v47  ;;  %v1278_v16 = vrot.slane %v6821_v25, 5  ;;  %v1215_v47 = vld [vmem:[%s6729_s11 + $0x54] sm:$0xe]  ;;  %v7354_v21 = vld [vmem:[%s6729_s11 + $0x2c] sm:$0x1] }
  0x60   : > { %v5415_v5 = vcombine.low %v1262_v22, %v1265_v56  ;;  %v1272_v7 = vsel %vm7059_vm7, %v1270_v26, %v9689_v6  ;;  %v1829_v52 = vsel %vm751_vm0, %v6866_v19, 0  ;;  %v1282_v18 = vrot.slane %v6860_v10, 5 }
  0x61   : > { %v1276_v41 = vsel %vm7059_vm7, %v5400_v44, %v1275_v20  ;;  %v1277_v57 = vrot.slane %v1275_v20, 4  ;;  %6094 = vmatmul.mubr.msk.bf16.gmra.mxu1 %vm702_vm3, %v5349_v59  ;;  %v5416_v22 = vcombine.low %v1269_v32, %v1272_v7  ;;  %v2555_v25 = vsel %vm751_vm0, %v6834_v40, 0 }
  0x62   : > { %6133 = vmatprep.mubr.msk.bf16.mxu0 %vm702_vm3, %v5415_v5  ;;  %v1289_v45 = vrot.slane %v6906_v9, 5  ;;  %6099 = vmatprep.mubr.msk.bf16.mxu1 %vm702_vm3, %v5366_v51  ;;  %v5401_v26 = vrot.slane %v1211_v27, 9  ;;  %v1285_v50 = vrot.slane %v6871_v24, 5  ;;  %v5402_v54 = vrot.slane %v1212_v42, 9  ;;  %v7126_v24 = vld [vmem:[%s9633_s1 + $0xc] sm:$0x3] }
  0x63   : > { %v1279_v19 = vsel %vm7059_vm7, %v1277_v57, %v1278_v16  ;;  %v1284_v56 = vrot.slane %v1282_v18, 4  ;;  %v1292_v32 = vrot.slane %v6914_v33, 5  ;;  %v5403_v44 = vrot.slane %v1213_v4, 9 }
  0x64   : > { %v5417_v28 = vcombine.low %v1276_v41, %v1279_v19  ;;  %v1291_v3 = vrot.slane %v1289_v45, 4  ;;  %v1296_v40 = vrot.slane %v6943_v23, 5  ;;  %v1320_v5 = vrot.slane %v6755_v15, 5 }
  0x65   : > { %v1299_v51 = vrot.slane %v6952_v48, 5  ;;  %v5404_v6 = vrot.slane %v1214_v39, 9  ;;  %v1303_v7 = vrot.slane %v6980_v17, 5  ;;  %v5369_v33 = vcombine.low %v6852_v1, %v6860_v10  ;;  %v1216_v1 = vld [vmem:[%s6729_s11 + $0x60] sm:$0xe] }
  0x66   : > { %6134 = vmatmul.mubr.msk.bf16.vlgmr.msra.gmra.mxu0 %vm702_vm3, %v5416_v22  ;;  %v1283_v20 = vsel %vm7059_vm7, %v5401_v26, %v1282_v18  ;;  %v1298_v59 = vrot.slane %v1296_v40, 4  ;;  %v1306_v16 = vrot.slane %v6986_v2, 5  ;;  %v1286_v48 = vsel %vm7059_vm7, %v1284_v56, %v1285_v50  ;;  %v7154_v22 = vld [vmem:[%s9633_s1 + $0xa] sm:$0x3]  ;;  %v7179_v50 = vld [vmem:[%s6729_s11 + $0x6c] sm:$0xe] }
  0x67   : > { %6200 = vmatpush3.bf16.msra.mxu0 %v2555_v25  ;;  %6137 = vmatprep.mubr.msk.bf16.mxu0 %vm702_vm3, %v5417_v28  ;;  %v1290_v27 = vsel %vm7059_vm7, %v5402_v54, %v1289_v45  ;;  %v1293_v42 = vsel %vm7059_vm7, %v1291_v3, %v1292_v32  ;;  %v1305_v41 = vrot.slane %v1303_v7, 4  ;;  %v7144_v10 = vsel %vm7059_vm7, %v5403_v44, %v1296_v40  ;;  %v1219_v39 = vld [vmem:[%s6729_s11 + $0x84] sm:$0xe]  ;;  %v7208_v44 = vld [vmem:[%s6729_s11 + $0x78] sm:$0xe] }
  0x68   : > { %v7148_v2 = vsel %vm7059_vm7, %v5404_v6, %v1303_v7  ;;  %v5405_v57 = vrot.slane %v1215_v47, 9  ;;  %v1310_v18 = vrot.slane %v7021_v55, 5  ;;  %6378 = vmatprep.subr.msk.bf16.mxu0 %vm751_vm0, %v7126_v24  ;;  %v7164_v25 = vsel %vm7059_vm7, %v1298_v59, %v1299_v51  ;;  %v1220_v40 = vld [vmem:[%s6729_s11 + $0x90] sm:$0xe] }
  0x69   : > { %6100 = vmatmul.mubr.msk.bf16.vlgmr.msra.gmra.mxu1 %vm702_vm3, %v5367_v38  ;;  %v7168_v45 = vsel %vm7059_vm7, %v1305_v41, %v1306_v16  ;;  %v1313_v4 = vrot.slane %v7024_v49, 5  ;;  %v1317_v19 = vrot.slane %v6752_v14, 5  ;;  %v5418_v29 = vcombine.low %v1283_v20, %v1286_v48  ;;  %v9690_v48 = vld [vmem:[#allocation7_spill] sm:$0xff] }
  0x6a   : > { %6166 = vmatpush3.bf16.msra.mxu1 %v1829_v52  ;;  %6103 = vmatprep.mubr.msk.bf16.mxu1 %vm702_vm3, %v5368_v13  ;;  %v5370_v30 = vcombine.low %v6901_v60, %v6906_v9  ;;  %v1312_v38 = vrot.slane %v1310_v18, 4  ;;  %v5406_v26 = vrot.slane %v1216_v1, 9  ;;  %v5419_v49 = vcombine.low %v1290_v27, %v1293_v42  ;;  %v1221_v42 = vld [vmem:[%s6729_s11 + $0x9c] sm:$0xe] }
  0x6b   : > { %v5371_v52 = vcombine.low %v6938_v11, %v6943_v23  ;;  %v5372_v8 = vcombine.low %v6971_v34, %v6980_v17  ;;  %6377 = vmatprep.subr.msk.bf16.mxu1 %vm751_vm0, %v7154_v22  ;;  %v5420_v60 = vcombine.low %v7144_v10, %v7164_v25  ;;  %v5421_v9 = vcombine.low %v7148_v2, %v7168_v45  ;;  %v9691_v10 = vld [vmem:[#allocation9_spill] sm:$0xff]  ;;  %v9692_v2 = vld [vmem:[#allocation8_spill] sm:$0xff] }
  0x6c   : > { %v1319_v54 = vrot.slane %v1317_v19, 4  ;;  %v7198_v28 = vsel %vm7059_vm7, %v5405_v57, %v1310_v18  ;;  %v7202_v56 = vsel %vm7059_vm7, %v1312_v38, %v1313_v4  ;;  %v5407_v32 = vrot.slane %v7179_v50, 9  ;;  %v1222_v18 = vld [vmem:[%s6729_s11 + $0xa8] sm:$0xe]  ;;  %v9694_v38 = vld [vmem:[#allocation12_spill] sm:$0xff] }
  0x6d   : > { %v7214_v47 = vsel %vm7059_vm7, %v5406_v26, %v1317_v19  ;;  %v1324_v51 = vrot.slane %v6794_v58, 5  ;;  %v1327_v6 = vrot.slane %v6802_v63, 5  ;;  %v5409_v59 = vrot.slane %v1219_v39, 9  ;;  %v9693_v19 = vld [vmem:[#allocation10_spill] sm:$0xff]  ;;  %v9695_v26 = vld [vmem:[#allocation11_spill] sm:$0xff] }
  0x6e   : > { %6138 = vmatmul.mubr.msk.bf16.gmra.mxu0 %vm702_vm3, %v5418_v29  ;;  %v1338_v16 = vrot.slane %v6885_v43, 5  ;;  %v1341_v27 = vrot.slane %v9690_v48, 5  ;;  %v5422_v41 = vcombine.low %v7198_v28, %v7202_v56  ;;  %v7232_v63 = vsel %vm7059_vm7, %v1319_v54, %v1320_v5  ;;  %v9697_v48 = vld [vmem:[#allocation15_spill] sm:$0xff] }
  0x6f   : > { %6141 = vmatprep.mubr.msk.bf16.mxu0 %vm702_vm3, %v5419_v49  ;;  %v5408_v1 = vrot.slane %v7208_v44, 9  ;;  %v5410_v4 = vrot.slane %v1220_v40, 9  ;;  %v1345_v15 = vrot.slane %v9691_v10, 5  ;;  %v1326_v5 = vrot.slane %v1324_v51, 4  ;;  %v5512_v57 = vld [vmem:[%s6729_s11 + $0xc] sm:$0xf] }
  0x70   : > { %v7241_v25 = vsel %vm7059_vm7, %v5409_v59, %v1338_v16  ;;  %v1340_v45 = vrot.slane %v1338_v16, 4  ;;  %v1348_v29 = vrot.slane %v9693_v19, 5  ;;  %v5411_v49 = vrot.slane %v1221_v42, 9  ;;  %v9696_v59 = vld [vmem:[#allocation13_spill] sm:$0xff]  ;;  %v9698_v42 = vld [vmem:[#allocation14_spill] sm:$0xff] }
  0x71   : > { %6104 = vmatmul.mubr.msk.bf16.gmra.mxu1 %vm702_vm3, %v5369_v33  ;;  %v1331_v33 = vrot.slane %v6839_v46, 5  ;;  %v7255_v39 = vsel %vm7059_vm7, %v5410_v4, %v1345_v15  ;;  %v1347_v44 = vrot.slane %v1345_v15, 4  ;;  %v1352_v40 = vrot.slane %v9694_v38, 5  ;;  %v9699_v15 = vld [vmem:[#allocation16_spill] sm:$0xff] }
  0x72   : > { %6107 = vmatprep.mubr.msk.bf16.mxu1 %vm702_vm3, %v5370_v30  ;;  %v7251_v54 = vsel %vm7059_vm7, %v1340_v45, %v1341_v27  ;;  %v1355_v16 = vrot.slane %v9696_v59, 5  ;;  %v5412_v45 = vrot.slane %v1222_v18, 9  ;;  %v1359_v4 = vrot.slane %v9697_v48, 5 }
  0x73   : > { %v7265_v27 = vsel %vm7059_vm7, %v1347_v44, %v1348_v29  ;;  %v1362_v50 = vrot.slane %v9699_v15, 5  ;;  %v7275_v19 = vsel %vm7059_vm7, %v5411_v49, %v1352_v40  ;;  %v1354_v7 = vrot.slane %v1352_v40, 4  ;;  %v9700_v29 = vld [vmem:[#allocation17_spill] sm:$0xff]  ;;  %v9701_v15 = vld [vmem:[#allocation6_spill] sm:$0xff]  ;;  %v7290_v49 = vld [vmem:[%s6729_s11 + $0x10] sm:$0xf] }
  0x74   : > { %v7282_v18 = vsel %vm7059_vm7, %v5407_v32, %v1324_v51  ;;  %v7287_v59 = vsel %vm7059_vm7, %v5412_v45, %v1359_v4  ;;  %v1361_v30 = vrot.slane %v1359_v4, 4  ;;  %v5515_v40 = vld [vmem:[%s6729_s11 + $0x18] sm:$0xf]  ;;  %v1333_v20 = vrot.slane %v1331_v33, 4 }
  0x75   : > { %v2073_v44 = vshrl.u32 %v5512_v57, 16  ;;  %v2076_v32 = vshll.u32 %v5512_v57, 16  ;;  %v5423_v51 = vcombine.low %v7214_v47, %v7232_v63  ;;  %v7305_v45 = vsel %vm7059_vm7, %v1326_v5, %v1327_v6  ;;  %v1223_v57 = vld [vmem:[%s6729_s11 + $0xb4] sm:$0xe]  ;;  %v7326_v47 = vld [vmem:[%s6729_s11 + $0x14] sm:$0x1] }
  0x76   : > { %6142 = vmatmul.mubr.msk.bf16.gmra.mxu0 %vm702_vm3, %v5420_v60  ;;  %v1334_v60 = vrot.slane %v9701_v15, 5  ;;  %v7320_v11 = vsel %vm7059_vm7, %v5408_v1, %v1331_v33  ;;  %v2082_v6 = vshll.u32 %v7290_v49, 16  ;;  %v5516_v63 = vld [vmem:[%s6729_s11 + $0x1c] sm:$0xf]  ;;  %v2086_v17 = vshrl.u32 %v7290_v49, 16 }
  0x77   : > { %6145 = vmatprep.mubr.msk.bf16.mxu0 %vm702_vm3, %v5421_v9  ;;  %v7295_v9 = vsel %vm7059_vm7, %v1354_v7, %v1355_v16  ;;  %v7311_v7 = vsel %vm7059_vm7, %v1361_v30, %v1362_v50  ;;  %v2075_v5 = vrot.slane %v2073_v44, 4  ;;  %v2078_v34 = vrot.slane %v2076_v32, 5  ;;  %v5518_v15 = vld [vmem:[%s6729_s11 + $0x24] sm:$0xf]  ;;  %v7339_v44 = vld [vmem:[%s6729_s11 + $0x28] sm:$0xf] }
  0x78   : > { %v2097_v50 = vshrl.u32 %v5515_v40, 16  ;;  %v1335_v1 = vsel %vm7059_vm7, %v1333_v20, %v1334_v60  ;;  %v5413_v33 = vrot.slane %v1223_v57, 9  ;;  %v7334_v30 = vrot.slane %v2082_v6, 5 }
  0x79   : > { %6108 = vmatmul.mubr.msk.bf16.gmra.mxu1 %vm702_vm3, %v5371_v52  ;;  %v1366_v52 = vrot.slane %v7038_v37, 5  ;;  %v2100_v16 = vshll.u32 %v5515_v40, 16  ;;  %v1369_v23 = vrot.slane %v7043_v61, 5  ;;  %v2088_v4 = vrot.slane %v2086_v17, 4 }
  0x7a   : > { %6111 = vmatprep.mubr.msk.bf16.mxu1 %vm702_vm3, %v5372_v8  ;;  %v5517_v8 = vld [vmem:[%s6729_s11 + $0x20] sm:$0x1]  ;;  %v2099_v3 = vrot.slane %v2097_v50, 4  ;;  %v2106_v13 = vshll.u32 %v5516_v63, 16  ;;  %v2092_v20 = vshll.u32 %v7326_v47, 16  ;;  %v2110_v57 = vshrl.u32 %v5516_v63, 16 }
  0x7b   : > { %v1368_v32 = vrot.slane %v1366_v52, 4  ;;  %v2102_v60 = vrot.slane %v2100_v16, 5  ;;  %v5424_v61 = vcombine.low %v7282_v18, %v7305_v45  ;;  %v5425_v40 = vcombine.low %v7320_v11, %v1335_v1 }
  0x7c   : > { %v2079_v6 = vor.u32 %v2078_v34, %v2075_v5  ;;  %v7350_v17 = vrot.slane %v2106_v13, 5  ;;  %v2089_v28 = vor.u32 %v2088_v4, %v7334_v30  ;;  %v2116_v50 = vshll.u32 %v5517_v8, 16  ;;  %v7377_v5 = vld [vmem:[%s6729_s11 + $0x34] sm:$0xf] }
  0x7d   : > { %v2103_v56 = vor.u32 %v2102_v60, %v2099_v3  ;;  %v7362_v18 = vsel %vm7059_vm7, %v5413_v33, %v1366_v52  ;;  %v2121_v13 = vshrl.u32 %v5518_v15, 16  ;;  %v2124_v45 = vshll.u32 %v5518_v15, 16  ;;  %v5521_v52 = vld [vmem:[%s6729_s11 + $0x30] sm:$0xf] }
  0x7e   : > { %6146 = vmatmul.mubr.msk.bf16.gmra.mxu0 %vm702_vm3, %v5422_v41  ;;  %v2112_v41 = vrot.slane %v2110_v57, 4  ;;  %v2130_v11 = vshll.u32 %v7339_v44, 16  ;;  %v9703_v3 = vcombine.low %v6748_v12, %v6752_v14  ;;  %v7371_v4 = vsel %vm7059_vm7, %v1368_v32, %v1369_v23 }
  0x7f   : > { %6149 = vmatprep.mubr.msk.bf16.mxu0 %vm702_vm3, %v5423_v51  ;;  %v9702_v51 = vcombine.low %v7014_v62, %v7021_v55  ;;  %v2094_v62 = vrot.slane %v2092_v20, 5  ;;  %v2134_v63 = vshrl.u32 %v7339_v44, 16  ;;  %v2080_v34 = vrot.slane %v2079_v6, 4 }
  0x80   : > { %v2113_v55 = vor.u32 %v2112_v41, %v7350_v17  ;;  %v2123_v8 = vrot.slane %v2121_v13, 4  ;;  %v2126_v1 = vrot.slane %v2124_v45, 5  ;;  %v7379_v33 = vrot.slane %v2130_v11, 5  ;;  %v7385_v41 = vld [vmem:[%s6729_s11 + $0x38] sm:$0x1] }
  0x81   : > { %6112 = vmatmul.mubr.msk.bf16.gmra.mxu1 %vm702_vm3, %v9702_v51  ;;  %v2090_v12 = vrot.slane %v2089_v28, 4  ;;  %v2104_v14 = vrot.slane %v2103_v56, 4  ;;  %v2118_v16 = vrot.slane %v2116_v50, 5  ;;  %v2136_v23 = vrot.slane %v2134_v63, 4  ;;  %v5524_v13 = vld [vmem:[%s6729_s11 + $0x3c] sm:$0xf] }
  0x82   : > { %6115 = vmatprep.mubr.msk.bf16.mxu1 %vm702_vm3, %v9703_v3  ;;  %v2114_v15 = vrot.slane %v2113_v55, 4  ;;  %v2140_v32 = vshll.u32 %v7354_v21, 16  ;;  %v2145_v20 = vshrl.u32 %v5521_v52, 16  ;;  %v2148_v60 = vshll.u32 %v5521_v52, 16 }
  0x83   : > { %v2127_v57 = vor.u32 %v2126_v1, %v2123_v8  ;;  %v2137_v6 = vor.u32 %v2136_v23, %v7379_v33  ;;  %v2154_v28 = vshll.u32 %v7377_v5, 16  ;;  %v2158_v56 = vshrl.u32 %v7377_v5, 16  ;;  %v5527_v8 = vld [vmem:[%s6729_s11 + $0x48] sm:$0xf]  ;;  %v7412_v1 = vld [vmem:[%s6729_s11 + $0x4c] sm:$0xf] }
  0x84   : > { %v2147_v50 = vrot.slane %v2145_v20, 4  ;;  %v2150_v51 = vrot.slane %v2148_v60, 5  ;;  %v9704_v3 = vcombine.low %v6790_v53, %v6794_v58  ;;  %v5430_v55 = vcombine.low %v7362_v18, %v7371_v4 }
  0x85   : > { %v7391_v45 = vrot.slane %v2154_v28, 5  ;;  %v2160_v11 = vrot.slane %v2158_v56, 4  ;;  %v2095_v63 = vsel %vm6773_vm4, %v2090_v12, %v2094_v62  ;;  %v2109_v52 = vsel %vm6773_vm4, %v2104_v14, %v7350_v17 }
  0x86   : > { %6150 = vmatmul.mubr.msk.bf16.gmra.mxu0 %vm702_vm3, %v5424_v61  ;;  %v7394_v61 = vld [vmem:[%s6729_s11 + $0x40] sm:$0xf]  ;;  %v9705_v53 = vcombine.low %v6828_v35, %v6839_v46  ;;  %v2119_v58 = vsel %vm6773_vm4, %v2114_v15, %v2118_v16  ;;  %v2128_v23 = vrot.slane %v2127_v57, 4  ;;  %v2151_v20 = vor.u32 %v2150_v51, %v2147_v50  ;;  %v7446_v50 = vld [vmem:[%s6729_s11 + $0x44] sm:$0x1] }
  0x87   : > { %6153 = vmatprep.mubr.msk.bf16.mxu0 %vm702_vm3, %v5425_v40  ;;  %v2085_v40 = vsel %vm6773_vm4, %v2080_v34, %v7334_v30  ;;  %v2138_v30 = vrot.slane %v2137_v6, 4  ;;  %v2142_v34 = vrot.slane %v2140_v32, 5  ;;  %v2164_v62 = vshll.u32 %v7385_v41, 16  ;;  %v5530_v51 = vld [vmem:[%s6729_s11 + $0x54] sm:$0xf] }
  0x88   : > { %v2169_v12 = vshrl.u32 %v5524_v13, 16  ;;  %v2172_v17 = vshll.u32 %v5524_v13, 16  ;;  %v7423_v14 = vsel %vm751_vm0, %v7154_v22, 0  ;;  %v2161_v35 = vor.u32 %v2160_v11, %v7391_v45 }
  0x89   : > { %6116 = vmatmul.mubr.msk.bf16.gmra.mxu1 %vm702_vm3, %v9704_v3  ;;  %v2178_v46 = vshll.u32 %v7394_v61, 16  ;;  %v2182_v16 = vshrl.u32 %v7394_v61, 16  ;;  %v7428_v15 = vcombine.low %v2085_v40, %v2095_v63  ;;  %v7432_v32 = vsel %vm751_vm0, %v7126_v24, 0  ;;  %v7455_v40 = vld [vmem:[%s6729_s11 + $0x58] sm:$0xf] }
  0x8a   : > { %6119 = vmatprep.mubr.msk.bf16.mxu1 %vm702_vm3, %v9705_v53  ;;  %v2193_v60 = vshrl.u32 %v5527_v8, 16  ;;  %v2196_v57 = vshll.u32 %v5527_v8, 16  ;;  %v9706_v6 = vcombine.low %v7241_v25, %v7251_v54  ;;  %v7438_v22 = vcombine.low %v2109_v52, %v2119_v58  ;;  %v7460_v8 = vld [vmem:[%s6729_s11 + $0x50] sm:$0x1] }
  0x8b   : > { %v2133_v28 = vsel %vm6773_vm4, %v2128_v23, %v7379_v33  ;;  %v2143_v56 = vsel %vm6773_vm4, %v2138_v30, %v2142_v34  ;;  %v2202_v24 = vshll.u32 %v7412_v1, 16  ;;  %v9707_v25 = vcombine.low %v7255_v39, %v7265_v27  ;;  %v5533_v34 = vld [vmem:[%s6729_s11 + $0x60] sm:$0xf] }
  0x8c   : > { %v2152_v54 = vrot.slane %v2151_v20, 4  ;;  %v2166_v13 = vrot.slane %v2164_v62, 5  ;;  %v2171_v11 = vrot.slane %v2169_v12, 4  ;;  %v2174_v3 = vrot.slane %v2172_v17, 5 }
  0x8d   : > { %v2162_v33 = vrot.slane %v2161_v35, 4  ;;  %v7457_v63 = vrot.slane %v2178_v46, 5  ;;  %v2184_v52 = vrot.slane %v2182_v16, 4  ;;  %v2206_v53 = vshrl.u32 %v7412_v1, 16  ;;  %v7477_v35 = vld [vmem:[%s6729_s11 + $0x5c] sm:$0x1] }
  0x8e   : > { %6154 = vmatmul.mubr.msk.bf16.gmra.mxu0 %vm702_vm3, %v9706_v6  ;;  %v9708_v39 = vcombine.low %v6878_v36, %v6885_v43  ;;  %v2195_v27 = vrot.slane %v2193_v60, 4  ;;  %v2198_v58 = vrot.slane %v2196_v57, 5  ;;  %v2217_v23 = vshrl.u32 %v5530_v51, 16 }
  0x8f   : > { %6157 = vmatprep.mubr.msk.bf16.mxu0 %vm702_vm3, %v9707_v25  ;;  %v2220_v30 = vshll.u32 %v5530_v51, 16  ;;  %v9709_v20 = vcombine.low %v9692_v2, %v9691_v10  ;;  %v7472_v62 = vcombine.low %v2133_v28, %v2143_v56  ;;  %v7474_v12 = vrot.slane %v2202_v24, 5  ;;  %v7490_v28 = vld [vmem:[%s6729_s11 + $0x64] sm:$0xf] }
  0x90   : > { %v2208_v17 = vrot.slane %v2206_v53, 4  ;;  %v2226_v36 = vshll.u32 %v7455_v40, 16  ;;  %v2188_v43 = vshll.u32 %v7446_v50, 16  ;;  %v2219_v46 = vrot.slane %v2217_v23, 4 }
  0x91   : > { %6120 = vmatmul.mubr.msk.bf16.gmra.mxu1 %vm702_vm3, %v9708_v39  ;;  %v2222_v16 = vrot.slane %v2220_v30, 5  ;;  %v2230_v60 = vshrl.u32 %v7455_v40, 16  ;;  %v2157_v10 = vsel %vm6773_vm4, %v2152_v54, %v7391_v45  ;;  %v2167_v2 = vsel %vm6773_vm4, %v2162_v33, %v2166_v13  ;;  %v7512_v30 = vld [vmem:[%s6729_s11 + $0x68] sm:$0x1] }
  0x92   : > { %6123 = vmatprep.mubr.msk.bf16.mxu1 %vm702_vm3, %v9709_v20  ;;  %v2175_v57 = vor.u32 %v2174_v3, %v2171_v11  ;;  %v7487_v6 = vrot.slane %v2226_v36, 5  ;;  %v2185_v56 = vor.u32 %v2184_v52, %v7457_v63  ;;  %v2199_v24 = vor.u32 %v2198_v58, %v2195_v27  ;;  %v5536_v3 = vld [vmem:[%s6729_s11 + $0x6c] sm:$0xf]  ;;  %v7509_v27 = vld [vmem:[%s6729_s11 + $0x70] sm:$0xf] }
  0x93   : > { %v2212_v51 = vshll.u32 %v7460_v8, 16  ;;  %v2232_v25 = vrot.slane %v2230_v60, 4  ;;  %v9710_v53 = vcombine.low %v7275_v19, %v7295_v9  ;;  %v2209_v45 = vor.u32 %v2208_v17, %v7474_v12 }
  0x94   : > { %v2223_v54 = vor.u32 %v2222_v16, %v2219_v46  ;;  %v2241_v13 = vshrl.u32 %v5533_v34, 16  ;;  %v2244_v11 = vshll.u32 %v5533_v34, 16  ;;  %v9711_v33 = vcombine.low %v7287_v59, %v7311_v7  ;;  %v5539_v16 = vld [vmem:[%s6729_s11 + $0x78] sm:$0xf] }
  0x95   : > { %v2233_v52 = vor.u32 %v2232_v25, %v7487_v6  ;;  %v2236_v39 = vshll.u32 %v7477_v35, 16  ;;  %v2250_v19 = vshll.u32 %v7490_v28, 16  ;;  %v2254_v9 = vshrl.u32 %v7490_v28, 16 }
  0x96   : > { %6158 = vmatmul.mubr.msk.bf16.gmra.mxu0 %vm702_vm3, %v9710_v53  ;;  %v2176_v58 = vrot.slane %v2175_v57, 4  ;;  %v2190_v23 = vrot.slane %v2188_v43, 5  ;;  %v2243_v34 = vrot.slane %v2241_v13, 4  ;;  %v2246_v20 = vrot.slane %v2244_v11, 5 }
  0x97   : > { %6161 = vmatprep.mubr.msk.bf16.mxu0 %vm702_vm3, %v9711_v33  ;;  %v9712_v59 = vcombine.low %v9695_v26, %v9694_v38  ;;  %v7518_v7 = vcombine.low %v2157_v10, %v2167_v2  ;;  %v2186_v17 = vrot.slane %v2185_v56, 4  ;;  %v2200_v36 = vrot.slane %v2199_v24, 4  ;;  %v7528_v2 = vld [vmem:[%s6729_s11 + $0x7c] sm:$0xf] }
  0x98   : > { %v7520_v46 = vrot.slane %v2250_v19, 5  ;;  %v9713_v43 = vcombine.low %v9698_v42, %v9697_v48  ;;  %v2210_v60 = vrot.slane %v2209_v45, 4  ;;  %v2214_v57 = vrot.slane %v2212_v51, 5  ;;  %9714 = vst [vmem:[#allocation7_spill] sm:$0xff] %v7528_v2  ;;  %v5542_v19 = vld [vmem:[%s6729_s11 + $0x84] sm:$0xf] }
  0x99   : > { %6124 = vmatmul.mubr.msk.bf16.gmra.mxu1 %vm702_vm3, %v9712_v59  ;;  %v2224_v25 = vrot.slane %v2223_v54, 4  ;;  %v2256_v38 = vrot.slane %v2254_v9, 4  ;;  %v2234_v26 = vrot.slane %v2233_v52, 4  ;;  %v2238_v53 = vrot.slane %v2236_v39, 5 }
  0x9a   : > { %6127 = vmatprep.mubr.msk.bf16.mxu1 %vm702_vm3, %v9713_v43  ;;  %v2247_v13 = vor.u32 %v2246_v20, %v2243_v34  ;;  %v2265_v10 = vshrl.u32 %v5536_v3, 16  ;;  %v2181_v56 = vsel %vm6773_vm4, %v2176_v58, %v7457_v63  ;;  %v2268_v24 = vshll.u32 %v5536_v3, 16  ;;  %v6439_v63 = vld [vmem:[%s6729_s11 + $0xc] sm:$0xff]   ;;  %v7562_v34 = vld [vmem:[%s6729_s11 + $0x88] sm:$0xf] }
  0x9b   : > { %v2274_v48 = vshll.u32 %v7509_v27, 16  ;;  %v2278_v42 = vshrl.u32 %v7509_v27, 16  ;;  %v2191_v51 = vsel %vm6773_vm4, %v2186_v17, %v2190_v23  ;;  %v2205_v45 = vsel %vm6773_vm4, %v2200_v36, %v7474_v12  ;;  %9715 = vst [vmem:[#allocation9_spill] sm:$0xff] %v7562_v34  ;;  %v7571_v36 = vld [vmem:[%s6729_s11 + $0x74] sm:$0x1] }
  0x9c   : > { %v2257_v54 = vor.u32 %v2256_v38, %v7520_v46  ;;  %v2260_v11 = vshll.u32 %v7512_v30, 16  ;;  %v2215_v3 = vsel %vm6773_vm4, %v2210_v60, %v2214_v57  ;;  %v2229_v33 = vsel %vm6773_vm4, %v2224_v25, %v7487_v6  ;;  %9717 = vst [vmem:[#allocation8_spill] sm:$0xff] %v7571_v36  ;;  %v7581_v38 = vld [vmem:[%s6729_s11 + $0x80] sm:$0x1] }
  0x9d   : > { %v2289_v52 = vshrl.u32 %v5539_v16, 16  ;;  %v2292_v12 = vshll.u32 %v5539_v16, 16  ;;  %v2239_v18 = vsel %vm6773_vm4, %v2234_v26, %v2238_v53  ;;  %v2248_v4 = vrot.slane %v2247_v13, 4  ;;  %9718 = vst [vmem:[#allocation10_spill] sm:$0xff] %v7581_v38  ;;  %v7584_v26 = vld [vmem:[%s6729_s11 + $0x8c] sm:$0x1] }
  0x9e   : > { %6162 = vmatmul.mubr.msk.bf16.gmra.mxu0 %vm702_vm3, %v5430_v55  ;;  %v2267_v55 = vrot.slane %v2265_v10, 4  ;;  %v2298_v39 = vshll.u32 %v7528_v2, 16  ;;  %v2270_v9 = vrot.slane %v2268_v24, 5  ;;  %v7558_v58 = vrot.slane %v2274_v48, 5  ;;  %9719 = vst [vmem:[#allocation12_spill] sm:$0xff] %v7584_v26  ;;  %v6440_v10 = vld [vmem:[%s6729_s11 + $0x18] sm:$0xff]  }
  0x9f   : > { %6201 = vmatprep.mubr.msk.bf16.mxu0 %vm702_vm3, %v7428_v15  ;;  %v2280_v23 = vrot.slane %v2278_v42, 4  ;;  %v2302_v6 = vshrl.u32 %v7528_v2, 16  ;;  %v9716_v15 = vcombine.low %v9700_v29, %v7038_v37  ;;  %v7568_v20 = vcombine.low %v2181_v56, %v2191_v51  ;;  %v5545_v51 = vld [vmem:[%s6729_s11 + $0x90] sm:$0xf] }
  0xa0   : > { %v2258_v59 = vrot.slane %v2257_v54, 4  ;;  %v2262_v17 = vrot.slane %v2260_v11, 5  ;;  %v2291_v16 = vrot.slane %v2289_v52, 4  ;;  %v2294_v43 = vrot.slane %v2292_v12, 5 }
  0xa1   : > { %6128 = vmatmul.mubr.msk.bf16.gmra.mxu1 %vm702_vm3, %v9716_v15  ;;  %v7574_v60 = vrot.slane %v2298_v39, 5  ;;  %v2304_v57 = vrot.slane %v2302_v6, 4  ;;  %v2313_v25 = vshrl.u32 %v5542_v19, 16  ;;  %v7576_v37 = vcombine.low %v2205_v45, %v2215_v3  ;;  %v7595_v45 = vld [vmem:[%s6729_s11 + $0x94] sm:$0xf] }
  0xa2   : > { %6167 = vmatprep.mubr.msk.bf16.mxu1 %vm702_vm3, %v6439_v63  ;;  %v7578_v29 = vcombine.low %v2229_v33, %v2239_v18  ;;  %v2316_v53 = vshll.u32 %v5542_v19, 16  ;;  %v2322_v13 = vshll.u32 %v7562_v34, 16  ;;  %v2253_v56 = vsel %vm6773_vm4, %v2248_v4, %v7520_v46  ;;  %9720 = vst [vmem:[#allocation11_spill] sm:$0xff] %v7595_v45  ;;  %v7603_v33 = vld [vmem:[%s9633_s1 + $0x10] sm:$0x3]  ;;  %v6441_v46 = vld [vmem:[%s6729_s11 + $0x24] sm:$0xff]  }
  0xa3   : > { %v2271_v24 = vor.u32 %v2270_v9, %v2267_v55  ;;  %v2281_v48 = vor.u32 %v2280_v23, %v7558_v58  ;;  %v2284_v42 = vshll.u32 %v7571_v36, 16  ;;  %v2315_v54 = vrot.slane %v2313_v25, 4  ;;  %9721 = vst [vmem:[#allocation13_spill] sm:$0xff] %v7603_v33 }
  0xa4   : > { %v2318_v11 = vrot.slane %v2316_v53, 5  ;;  %v7597_v63 = vrot.slane %v2322_v13, 5  ;;  %v2326_v3 = vshrl.u32 %v7562_v34, 16  ;;  %v2263_v52 = vsel %vm6773_vm4, %v2258_v59, %v2262_v17 }
  0xa5   : > { %v2295_v12 = vor.u32 %v2294_v43, %v2291_v16  ;;  %v2305_v18 = vor.u32 %v2304_v57, %v7574_v60  ;;  %v2308_v4 = vshll.u32 %v7581_v38, 16  ;;  %v2337_v19 = vshrl.u32 %v5545_v51, 16  ;;  %v7637_v57 = vld [vmem:[%s6729_s11 + $0xa0] sm:$0xf] }
  0xa6   : > { %6202 = vmatmul.mubr.msk.bf16.vlgmr.msra.gmra.mxu0 %vm702_vm3, %v7438_v22  ;;  %v2319_v55 = vor.u32 %v2318_v11, %v2315_v54  ;;  %v2328_v39 = vrot.slane %v2326_v3, 4  ;;  %v2340_v9 = vshll.u32 %v5545_v51, 16  ;;  %v5548_v22 = vld [vmem:[%s6729_s11 + $0x9c] sm:$0xf]  ;;  %v7616_v23 = vrot.slane %v2271_v24, 4  ;;  %9723 = vst [vmem:[#allocation14_spill] sm:$0xff] %v7637_v57 }
  0xa7   : > { %6268 = vmatpush3.bf16.msra.mxu0 %v7432_v32  ;;  %6205 = vmatprep.mubr.msk.bf16.mxu0 %vm702_vm3, %v7472_v62  ;;  %v7618_v6 = vrot.slane %v2284_v42, 5  ;;  %v2332_v15 = vshll.u32 %v7584_v26, 16  ;;  %v2346_v59 = vshll.u32 %v7595_v45, 16  ;;  %v7625_v32 = vld [vmem:[%s9633_s1 + $0xe] sm:$0x3]  ;;  %v7630_v62 = vcombine.low %v2253_v56, %v2263_v52 }
  0xa8   : > { %9722 = vst [vmem:[#allocation15_spill] sm:$0xff] %v7625_v32  ;;  %6380 = vmatprep.subr.msk.bf16.mxu0 %vm751_vm0, %v7603_v33  ;;  %v7632_v17 = vrot.slane %v2281_v48, 4  ;;  %v2329_v16 = vor.u32 %v2328_v39, %v7597_v63  ;;  %v2350_v43 = vshrl.u32 %v7595_v45, 16  ;;  %v7641_v25 = vrot.slane %v2295_v12, 4  ;;  %v7650_v56 = vld [vmem:[%s6729_s11 + $0x98] sm:$0x1] }
  0xa9   : > { %6168 = vmatmul.mubr.msk.bf16.vlgmr.msra.gmra.mxu1 %vm702_vm3, %v6440_v10  ;;  %v7643_v53 = vrot.slane %v2305_v18, 4  ;;  %v7645_v13 = vrot.slane %v2308_v4, 5  ;;  %v7647_v10 = vrot.slane %v2319_v55, 4  ;;  %9724 = vst [vmem:[#allocation16_spill] sm:$0xff] %v7650_v56  ;;  %v2339_v24 = vrot.slane %v2337_v19, 4  ;;  %v6443_v19 = vld [vmem:[%s6729_s11 + $0x3c] sm:$0xff]  }
  0xaa   : > { %6234 = vmatpush3.bf16.msra.mxu1 %v7423_v14  ;;  %6171 = vmatprep.mubr.msk.bf16.mxu1 %vm702_vm3, %v6441_v46  ;;  %v2342_v48 = vrot.slane %v2340_v9, 5  ;;  %v2361_v42 = vshrl.u32 %v5548_v22, 16  ;;  %v2364_v51 = vshll.u32 %v5548_v22, 16  ;;  %v6442_v14 = vld [vmem:[%s6729_s11 + $0x30] sm:$0xff]   ;;  %v7659_v11 = vrot.slane %v2332_v15, 5 }
  0xab   : > { %6379 = vmatprep.subr.msk.bf16.mxu1 %vm751_vm0, %v7625_v32  ;;  %v7661_v3 = vrot.slane %v2346_v59, 5  ;;  %v2370_v46 = vshll.u32 %v7637_v57, 16  ;;  %v5551_v52 = vld [vmem:[%s6729_s11 + $0xa8] sm:$0xf]  ;;  %v7665_v12 = vrot.slane %v2329_v16, 4  ;;  %v2352_v18 = vrot.slane %v2350_v43, 4 }
  0xac   : > { %v2356_v4 = vshll.u32 %v7650_v56, 16  ;;  %v2374_v55 = vshrl.u32 %v7637_v57, 16  ;;  %v7670_v39 = vld [vmem:[%s6729_s11 + $0xac] sm:$0xf]  ;;  %v2343_v59 = vor.u32 %v2342_v48, %v2339_v24  ;;  %v7694_v16 = vld [vmem:[%s6729_s11 + $0xa4] sm:$0x1] }
  0xad   : > { %9725 = vst [vmem:[#allocation17_spill] sm:$0xff] %v7670_v39  ;;  %9726 = vst [vmem:[#allocation6_spill] sm:$0xff] %v7694_v16  ;;  %v2363_v43 = vrot.slane %v2361_v42, 4  ;;  %v2366_v22 = vrot.slane %v2364_v51, 5  ;;  %v2385_v54 = vshrl.u32 %v5551_v52, 16  ;;  %v7696_v9 = vrot.slane %v2370_v46, 5 }
  0xae   : > { %6206 = vmatmul.mubr.msk.bf16.gmra.mxu0 %vm702_vm3, %v7518_v7  ;;  %v2376_v32 = vrot.slane %v2374_v55, 4  ;;  %v2388_v15 = vshll.u32 %v5551_v52, 16  ;;  %v2394_v33 = vshll.u32 %v7670_v39, 16  ;;  %v5554_v57 = vld [vmem:[%s6729_s11 + $0xb4] sm:$0xf]  ;;  %v2353_v24 = vor.u32 %v2352_v18, %v7661_v3 }
  0xaf   : > { %6209 = vmatprep.mubr.msk.bf16.mxu0 %vm702_vm3, %v7568_v20  ;;  %v2335_v20 = vsel %vm6773_vm4, %v7665_v12, %v7659_v11  ;;  %v7706_v48 = vrot.slane %v2356_v4, 5  ;;  %v7709_v42 = vld [vmem:[%s6729_s11 + $0xb0] sm:$0x1]  ;;  %v2387_v51 = vrot.slane %v2385_v54, 4  ;;  %v7712_v46 = vld [vmem:[%s6729_s11 + $0xb8] sm:$0xf]  ;;  %v2367_v18 = vor.u32 %v2366_v22, %v2363_v43 }
  0xb0   : > { %9727 = vst [vmem:[#allocation18_spill] sm:$0xff] %v7709_v42  ;;  %9728 = vst [vmem:[#allocation19_spill] sm:$0xff] %v7712_v46  ;;  %v2390_v52 = vrot.slane %v2388_v15, 5  ;;  %v7716_v55 = vrot.slane %v2394_v33, 5  ;;  %v2398_v11 = vshrl.u32 %v7670_v39, 16  ;;  %v7719_v12 = vrot.slane %v2343_v59, 4 }
  0xb1   : > { %6172 = vmatmul.mubr.msk.bf16.gmra.mxu1 %vm702_vm3, %v6442_v14  ;;  %v2380_v14 = vshll.u32 %v7694_v16, 16  ;;  %v7722_v4 = vld [vmem:[%s6729_s11 + $0xbc] sm:$0x1]  ;;  %v2409_v54 = vshrl.u32 %v5554_v57, 16  ;;  %v2412_v7 = vshll.u32 %v5554_v57, 16  ;;  %v2377_v56 = vor.u32 %v2376_v32, %v7696_v9  ;;  %v6444_v16 = vld [vmem:[%s6729_s11 + $0x48] sm:$0xff]  }
  0xb2   : > { %6175 = vmatprep.mubr.msk.bf16.mxu1 %vm702_vm3, %v6443_v19  ;;  %v2400_v45 = vrot.slane %v2398_v11, 4  ;;  %v2404_v19 = vshll.u32 %v7709_v42, 16  ;;  %v2418_v15 = vshll.u32 %v7712_v46, 16  ;;  %v5557_v33 = vld [vmem:[%s6729_s11 + $0xc0] sm:$0xf]  ;;  %v2391_v26 = vor.u32 %v2390_v52, %v2387_v51  ;;  %v6445_v57 = vld [vmem:[%s6729_s11 + $0x54] sm:$0xff]  }
  0xb3   : > { %v2411_v39 = vrot.slane %v2409_v54, 4  ;;  %v2414_v34 = vrot.slane %v2412_v7, 5  ;;  %v2422_v59 = vshrl.u32 %v7712_v46, 16  ;;  %v7731_v22 = vld [vmem:[%s6729_s11 + $0xc4] sm:$0xf]  ;;  %v2354_v43 = vrot.slane %v2353_v24, 4 }
  0xb4   : > { %v2382_v32 = vrot.slane %v2380_v14, 5  ;;  %v2401_v11 = vor.u32 %v2400_v45, %v7716_v55  ;;  %v2420_v42 = vrot.slane %v2418_v15, 5  ;;  %v2428_v7 = vshll.u32 %v7722_v4, 16  ;;  %v7743_v45 = vld [vmem:[%s6729_s11 + $0xc8] sm:$0x1] }
  0xb5   : > { %v2415_v51 = vor.u32 %v2414_v34, %v2411_v39  ;;  %v2424_v52 = vrot.slane %v2422_v59, 4  ;;  %v2433_v54 = vshrl.u32 %v5557_v33, 16  ;;  %v2368_v46 = vrot.slane %v2367_v18, 4 }
  0xb6   : > { %6210 = vmatmul.mubr.msk.bf16.gmra.mxu0 %vm702_vm3, %v7576_v37  ;;  %v2378_v38 = vrot.slane %v2377_v56, 4  ;;  %v2436_v2 = vshll.u32 %v5557_v33, 16  ;;  %v2442_v37 = vshll.u32 %v7731_v22, 16  ;;  %v2392_v24 = vrot.slane %v2391_v26, 4 }
  0xb7   : > { %6213 = vmatprep.mubr.msk.bf16.mxu0 %vm702_vm3, %v7578_v29  ;;  %v2406_v14 = vrot.slane %v2404_v19, 5  ;;  %v2425_v36 = vor.u32 %v2424_v52, %v2420_v42  ;;  %v2435_v15 = vrot.slane %v2433_v54, 4  ;;  %v2402_v34 = vrot.slane %v2401_v11, 4 }
  0xb8   : > { %v2438_v29 = vrot.slane %v2436_v2, 5  ;;  %v7746_v39 = vrot.slane %v2442_v37, 5  ;;  %v2446_v56 = vshrl.u32 %v7731_v22, 16  ;;  %v9729_v26 = vsel %vm6773_vm4, %v7632_v17, %v7618_v6 }
  0xb9   : > { %6176 = vmatmul.mubr.msk.bf16.gmra.mxu1 %vm702_vm3, %v6444_v16  ;;  %v9730_v16 = vsel %vm6773_vm4, %v7616_v23, %v7558_v58  ;;  %v2416_v19 = vrot.slane %v2415_v51, 4  ;;  %v2426_v33 = vrot.slane %v2425_v36, 4  ;;  %v2430_v2 = vrot.slane %v2428_v7, 5  ;;  %v6446_v23 = vld [vmem:[%s6729_s11 + $0x60] sm:$0xff]  }
  0xba   : > { %6179 = vmatprep.mubr.msk.bf16.mxu1 %vm702_vm3, %v6445_v57  ;;  %v5569_v18 = vcombine.low %v9730_v16, %v9729_v26  ;;  %v9731_v59 = vsel %vm6773_vm4, %v7643_v53, %v7645_v13  ;;  %v9732_v6 = vsel %vm6773_vm4, %v7641_v25, %v7574_v60  ;;  %v2439_v57 = vor.u32 %v2438_v29, %v2435_v15  ;;  %v5595_v13 = vld [vmem:[%s6729_s11 + $0x24] sm:$0xe]  ;;  %v5598_v26 = vld [vmem:[%s6729_s11 + $0x48] sm:$0xe] }
  0xbb   : > { %v5570_v17 = vcombine.low %v9732_v6, %v9731_v59  ;;  %v2448_v11 = vrot.slane %v2446_v56, 4  ;;  %v2452_v58 = vshll.u32 %v7743_v45, 16  ;;  %v9733_v36 = vsel %vm6773_vm4, %v7647_v10, %v7597_v63  ;;  %v6447_v63 = vld [vmem:[%s6729_s11 + $0x6c] sm:$0xff]   ;;  %v5599_v6 = vld [vmem:[%s6729_s11 + $0x54] sm:$0xe] }
  0xbc   : > { %v5571_v51 = vcombine.low %v9733_v36, %v2335_v20  ;;  %v2349_v53 = vsel %vm6773_vm4, %v7719_v12, %v7661_v3  ;;  %v2359_v60 = vsel %vm6773_vm4, %v2354_v43, %v7706_v48  ;;  %v2373_v25 = vsel %vm6773_vm4, %v2368_v46, %v7696_v9  ;;  %v7799_v12 = vld [vmem:[%s6729_s11 + $0xc] sm:$0xe] }
  0xbd   : > { %v2383_v10 = vsel %vm6773_vm4, %v2378_v38, %v2382_v32  ;;  %v2397_v3 = vsel %vm6773_vm4, %v2392_v24, %v7716_v55  ;;  %v2407_v20 = vsel %vm6773_vm4, %v2402_v34, %v2406_v14  ;;  %v2449_v48 = vor.u32 %v2448_v11, %v7746_v39  ;;  %v5596_v55 = vld [vmem:[%s6729_s11 + $0x30] sm:$0xe]  ;;  %v5597_v14 = vld [vmem:[%s6729_s11 + $0x3c] sm:$0xe] }
  0xbe   : > { %6214 = vmatmul.mubr.msk.bf16.gmra.mxu0 %vm702_vm3, %v7630_v62  ;;  %v2421_v62 = vsel %vm6773_vm4, %v2416_v19, %v2420_v42  ;;  %v2431_v38 = vsel %vm6773_vm4, %v2426_v33, %v2430_v2  ;;  %v7806_v9 = vrot.slane %v2439_v57, 4  ;;  %v2816_v46 = vrot.slane %v7290_v49, 5  ;;  %v6448_v57 = vld [vmem:[%s6729_s11 + $0x78] sm:$0xff]  }
  0xbf   : > { %6217 = vmatprep.mubr.msk.bf16.mxu0 %vm702_vm3, %v5569_v18  ;;  %v7810_v43 = vcombine.low %v2349_v53, %v2359_v60  ;;  %v7812_v32 = vrot.slane %v2449_v48, 4  ;;  %v7814_v52 = vrot.slane %v2452_v58, 5  ;;  %v5611_v7 = vrot.slane %v5595_v13, 9  ;;  %v6449_v53 = vld [vmem:[%s6729_s11 + $0x84] sm:$0xff]   ;;  %v5600_v13 = vld [vmem:[%s6729_s11 + $0x60] sm:$0xe] }
  0xc0   : > { %v7817_v54 = vcombine.low %v2373_v25, %v2383_v10  ;;  %v7819_v42 = vcombine.low %v2397_v3, %v2407_v20  ;;  %v5609_v37 = vrot.slane %v7799_v12, 9  ;;  %v2830_v24 = vrot.slane %v7339_v44, 5  ;;  %v6455_v49 = vld [vmem:[%s6729_s11 + $0x18] sm:$0xff]  }
  0xc1   : > { %6180 = vmatmul.mubr.msk.bf16.gmra.mxu1 %vm702_vm3, %v6446_v23  ;;  %v7825_v15 = vcombine.low %v2421_v62, %v2431_v38  ;;  %v2819_v34 = vrot.slane %v7326_v47, 5  ;;  %v2833_v29 = vrot.slane %v7354_v21, 5  ;;  %v5612_v56 = vrot.slane %v5596_v55, 9  ;;  %v5602_v55 = vld [vmem:[%s6729_s11 + $0x78] sm:$0xe] }
  0xc2   : > { %6183 = vmatprep.mubr.msk.bf16.mxu1 %vm702_vm3, %v6447_v63  ;;  %v2445_v16 = vsel %vm6773_vm4, %v7806_v9, %v7746_v39  ;;  %v7836_v44 = vrot.slane %v2816_v46, 4  ;;  %v7840_v18 = vsel %vm7059_vm7, %v5611_v7, %v2830_v24  ;;  %v2832_v19 = vrot.slane %v2830_v24, 4 }
  0xc3   : > { %v2455_v21 = vsel %vm6773_vm4, %v7812_v32, %v7814_v52  ;;  %v2837_v33 = vrot.slane %v7377_v5, 5  ;;  %v2840_v2 = vrot.slane %v7385_v41, 5  ;;  %v5613_v59 = vrot.slane %v5597_v14, 9  ;;  %v6454_v52 = vld [vmem:[%s6729_s11 + $0xc0] sm:$0xff]  }
  0xc4   : > { %v7852_v11 = vsel %vm7059_vm7, %v2832_v19, %v2833_v29  ;;  %v2844_v58 = vrot.slane %v7394_v61, 5  ;;  %v2847_v23 = vrot.slane %v7446_v50, 5  ;;  %v5614_v36 = vrot.slane %v5598_v26, 9  ;;  %v5603_v19 = vld [vmem:[%s6729_s11 + $0x84] sm:$0xe] }
  0xc5   : > { %v5628_v5 = vcombine.low %v7840_v18, %v7852_v11  ;;  %v7862_v41 = vsel %vm7059_vm7, %v5612_v56, %v2837_v33  ;;  %v2839_v60 = vrot.slane %v2837_v33, 4  ;;  %v2851_v25 = vrot.slane %v7412_v1, 5 }
  0xc6   : > { %6218 = vmatmul.mubr.msk.bf16.gmra.mxu0 %vm702_vm3, %v5570_v17  ;;  %v7869_v61 = vsel %vm7059_vm7, %v5613_v59, %v2844_v58  ;;  %v2846_v50 = vrot.slane %v2844_v58, 4  ;;  %v2854_v17 = vrot.slane %v7460_v8, 5  ;;  %v5615_v63 = vrot.slane %v5599_v6, 9  ;;  %v9734_v59 = vld [vmem:[#allocation8_spill] sm:$0xff] }
  0xc7   : > { %6221 = vmatprep.mubr.msk.bf16.mxu0 %vm702_vm3, %v5571_v51  ;;  %v7874_v10 = vsel %vm7059_vm7, %v2839_v60, %v2840_v2  ;;  %v7878_v3 = vsel %vm7059_vm7, %v5614_v36, %v2851_v25  ;;  %v2853_v1 = vrot.slane %v2851_v25, 4  ;;  %v2858_v20 = vrot.slane %v7455_v40, 5  ;;  %v5601_v51 = vld [vmem:[%s6729_s11 + $0x6c] sm:$0xe]  ;;  %v6450_v58 = vld [vmem:[%s6729_s11 + $0x90] sm:$0xff]  }
  0xc8   : > { %v5629_v48 = vcombine.low %v7862_v41, %v7874_v10  ;;  %v7887_v8 = vsel %vm7059_vm7, %v2846_v50, %v2847_v23  ;;  %v2861_v62 = vrot.slane %v7477_v35, 5  ;;  %v5616_v38 = vrot.slane %v5600_v13, 9  ;;  %v9735_v36 = vld [vmem:[#allocation7_spill] sm:$0xff]  ;;  %v9736_v50 = vld [vmem:[#allocation10_spill] sm:$0xff] }
  0xc9   : > { %6184 = vmatmul.mubr.msk.bf16.gmra.mxu1 %vm702_vm3, %v6448_v57  ;;  %v5630_v40 = vcombine.low %v7869_v61, %v7887_v8  ;;  %v7896_v7 = vsel %vm7059_vm7, %v2853_v1, %v2854_v17  ;;  %v7900_v24 = vsel %vm7059_vm7, %v5615_v63, %v2858_v20  ;;  %v2860_v14 = vrot.slane %v2858_v20, 4  ;;  %v5604_v60 = vld [vmem:[%s6729_s11 + $0x90] sm:$0xe] }
  0xca   : > { %6187 = vmatprep.mubr.msk.bf16.mxu1 %vm702_vm3, %v6449_v53  ;;  %v5631_v35 = vcombine.low %v7878_v3, %v7896_v7  ;;  %v2865_v29 = vrot.slane %v7490_v28, 5  ;;  %v2868_v56 = vrot.slane %v7512_v30, 5  ;;  %v5617_v26 = vrot.slane %v5601_v51, 9  ;;  %v9737_v51 = vld [vmem:[#allocation9_spill] sm:$0xff]  ;;  %v5735_v3 = vld [vmem:[%s6729_s11 + $0x48] sm:$0xf] }
  0xcb   : > { %v7909_v33 = vsel %vm7059_vm7, %v2860_v14, %v2861_v62  ;;  %v2872_v2 = vrot.slane %v7509_v27, 5  ;;  %v2875_v6 = vrot.slane %v9734_v59, 5  ;;  %v5618_v57 = vrot.slane %v5602_v55, 9  ;;  %v6451_v27 = vld [vmem:[%s6729_s11 + $0x9c] sm:$0xff]   ;;  %v9745_v55 = vld [vmem:[#allocation19_spill] sm:$0xff] }
  0xcc   : > { %v5632_v23 = vcombine.low %v7900_v24, %v7909_v33  ;;  %v7918_v28 = vsel %vm7059_vm7, %v5616_v38, %v2865_v29  ;;  %v2867_v30 = vrot.slane %v2865_v29, 4  ;;  %v2879_v53 = vrot.slane %v9735_v36, 5  ;;  %v5605_v38 = vld [vmem:[%s6729_s11 + $0x9c] sm:$0xe]  ;;  %v9740_v36 = vld [vmem:[#allocation16_spill] sm:$0xff] }
  0xcd   : > { %v7927_v25 = vsel %vm7059_vm7, %v5617_v26, %v2872_v2  ;;  %v2874_v13 = vrot.slane %v2872_v2, 4  ;;  %v2882_v17 = vrot.slane %v9736_v50, 5  ;;  %v5619_v63 = vrot.slane %v5603_v19, 9  ;;  %v5606_v26 = vld [vmem:[%s6729_s11 + $0xa8] sm:$0xe] }
  0xce   : > { %6222 = vmatmul.mubr.msk.bf16.gmra.mxu0 %vm702_vm3, %v7810_v43  ;;  %v7934_v1 = vsel %vm7059_vm7, %v2867_v30, %v2868_v56  ;;  %v7938_v43 = vsel %vm7059_vm7, %v5618_v57, %v2879_v53  ;;  %v2881_v20 = vrot.slane %v2879_v53, 4  ;;  %v2886_v62 = vrot.slane %v9737_v51, 5  ;;  %v5608_v57 = vld [vmem:[%s6729_s11 + $0xc0] sm:$0xe]  ;;  %v6452_v19 = vld [vmem:[%s6729_s11 + $0xa8] sm:$0xff]  }
  0xcf   : > { %6225 = vmatprep.mubr.msk.bf16.mxu0 %vm702_vm3, %v7817_v54  ;;  %v7946_v14 = vsel %vm7059_vm7, %v2874_v13, %v2875_v6  ;;  %v9738_v54 = vld [vmem:[#allocation12_spill] sm:$0xff]  ;;  %v5620_v56 = vrot.slane %v5604_v60, 9  ;;  %v2896_v53 = vrot.slane %v9740_v36, 5  ;;  %v5621_v60 = vrot.slane %v5605_v38, 9  ;;  %v9743_v38 = vld [vmem:[#allocation17_spill] sm:$0xff] }
  0xd0   : > { %v2889_v29 = vrot.slane %v9738_v54, 5  ;;  %v7955_v2 = vsel %vm7059_vm7, %v2881_v20, %v2882_v17  ;;  %v7959_v59 = vsel %vm7059_vm7, %v5619_v63, %v2886_v62  ;;  %v2888_v6 = vrot.slane %v2886_v62, 4  ;;  %v5607_v13 = vld [vmem:[%s6729_s11 + $0xb4] sm:$0xe]  ;;  %v9741_v17 = vld [vmem:[#allocation14_spill] sm:$0xff] }
  0xd1   : > { %6188 = vmatmul.mubr.msk.bf16.gmra.mxu1 %vm702_vm3, %v6450_v58  ;;  %v9739_v58 = vld [vmem:[#allocation11_spill] sm:$0xff]  ;;  %v2900_v63 = vrot.slane %v9741_v17, 5  ;;  %v9742_v20 = vld [vmem:[#allocation6_spill] sm:$0xff]  ;;  %v5622_v62 = vrot.slane %v5606_v26, 9  ;;  %v2907_v36 = vrot.slane %v9743_v38, 5  ;;  %v5623_v26 = vrot.slane %v5607_v13, 9 }
  0xd2   : > { %6191 = vmatprep.mubr.msk.bf16.mxu1 %vm702_vm3, %v6451_v27  ;;  %v2893_v30 = vrot.slane %v9739_v58, 5  ;;  %v7969_v50 = vsel %vm7059_vm7, %v2888_v6, %v2889_v29  ;;  %v2903_v51 = vrot.slane %v9742_v20, 5  ;;  %v9744_v17 = vld [vmem:[#allocation18_spill] sm:$0xff]  ;;  %v6453_v27 = vld [vmem:[%s6729_s11 + $0xb4] sm:$0xff]   ;;  %v2820_v39 = vsel %vm7059_vm7, %v7836_v44, %v2819_v34  ;;  %v6472_v44 = vld [vmem:[%s6729_s11 + $0x20] sm:$0x1] }
  0xd3   : > { %v7984_v29 = vsel %vm7059_vm7, %v5621_v60, %v2900_v63  ;;  %v2902_v6 = vrot.slane %v2900_v63, 4  ;;  %v2910_v20 = vrot.slane %v9744_v17, 5  ;;  %v2909_v38 = vrot.slane %v2907_v36, 4  ;;  %v8186_v7 = vld [vmem:[%s6729_s11 + $0x4c] sm:$0xf] }
  0xd4   : > { %v7977_v54 = vsel %vm7059_vm7, %v5620_v56, %v2893_v30  ;;  %v2895_v58 = vrot.slane %v2893_v30, 4  ;;  %v7996_v30 = vsel %vm7059_vm7, %v5622_v62, %v2907_v36  ;;  %v2914_v60 = vrot.slane %v9745_v55, 5 }
  0xd5   : > { %v5624_v63 = vrot.slane %v5608_v57, 9  ;;  %v8012_v55 = vsel %vm7059_vm7, %v2909_v38, %v2910_v20  ;;  %v2921_v57 = vrot.slane %v7731_v22, 5  ;;  %v2817_v22 = vsel %vm7059_vm7, %v5609_v37, %v2816_v46  ;;  %v6457_v38 = vld [vmem:[%s6729_s11 + $0x30] sm:$0xff]  }
  0xd6   : > { %6226 = vmatmul.mubr.msk.bf16.gmra.mxu0 %vm702_vm3, %v7819_v42  ;;  %v7992_v56 = vsel %vm7059_vm7, %v2895_v58, %v2896_v53  ;;  %v8005_v42 = vsel %vm7059_vm7, %v2902_v6, %v2903_v51  ;;  %v2917_v53 = vrot.slane %v7722_v4, 5  ;;  %v2916_v58 = vrot.slane %v2914_v60, 4 }
  0xd7   : > { %6229 = vmatprep.mubr.msk.bf16.mxu0 %vm702_vm3, %v7825_v15  ;;  %v8016_v15 = vsel %vm7059_vm7, %v5623_v26, %v2914_v60  ;;  %v2924_v51 = vrot.slane %v7743_v45, 5  ;;  %v5594_v45 = vld [vmem:[%s6729_s11 + $0x18] sm:$0xe]  ;;  %v8056_v9 = vsel %vm7059_vm7, %v5624_v63, %v2921_v57  ;;  %v2923_v46 = vrot.slane %v2921_v57, 4  ;;  %v6456_v26 = vld [vmem:[%s6729_s11 + $0x24] sm:$0xff]   ;;  %v9746_v60 = vld [vmem:[#allocation13_spill] sm:$0xff] }
  0xd8   : > { %v8044_v32 = vsel %vm7059_vm7, %v2916_v58, %v2917_v53  ;;  %v5610_v37 = vrot.slane %v5594_v45, 9  ;;  %v5626_v34 = vcombine.low %v2817_v22, %v2820_v39  ;;  %v4580_v53 = vsel %vm751_vm0, %v9746_v60, 0  ;;  %v5723_v63 = vld [vmem:[%s6729_s11 + $0x18] sm:$0xf]  ;;  %v5724_v57 = vld [vmem:[%s6729_s11 + $0x1c] sm:$0xf] }
  0xd9   : > { %6192 = vmatmul.mubr.msk.bf16.gmra.mxu1 %vm702_vm3, %v6452_v19  ;;  %v5576_v19 = vcombine.low %v2445_v16, %v2455_v21  ;;  %v8061_v47 = vsel %vm7059_vm7, %v2923_v46, %v2924_v51  ;;  %v2826_v21 = vrot.slane %v6472_v44, 5  ;;  %v5726_v51 = vld [vmem:[%s6729_s11 + $0x24] sm:$0xf]  ;;  %v3628_v45 = vshrl.u32 %v5723_v63, 16  ;;  %v6459_v44 = vld [vmem:[%s6729_s11 + $0x48] sm:$0xff]  }
  0xda   : > { %6195 = vmatprep.mubr.msk.bf16.mxu1 %vm702_vm3, %v6453_v27  ;;  %v6471_v27 = vld [vmem:[%s6729_s11 + $0x1c] sm:$0xf]  ;;  %v3637_v39 = vshll.u32 %v5724_v57, 16  ;;  %v3652_v46 = vshrl.u32 %v5726_v51, 16  ;;  %v5804_v60 = vld [vmem:[%s6729_s11 + $0x18] sm:$0xe] }
  0xdb   : > { %v2823_v36 = vrot.slane %v6471_v27, 5  ;;  %v3631_v27 = vshll.u32 %v5723_v63, 16  ;;  %v8102_v63 = vld [vmem:[%s6729_s11 + $0x2c] sm:$0x1] }
  0xdc   : > { %v3654_v18 = vrot.slane %v3652_v46, 4 }
  0xdd   : > { %v2825_v16 = vrot.slane %v2823_v36, 4  ;;  %v2824_v17 = vsel %vm7059_vm7, %v5610_v37, %v2823_v36  ;;  %v8086_v36 = vld [vmem:[%s6729_s11 + $0x28] sm:$0xf]  ;;  %v6458_v37 = vld [vmem:[%s6729_s11 + $0x3c] sm:$0xff]  }
  0xde   : > { %6230 = vmatmul.mubr.msk.bf16.gmra.mxu0 %vm702_vm3, %v5576_v19  ;;  %v9747_v19 = vld [vmem:[#allocation15_spill] sm:$0xff] }
  0xdf   : > { %6269 = vmatprep.mubr.msk.bf16.mxu0 %vm702_vm3, %v6455_v49  ;;  %v2827_v20 = vsel %vm7059_vm7, %v2825_v16, %v2826_v21  ;;  %v4110_v22 = vsel %vm751_vm0, %v9747_v19, 0  ;;  %v3641_v49 = vshrl.u32 %v5724_v57, 16  ;;  %v3665_v16 = vshrl.u32 %v8086_v36, 16  ;;  %v5725_v21 = vld [vmem:[%s6729_s11 + $0x20] sm:$0x1] }
  0xe0   : > { %v5627_v58 = vcombine.low %v2824_v17, %v2827_v20  ;;  %v3630_v17 = vrot.slane %v3628_v45, 4  ;;  %v3633_v20 = vrot.slane %v3631_v27, 5  ;;  %v5729_v19 = vld [vmem:[%s6729_s11 + $0x30] sm:$0xf]  ;;  %v3647_v45 = vshll.u32 %v5725_v21, 16 }
  0xe1   : > { %6196 = vmatmul.mubr.msk.bf16.gmra.mxu1 %vm702_vm3, %v6454_v52  ;;  %v3655_v52 = vshll.u32 %v5726_v51, 16  ;;  %v3667_v51 = vrot.slane %v3665_v16, 4  ;;  %v5820_v27 = vrot.slane %v5804_v60, 9  ;;  %v4374_v46 = vrot.slane %v5725_v21, 5  ;;  %v5805_v16 = vld [vmem:[%s6729_s11 + $0x24] sm:$0xe] }
  0xe2   : > { %6235 = vmatprep.mubr.msk.bf16.mxu1 %vm702_vm3, %v5626_v34  ;;  %v3661_v34 = vshll.u32 %v8086_v36, 16  ;;  %v6460_v21 = vld [vmem:[%s6729_s11 + $0x54] sm:$0xff]   ;;  %v3679_v10 = vshll.u32 %v5729_v19, 16  ;;  %v6461_v60 = vld [vmem:[%s6729_s11 + $0x60] sm:$0xff]  }
  0xe3   : > { %v3657_v11 = vrot.slane %v3655_v52, 5  ;;  %v3671_v52 = vshll.u32 %v8102_v63, 16 }
  0xe6   : > { %6270 = vmatmul.mubr.msk.bf16.vlgmr.msra.gmra.mxu0 %vm702_vm3, %v6456_v26  ;;  %v8098_v26 = vrot.slane %v3637_v39, 5 }
  0xe7   : > { %6336 = vmatpush3.bf16.msra.mxu0 %v4580_v53  ;;  %6273 = vmatprep.mubr.msk.bf16.mxu0 %vm702_vm3, %v6457_v38  ;;  %v3643_v38 = vrot.slane %v3641_v49, 4  ;;  %v4371_v53 = vrot.slane %v5724_v57, 5  ;;  %v8112_v57 = vld [vmem:[%s6729_s11 + $0x34] sm:$0xf] }
  0xe9   : > { %6236 = vmatmul.mubr.msk.bf16.vlgmr.msra.gmra.mxu1 %vm702_vm3, %v5627_v58  ;;  %v8107_v58 = vrot.slane %v3661_v34, 5  ;;  %v3644_v39 = vor.u32 %v3643_v38, %v8098_v26  ;;  %v4373_v49 = vrot.slane %v4371_v53, 4  ;;  %v3658_v34 = vor.u32 %v3657_v11, %v3654_v18 }
  0xea   : > { %6302 = vmatpush3.bf16.msra.mxu1 %v4110_v22  ;;  %6239 = vmatprep.mubr.msk.bf16.mxu1 %vm702_vm3, %v5628_v5  ;;  %v8105_v5 = vpop.f32.mrf.mxu0  ;;  %v3634_v22 = vor.u32 %v3633_v20, %v3630_v17  ;;  %v3676_v17 = vshrl.u32 %v5729_v19, 16  ;;  %v3689_v38 = vshrl.u32 %v8112_v57, 16  ;;  %v8137_v61 = vsel %vm7059_vm7, %v5820_v27, %v4371_v53  ;;  %v5732_v19 = vld [vmem:[%s6729_s11 + $0x3c] sm:$0xf] }
  0xeb   : > { %v3668_v41 = vor.u32 %v3667_v51, %v8107_v58  ;;  %v3645_v8 = vrot.slane %v3644_v39, 4  ;;  %v3673_v11 = vrot.slane %v3671_v52, 5  ;;  %v5821_v51 = vrot.slane %v5805_v16, 9  ;;  %v8151_v39 = vld [vmem:[%s6729_s11 + $0x38] sm:$0x1] }
  0xec   : > { %v8129_v20 = vpop.f32.mrf.mxu0  ;;  %v3635_v18 = vrot.slane %v3634_v22, 4  ;;  %v3659_v12 = vrot.slane %v3658_v34, 4  ;;  %v4381_v22 = vrot.slane %v8102_v63, 5  ;;  %v3691_v52 = vrot.slane %v3689_v38, 4 }
  0xed   : > { %v3669_v27 = vrot.slane %v3668_v41, 4  ;;  %v3700_v34 = vshrl.u32 %v5732_v19, 16  ;;  %v3703_v16 = vshll.u32 %v5732_v19, 16  ;;  %v8164_v41 = vld [vmem:[%s6729_s11 + $0x40] sm:$0xf] }
  0xee   : > { %6274 = vmatmul.mubr.msk.bf16.gmra.mxu0 %vm702_vm3, %v6458_v37  ;;  %v8148_v53 = vpop.f32.mrf.mxu0  ;;  %v3640_v63 = vsel %vm6773_vm4, %v3635_v18, %v8098_v26  ;;  %v3664_v26 = vsel %vm6773_vm4, %v3659_v12, %v8107_v58  ;;  %v5806_v18 = vld [vmem:[%s6729_s11 + $0x30] sm:$0xe]  ;;  %v3709_v24 = vshll.u32 %v8164_v41, 16  ;;  %v3713_v33 = vshrl.u32 %v8164_v41, 16 }
  0xef   : > { %6277 = vmatprep.mubr.msk.bf16.mxu0 %vm702_vm3, %v6459_v44  ;;  %v8120_v37 = vpop.f32.mrf.mxu1  ;;  %v4378_v44 = vrot.slane %v8086_v36, 5  ;;  %v3649_v36 = vrot.slane %v3647_v45, 5  ;;  %v3678_v45 = vrot.slane %v3676_v17, 4  ;;  %v3674_v58 = vsel %vm6773_vm4, %v3669_v27, %v3673_v11 }
  0xf0   : > { %9748 = vst [vmem:[#allocation8_spill] sm:$0xff] %v8120_v37  ;;  %v8193_v12 = vpop.f32.mrf.mxu0  ;;  %v3705_v19 = vrot.slane %v3703_v16, 5  ;;  %v3737_v11 = vshrl.u32 %v8186_v7, 16 }
  0xf1   : > { %6240 = vmatmul.mubr.msk.bf16.gmra.mxu1 %vm702_vm3, %v5629_v48  ;;  %v3685_v48 = vshll.u32 %v8112_v57, 16  ;;  %v8144_v6 = vpop.f32.mrf.mxu1  ;;  %v4380_v4 = vrot.slane %v4378_v44, 4  ;;  %v3650_v17 = vsel %vm6773_vm4, %v3645_v8, %v3649_v36  ;;  %v4385_v36 = vrot.slane %v8112_v57, 5  ;;  %v6463_v8 = vld [vmem:[%s6729_s11 + $0x78] sm:$0xff]  }
  0xf2   : > { %6243 = vmatprep.mubr.msk.bf16.mxu1 %vm702_vm3, %v5630_v40  ;;  %v8141_v40 = vsel %vm7059_vm7, %v4373_v49, %v4374_v46  ;;  %9749 = vst [vmem:[#allocation7_spill] sm:$0xff] %v8144_v6  ;;  %v3681_v49 = vrot.slane %v3679_v10, 5  ;;  %v8207_v27 = vcombine.low %v3640_v63, %v3650_v17  ;;  %v8209_v57 = vcombine.low %v3664_v26, %v3674_v58  ;;  %v8223_v17 = vld [vmem:[%s6729_s11 + $0x58] sm:$0xf]  ;;  %v8229_v58 = vld [vmem:[%s6729_s11 + $0x44] sm:$0x1] }
  0xf3   : > { %v8153_v46 = vrot.slane %v3685_v48, 5  ;;  %v8170_v10 = vpop.f32.mrf.mxu1  ;;  %v8177_v48 = vsel %vm7059_vm7, %v5821_v51, %v4378_v44  ;;  %v8181_v38 = vsel %vm7059_vm7, %v4380_v4, %v4381_v22  ;;  %v3702_v51 = vrot.slane %v3700_v34, 4  ;;  %v5738_v34 = vld [vmem:[%s6729_s11 + $0x54] sm:$0xf] }
  0xf4   : > { %9750 = vst [vmem:[#allocation10_spill] sm:$0xff] %v8170_v10  ;;  %v3682_v44 = vor.u32 %v3681_v49, %v3678_v45  ;;  %v3727_v22 = vshll.u32 %v5735_v3, 16  ;;  %v4387_v13 = vrot.slane %v4385_v36, 4  ;;  %v4388_v63 = vrot.slane %v8151_v39, 5  ;;  %v5807_v49 = vld [vmem:[%s6729_s11 + $0x3c] sm:$0xe] }
  0xf5   : > { %v3692_v4 = vor.u32 %v3691_v52, %v8153_v46  ;;  %v8205_v45 = vpop.f32.mrf.mxu1  ;;  %v5822_v52 = vrot.slane %v5806_v18, 9  ;;  %v3706_v18 = vor.u32 %v3705_v19, %v3702_v51  ;;  %v9753_v6 = vcombine.low %v7918_v28, %v7934_v1 }
  0xf6   : > { %6278 = vmatmul.mubr.msk.bf16.gmra.mxu0 %vm702_vm3, %v6460_v21  ;;  %v3733_v21 = vshll.u32 %v8186_v7, 16  ;;  %9751 = vst [vmem:[#allocation9_spill] sm:$0xff] %v8205_v45  ;;  %v3729_v45 = vrot.slane %v3727_v22, 5  ;;  %v3748_v51 = vshrl.u32 %v5738_v34, 16  ;;  %v3751_v19 = vshll.u32 %v5738_v34, 16 }
  0xf7   : > { %6281 = vmatprep.mubr.msk.bf16.mxu0 %vm702_vm3, %v6461_v60  ;;  %v3695_v60 = vshll.u32 %v8151_v39, 16  ;;  %v8226_v26 = vrot.slane %v3692_v4, 4  ;;  %v3739_v39 = vrot.slane %v3737_v11, 4  ;;  %v8264_v22 = vsel %vm7059_vm7, %v4387_v13, %v4388_v63 }
  0xf8   : > { %v8234_v10 = vrot.slane %v3733_v21, 5  ;;  %v9755_v21 = vcombine.low %v7927_v25, %v7946_v14  ;;  %v4392_v25 = vrot.slane %v8164_v41, 5  ;;  %v6465_v14 = vld [vmem:[%s6729_s11 + $0x90] sm:$0xff]   ;;  %v5823_v1 = vrot.slane %v5807_v49, 9  ;;  %v5741_v41 = vld [vmem:[%s6729_s11 + $0x60] sm:$0xf] }
  0xf9   : > { %6244 = vmatmul.mubr.msk.bf16.gmra.mxu1 %vm702_vm3, %v5631_v35  ;;  %v6462_v35 = vld [vmem:[%s6729_s11 + $0x6c] sm:$0xff]   ;;  %v8219_v62 = vrot.slane %v3695_v60, 5  ;;  %v3750_v37 = vrot.slane %v3748_v51, 4 }
  0xfa   : > { %6247 = vmatprep.mubr.msk.bf16.mxu1 %vm702_vm3, %v5632_v23  ;;  %v3724_v23 = vshrl.u32 %v5735_v3, 16  ;;  %v8217_v3 = vrot.slane %v3682_v44, 4  ;;  %v3715_v44 = vrot.slane %v3713_v33, 4  ;;  %v3761_v33 = vshrl.u32 %v8223_v17, 16 }
  0xfb   : > { %v8215_v16 = vpop.f32.mrf.mxu0  ;;  %v3740_v13 = vor.u32 %v3739_v39, %v8234_v10  ;;  %v4399_v39 = vrot.slane %v8186_v7, 5  ;;  %v9759_v7 = vcombine.low %v7938_v43, %v7955_v2  ;;  %v9761_v43 = vcombine.low %v7959_v59, %v7969_v50  ;;  %v6466_v2 = vld [vmem:[%s6729_s11 + $0x9c] sm:$0xff]  }
  0xfc   : > { %9752 = vst [vmem:[#allocation12_spill] sm:$0xff] %v8215_v16  ;;  %v3726_v60 = vrot.slane %v3724_v23, 4  ;;  %v6464_v23 = vld [vmem:[%s6729_s11 + $0x84] sm:$0xff]   ;;  %v8291_v16 = vld [vmem:[%s6729_s11 + $0x5c] sm:$0x1]  ;;  %v4406_v59 = vrot.slane %v8223_v17, 5 }
  0xfd   : > { %v8252_v28 = vpop.f32.mrf.mxu0 }
  0xfe   : > { %6282 = vmatmul.mubr.msk.bf16.gmra.mxu0 %vm702_vm3, %v6462_v35  ;;  %v8231_v35 = vrot.slane %v3709_v24, 5  ;;  %v3757_v24 = vshll.u32 %v8223_v17, 16  ;;  %9756 = vst [vmem:[#allocation16_spill] sm:$0xff] %v8252_v28  ;;  %v3753_v28 = vrot.slane %v3751_v19, 5 }
  0xff   : > { %6285 = vmatprep.mubr.msk.bf16.mxu0 %vm702_vm3, %v6463_v8  ;;  %v8240_v4 = vpop.f32.mrf.mxu1  ;;  %v8243_v8 = vld [vmem:[%s6729_s11 + $0x50] sm:$0x1]  ;;  %v8284_v49 = vpop.f32.mrf.mxu0 }
 0x100   : > { %9754 = vst [vmem:[#allocation11_spill] sm:$0xff] %v8240_v4  ;;  %v3716_v34 = vor.u32 %v3715_v44, %v8231_v35  ;;  %v8274_v4 = vrot.slane %v3706_v18, 4  ;;  %v8281_v11 = vrot.slane %v3757_v24, 5  ;;  %v3763_v44 = vrot.slane %v3761_v33, 4  ;;  %9758 = vst [vmem:[#allocation6_spill] sm:$0xff] %v8284_v49 }
 0x101   : > { %6248 = vmatmul.mubr.msk.bf16.gmra.mxu1 %vm702_vm3, %v9753_v6  ;;  %v8260_v6 = vsel %vm7059_vm7, %v5822_v52, %v4385_v36  ;;  %v3730_v36 = vor.u32 %v3729_v45, %v3726_v60  ;;  %v3743_v52 = vshll.u32 %v8243_v8, 16  ;;  %v8279_v63 = vpop.f32.mrf.mxu1  ;;  %v4394_v18 = vrot.slane %v4392_v25, 4  ;;  %v5808_v24 = vld [vmem:[%s6729_s11 + $0x48] sm:$0xe] }
 0x102   : > { %6251 = vmatprep.mubr.msk.bf16.mxu1 %vm702_vm3, %v9755_v21  ;;  %v3719_v21 = vshll.u32 %v8229_v58, 16  ;;  %9757 = vst [vmem:[#allocation14_spill] sm:$0xff] %v8279_v63  ;;  %v4395_v60 = vrot.slane %v8229_v58, 5  ;;  %v3717_v51 = vrot.slane %v3716_v34, 4  ;;  %v3772_v33 = vshrl.u32 %v5741_v41, 16 }
 0x103   : > { %v8297_v63 = vsel %vm7059_vm7, %v5823_v1, %v4392_v25  ;;  %v3731_v45 = vrot.slane %v3730_v36, 4  ;;  %v3741_v49 = vrot.slane %v3740_v13, 4  ;;  %v3745_v58 = vrot.slane %v3743_v52, 5  ;;  %v8312_v36 = vld [vmem:[%s6729_s11 + $0x64] sm:$0xf]  ;;  %v8319_v13 = vpop.f32.mrf.mxu0 }
 0x104   : > { %v3721_v19 = vrot.slane %v3719_v21, 5  ;;  %v3712_v34 = vsel %vm6773_vm4, %v8274_v4, %v8231_v35  ;;  %v3754_v21 = vor.u32 %v3753_v28, %v3750_v37  ;;  %v3764_v1 = vor.u32 %v3763_v44, %v8281_v11  ;;  %9762 = vst [vmem:[#allocation18_spill] sm:$0xff] %v8319_v13  ;;  %v5809_v28 = vld [vmem:[%s6729_s11 + $0x54] sm:$0xe]  ;;  %v6470_v13 = vld [vmem:[%s6729_s11 + $0xcc] sm:$0xff]  }
 0x105   : > { %v3767_v25 = vshll.u32 %v8291_v16, 16  ;;  %v8323_v52 = vsel %vm7059_vm7, %v4394_v18, %v4395_v60  ;;  %v5824_v35 = vrot.slane %v5808_v24, 9  ;;  %v4401_v37 = vrot.slane %v4399_v39, 4 }
 0x106   : > { %6286 = vmatmul.mubr.msk.bf16.gmra.mxu0 %vm702_vm3, %v6464_v23  ;;  %v3775_v23 = vshll.u32 %v5741_v41, 16  ;;  %v4402_v4 = vrot.slane %v8243_v8, 5  ;;  %v6467_v41 = vld [vmem:[%s6729_s11 + $0xa8] sm:$0xff]   ;;  %v3722_v44 = vsel %vm6773_vm4, %v3717_v51, %v3721_v19  ;;  %v3774_v50 = vrot.slane %v3772_v33, 4 }
 0x107   : > { %6289 = vmatprep.mubr.msk.bf16.mxu0 %vm702_vm3, %v6465_v14  ;;  %v8303_v14 = vpop.f32.mrf.mxu1  ;;  %v3746_v18 = vsel %vm6773_vm4, %v3741_v49, %v3745_v58  ;;  %v3781_v60 = vshll.u32 %v8312_v36, 16  ;;  %v3785_v8 = vshrl.u32 %v8312_v36, 16  ;;  %v3765_v51 = vrot.slane %v3764_v1, 4  ;;  %v8341_v33 = vld [vmem:[%s6729_s11 + $0x68] sm:$0x1] }
 0x108   : > { %9760 = vst [vmem:[#allocation17_spill] sm:$0xff] %v8303_v14  ;;  %v3755_v14 = vrot.slane %v3754_v21, 4  ;;  %v3769_v17 = vrot.slane %v3767_v25, 5  ;;  %v5825_v19 = vrot.slane %v5809_v28, 9  ;;  %v9765_v49 = vsel %vm6773_vm4, %v8226_v26, %v8219_v62  ;;  %v5744_v25 = vld [vmem:[%s6729_s11 + $0x6c] sm:$0xf] }
 0x109   : > { %6252 = vmatmul.mubr.msk.bf16.gmra.mxu1 %vm702_vm3, %v9759_v7  ;;  %v3777_v7 = vrot.slane %v3775_v23, 5  ;;  %v8338_v24 = vpop.f32.mrf.mxu1  ;;  %v8362_v21 = vsel %vm7059_vm7, %v5824_v35, %v4399_v39  ;;  %v8366_v1 = vsel %vm7059_vm7, %v4401_v37, %v4402_v4  ;;  %v8369_v62 = vcombine.low %v3712_v34, %v3722_v44  ;;  %v5810_v4 = vld [vmem:[%s6729_s11 + $0x60] sm:$0xe]  ;;  %v5750_v44 = vld [vmem:[%s6729_s11 + $0x84] sm:$0xf] }
 0x10a   : > { %6255 = vmatprep.mubr.msk.bf16.mxu1 %vm702_vm3, %v9761_v43  ;;  %v3736_v43 = vsel %vm6773_vm4, %v3731_v45, %v8234_v10  ;;  %9763 = vst [vmem:[#allocation19_spill] sm:$0xff] %v8338_v24  ;;  %v9766_v45 = vsel %vm6773_vm4, %v8217_v3, %v8153_v46  ;;  %v4408_v46 = vrot.slane %v4406_v59, 4  ;;  %v4409_v3 = vrot.slane %v8291_v16, 5 }
 0x10b   : > { %v8356_v23 = vcombine.low %v9766_v45, %v9765_v49  ;;  %9767 = vst [vmem:[#allocation15_spill] sm:$0xff] %v8369_v62  ;;  %v3778_v26 = vor.u32 %v3777_v7, %v3774_v50  ;;  %v8376_v28 = vcombine.low %v3736_v43, %v3746_v18  ;;  %v8378_v39 = vrot.slane %v3781_v60, 5 }
 0x10c   : > { %v8344_v10 = vpop.f32.mrf.mxu0  ;;  %v8380_v35 = vrot.slane %v3785_v8, 4  ;;  %v3791_v37 = vshll.u32 %v8341_v33, 16  ;;  %v9769_v34 = vcombine.low %v7977_v54, %v7992_v56  ;;  %v3760_v50 = vsel %vm6773_vm4, %v3755_v14, %v8281_v11  ;;  %v5747_v54 = vld [vmem:[%s6729_s11 + $0x78] sm:$0xf] }
 0x10d   : > { %9764 = vst [vmem:[#allocation13_spill] sm:$0xff] %v8344_v10  ;;  %9768 = vst [vmem:[#allocation20_spill] sm:$0xff] %v8376_v28  ;;  %v3770_v7 = vsel %vm6773_vm4, %v3765_v51, %v3769_v17  ;;  %v8400_v43 = vsel %vm7059_vm7, %v5825_v19, %v4406_v59  ;;  %v9771_v56 = vcombine.low %v7984_v29, %v8005_v42  ;;  %v3796_v60 = vshrl.u32 %v5744_v25, 16  ;;  %v8412_v51 = vld [vmem:[%s6729_s11 + $0x7c] sm:$0xf]  ;;  %v6469_v59 = vld [vmem:[%s6729_s11 + $0xc0] sm:$0xff]  }
 0x10e   : > { %6290 = vmatmul.mubr.msk.bf16.gmra.mxu0 %vm702_vm3, %v6466_v2  ;;  %v8374_v2 = vld [vmem:[%s6729_s11 + $0x70] sm:$0xf]  ;;  %v8407_v18 = vpop.f32.mrf.mxu0  ;;  %v3799_v8 = vshll.u32 %v5744_v25, 16  ;;  %v8417_v17 = vsel %vm7059_vm7, %v4408_v46, %v4409_v3  ;;  %v8419_v29 = vrot.slane %v3778_v26, 4  ;;  %v5826_v42 = vrot.slane %v5810_v4, 9 }
 0x10f   : > { %6293 = vmatprep.mubr.msk.bf16.mxu0 %vm702_vm3, %v6467_v41  ;;  %v6468_v41 = vld [vmem:[%s6729_s11 + $0xb4] sm:$0xff]   ;;  %9772 = vst [vmem:[#allocation22_spill] sm:$0xff] %v8407_v18  ;;  %v3805_v11 = vshll.u32 %v8374_v2, 16  ;;  %v3809_v14 = vshrl.u32 %v8374_v2, 16  ;;  %v4413_v19 = vrot.slane %v8312_v36, 5  ;;  %v8422_v49 = vcombine.low %v3760_v50, %v3770_v7 }
 0x110   : > { %v3788_v45 = vor.u32 %v8380_v35, %v8378_v39  ;;  %v8426_v25 = vrot.slane %v3791_v37, 5  ;;  %v3820_v46 = vshrl.u32 %v5747_v54, 16  ;;  %v3823_v3 = vshll.u32 %v5747_v54, 16  ;;  %v8438_v4 = vld [vmem:[%s6729_s11 + $0x88] sm:$0xf]  ;;  %v8441_v35 = vpop.f32.mrf.mxu0 }
 0x111   : > { %6256 = vmatmul.mubr.msk.bf16.gmra.mxu1 %vm702_vm3, %v9769_v34  ;;  %v8388_v16 = vpop.f32.mrf.mxu1  ;;  %9773 = vst [vmem:[#allocation23_spill] sm:$0xff] %v8422_v49  ;;  %v4416_v34 = vrot.slane %v8341_v33, 5  ;;  %v3829_v36 = vshll.u32 %v8412_v51, 16  ;;  %v3833_v26 = vshrl.u32 %v8412_v51, 16  ;;  %9775 = vst [vmem:[#allocation25_spill] sm:$0xff] %v8441_v35  ;;  %v3798_v33 = vrot.slane %v3796_v60, 4 }
 0x112   : > { %9770 = vst [vmem:[#allocation21_spill] sm:$0xff] %v8388_v16  ;;  %6259 = vmatprep.mubr.msk.bf16.mxu1 %vm702_vm3, %v9771_v56  ;;  %v8430_v56 = vld [vmem:[%s6729_s11 + $0x74] sm:$0x1]  ;;  %v3801_v37 = vrot.slane %v3799_v8, 5  ;;  %v8443_v50 = vrot.slane %v3805_v11, 5  ;;  %v3811_v7 = vrot.slane %v3809_v14, 4  ;;  %v9776_v54 = vcombine.low %v7996_v30, %v8012_v55  ;;  %v8471_v49 = vpop.f32.mrf.mxu0 }
 0x113   : > { %v8433_v58 = vpop.f32.mrf.mxu1  ;;  %v4415_v16 = vrot.slane %v4413_v19, 4  ;;  %v8456_v60 = vld [vmem:[%s6729_s11 + $0x80] sm:$0x1]  ;;  %v8459_v8 = vld [vmem:[%s6729_s11 + $0x6c] sm:$0xe]  ;;  %v3844_v11 = vshrl.u32 %v5750_v44, 16 }
 0x114   : > { %9774 = vst [vmem:[#allocation24_spill] sm:$0xff] %v8433_v58  ;;  %v8452_v58 = vsel %vm7059_vm7, %v5826_v42, %v4413_v19  ;;  %v3847_v14 = vshll.u32 %v5750_v44, 16  ;;  %v3857_v24 = vshrl.u32 %v8438_v4, 16  ;;  %v3822_v19 = vrot.slane %v3820_v46, 4  ;;  %9778 = vst [vmem:[#allocation27_spill] sm:$0xff] %v8471_v49 }
 0x115   : > { %v8467_v42 = vpop.f32.mrf.mxu1  ;;  %v3825_v35 = vrot.slane %v3823_v3, 5  ;;  %v8469_v18 = vrot.slane %v3829_v36, 5  ;;  %v3835_v10 = vrot.slane %v3833_v26, 4  ;;  %v9779_v44 = vcombine.low %v8016_v15, %v8044_v32  ;;  %v8490_v32 = vld [vmem:[%s6729_s11 + $0x8c] sm:$0x1] }
 0x116   : > { %6294 = vmatmul.mubr.msk.bf16.gmra.mxu0 %vm702_vm3, %v6468_v41  ;;  %v3815_v41 = vshll.u32 %v8430_v56, 16  ;;  %9777 = vst [vmem:[#allocation26_spill] sm:$0xff] %v8467_v42  ;;  %v3802_v30 = vor.u32 %v3801_v37, %v3798_v33  ;;  %v3812_v55 = vor.u32 %v3811_v7, %v8443_v50  ;;  %v3839_v46 = vshll.u32 %v8456_v60, 16  ;;  %v5812_v33 = vld [vmem:[%s6729_s11 + $0x78] sm:$0xe] }
 0x117   : > { %6297 = vmatprep.mubr.msk.bf16.mxu0 %vm702_vm3, %v6469_v59  ;;  %v3853_v59 = vshll.u32 %v8438_v4, 16  ;;  %v8481_v3 = vrot.slane %v3788_v45, 4  ;;  %v8485_v36 = vsel %vm7059_vm7, %v4415_v16, %v4416_v34  ;;  %v5827_v26 = vrot.slane %v8459_v8, 9  ;;  %v8495_v42 = vpop.f32.mrf.mxu1  ;;  %v5753_v8 = vld [vmem:[%s6729_s11 + $0x90] sm:$0xf] }
 0x118   : > { %v4427_v15 = vrot.slane %v8412_v51, 5  ;;  %v3846_v37 = vrot.slane %v3844_v11, 4  ;;  %v3849_v7 = vrot.slane %v3847_v14, 5  ;;  %9780 = vst [vmem:[#allocation28_spill] sm:$0xff] %v8495_v42  ;;  %v3817_v45 = vrot.slane %v3815_v41, 5 }
 0x119   : > { %6260 = vmatmul.mubr.msk.bf16.gmra.mxu1 %vm702_vm3, %v9776_v54  ;;  %v4420_v54 = vrot.slane %v8374_v2, 5  ;;  %v8493_v2 = vrot.slane %v3853_v59, 5  ;;  %v4423_v49 = vrot.slane %v8430_v56, 5  ;;  %v3826_v16 = vor.u32 %v3825_v35, %v3822_v19  ;;  %v8504_v59 = vld [vmem:[%s6729_s11 + $0x94] sm:$0xf] }
 0x11a   : > { %6263 = vmatprep.mubr.msk.bf16.mxu1 %vm702_vm3, %v9779_v44  ;;  %v3859_v44 = vrot.slane %v3857_v24, 4  ;;  %v3836_v34 = vor.u32 %v3835_v10, %v8469_v18  ;;  %v3803_v51 = vrot.slane %v3802_v30, 4  ;;  %v3813_v11 = vrot.slane %v3812_v55, 4 }
 0x11b   : > { %v4422_v62 = vrot.slane %v4420_v54, 4  ;;  %v3841_v14 = vrot.slane %v3839_v46, 5  ;;  %v9781_v24 = vcombine.low %v8137_v61, %v8141_v40  ;;  %v5828_v56 = vrot.slane %v5812_v33, 9 }
 0x11c   : > { %v4429_v35 = vrot.slane %v4427_v15, 4  ;;  %v4430_v10 = vrot.slane %v8456_v60, 5  ;;  %v3863_v41 = vshll.u32 %v8490_v32, 16  ;;  %v3860_v30 = vor.u32 %v3859_v44, %v8493_v2 }
 0x11d   : > { %v3868_v55 = vshrl.u32 %v5753_v8, 16  ;;  %v3871_v46 = vshll.u32 %v5753_v8, 16  ;;  %v9783_v61 = vcombine.low %v8056_v9, %v8061_v47  ;;  %v3827_v40 = vrot.slane %v3826_v16, 4 }
 0x11e   : > { %v8500_v28 = vpop.f32.mrf.mxu0  ;;  %6298 = vmatmul.mubr.msk.bf16.gmra.mxu0 %vm702_vm3, %v6470_v13  ;;  %v3850_v13 = vor.u32 %v3849_v7, %v3846_v37  ;;  %v3837_v33 = vrot.slane %v3836_v34, 4  ;;  %v3877_v60 = vshll.u32 %v8504_v59, 16  ;;  %v3794_v37 = vsel %vm6773_vm4, %v8481_v3, %v8426_v25 }
 0x11f   : > { %6337 = vmatprep.mubr.msk.bf16.mxu0 %vm702_vm3, %v9781_v24  ;;  %v3881_v24 = vshrl.u32 %v8504_v59, 16  ;;  %v3808_v9 = vsel %vm6773_vm4, %v3803_v51, %v8443_v50  ;;  %v8536_v47 = vsel %vm7059_vm7, %v5827_v26, %v4420_v54  ;;  %v8540_v7 = vsel %vm7059_vm7, %v4422_v62, %v4423_v49  ;;  %v5813_v54 = vld [vmem:[%s6729_s11 + $0x84] sm:$0xe]  ;;  %v9822_v31 = vld [vmem:[#allocation28_spill] sm:$0xff] }
 0x120   : > { %v8512_v19 = vpop.f32.mrf.mxu0  ;;  %v8548_v25 = vsel %vm7059_vm7, %v5828_v56, %v4427_v15  ;;  %v8552_v50 = vsel %vm7059_vm7, %v4429_v35, %v4430_v10  ;;  %v3865_v3 = vrot.slane %v3863_v41, 5  ;;  %v3851_v62 = vrot.slane %v3850_v13, 4  ;;  %v8576_v13 = vld [vmem:[%s6729_s11 + $0x98] sm:$0x1] }
 0x121   : > { %9782 = vst [vmem:[#allocation29_spill] sm:$0xff] %v8512_v19  ;;  %v8515_v42 = vpop.f32.mrf.mxu1  ;;  %6264 = vmatmul.mubr.msk.bf16.gmra.mxu1 %vm702_vm3, %v9783_v61  ;;  %v3861_v49 = vrot.slane %v3860_v30, 4  ;;  %v3870_v16 = vrot.slane %v3868_v55, 4  ;;  %v3873_v34 = vrot.slane %v3871_v46, 5  ;;  %v3832_v15 = vsel %vm6773_vm4, %v3827_v40, %v8469_v18  ;;  %v5756_v30 = vld [vmem:[%s6729_s11 + $0x9c] sm:$0xf] }
 0x122   : > { %v8523_v19 = vpop.f32.mrf.mxu0  ;;  %6303 = vmatprep.mubr.msk.bf16.mxu1 %vm702_vm3, %v8207_v27  ;;  %v3818_v27 = vsel %vm6773_vm4, %v3813_v11, %v3817_v45  ;;  %v3842_v45 = vsel %vm6773_vm4, %v3837_v33, %v3841_v14  ;;  %v8564_v51 = vrot.slane %v3877_v60, 5  ;;  %v3883_v11 = vrot.slane %v3881_v24, 4  ;;  %v8607_v24 = vld [vmem:[%s6729_s11 + $0xa0] sm:$0xf] }
 0x123   : > { %v8542_v44 = vpop.f32.mrf.mxu1  ;;  %v9784_v35 = vcombine.low %v8177_v48, %v8181_v38  ;;  %v5842_v10 = vcombine.low %v8400_v43, %v8417_v17  ;;  %v5843_v41 = vcombine.low %v8452_v58, %v8485_v36  ;;  %v5829_v18 = vrot.slane %v5813_v54, 9 }
 0x124   : > { %v8555_v26 = vpop.f32.mrf.mxu0  ;;  %v4434_v14 = vrot.slane %v8438_v4, 5  ;;  %v9785_v48 = vcombine.low %v8260_v6, %v8264_v22  ;;  %v9786_v38 = vsel %vm6773_vm4, %v8419_v29, %v8378_v39  ;;  %v8592_v61 = vcombine.low %v3808_v9, %v3818_v27  ;;  %v5814_v29 = vld [vmem:[%s6729_s11 + $0x90] sm:$0xe]  ;;  %v9793_v4 = vld [vmem:[#allocation6_spill] sm:$0xff] }
 0x125   : > { %v8557_v8 = vpop.f32.mrf.mxu1  ;;  %v8590_v46 = vcombine.low %v9786_v38, %v3794_v37  ;;  %v8598_v60 = vcombine.low %v3832_v15, %v3842_v45  ;;  %v3856_v6 = vsel %vm6773_vm4, %v3851_v62, %v8493_v2  ;;  %v3866_v22 = vsel %vm6773_vm4, %v3861_v49, %v3865_v3 }
 0x126   : > { %v6135_v56 = vpop.f32.mrf.mxu0  ;;  %6338 = vmatmul.mubr.msk.bf16.vlgmr.msra.gmra.mxu0 %vm702_vm3, %v9784_v35  ;;  %v3874_v39 = vor.u32 %v3873_v34, %v3870_v16  ;;  %v3884_v9 = vor.u32 %v3883_v11, %v8564_v51  ;;  %v3887_v27 = vshll.u32 %v8576_v13, 16  ;;  %v3892_v54 = vshrl.u32 %v5756_v30, 16 }
 0x127   : > { %v8579_v55 = vpop.f32.mrf.mxu1  ;;  %6341 = vmatprep.mubr.msk.bf16.mxu0 %vm702_vm3, %v9785_v48  ;;  %v3895_v15 = vshll.u32 %v5756_v30, 16  ;;  %v8618_v3 = vsel %vm7059_vm7, %v5829_v18, %v4434_v14  ;;  %v4436_v62 = vrot.slane %v4434_v14, 4  ;;  %v4437_v49 = vrot.slane %v8490_v32, 5 }
 0x128   : > { %v1506_v33 = vpop.f32.mrf.mxu0  ;;  %v5830_v16 = vrot.slane %v5814_v29, 9  ;;  %v4441_v34 = vrot.slane %v8504_v59, 5  ;;  %v3901_v11 = vshll.u32 %v8607_v24, 16  ;;  %v3905_v35 = vshrl.u32 %v8607_v24, 16 }
 0x129   : > { %v6101_v37 = vpop.f32.mrf.mxu1  ;;  %6304 = vmatmul.mubr.msk.bf16.vlgmr.msra.gmra.mxu1 %vm702_vm3, %v8209_v57  ;;  %v8627_v48 = vcombine.low %v3856_v6, %v3866_v22  ;;  %v8629_v18 = vrot.slane %v3874_v39, 4  ;;  %v3885_v32 = vrot.slane %v3884_v9, 4  ;;  %v3889_v38 = vrot.slane %v3887_v27, 5  ;;  %v5759_v22 = vld [vmem:[%s6729_s11 + $0xa8] sm:$0xf] }
 0x12a   : > { %v1090_v45 = vadd.f32 %v6101_v37, %v8105_v5  ;;  %v6136_v2 = vpop.f32.mrf.mxu0  ;;  %6307 = vmatprep.mubr.msk.bf16.mxu1 %vm702_vm3, %v8356_v23  ;;  %v3894_v29 = vrot.slane %v3892_v54, 4  ;;  %v3897_v59 = vrot.slane %v3895_v15, 5  ;;  %v4444_v6 = vrot.slane %v8576_v13, 5  ;;  %v8655_v27 = vld [vmem:[%s6729_s11 + $0xac] sm:$0xf] }
 0x12b   : > { %v1081_v57 = vpop.f32.mrf.mxu1  ;;  %v3907_v9 = vrot.slane %v3905_v35, 4  ;;  %v9790_v35 = vld [vmem:[#allocation12_spill] sm:$0xff] }
 0x12c   : > { %v8624_v5 = vadd.f32 %v6135_v56, %v1090_v45  ;;  %v1082_v23 = vadd.f32 %v1081_v57, %v8129_v20  ;;  %v1509_v30 = vpop.f32.mrf.mxu0  ;;  %v9787_v45 = vcombine.low %v8297_v63, %v8323_v52  ;;  %v8640_v20 = vsel %vm7059_vm7, %v4436_v62, %v4437_v49  ;;  %v5815_v62 = vld [vmem:[%s6729_s11 + $0x9c] sm:$0xe] }
 0x12d   : > { %v6102_v14 = vpop.f32.mrf.mxu1  ;;  %v4443_v63 = vrot.slane %v4441_v34, 4  ;;  %v8652_v52 = vrot.slane %v3901_v11, 5  ;;  %v4448_v49 = vrot.slane %v8607_v24, 5  ;;  %v3925_v24 = vshll.u32 %v8655_v27, 16 }
 0x12e   : > { %v8631_v37 = vadd.f32 %v1506_v33, %v1082_v23  ;;  %v1093_v40 = vadd.f32 %v6102_v14, %v8148_v53  ;;  %v6139_v56 = vpop.f32.mrf.mxu0  ;;  %6342 = vmatmul.mubr.msk.bf16.gmra.mxu0 %vm702_vm3, %v9787_v45  ;;  %v9788_v33 = vcombine.low %v8362_v21, %v8366_v1  ;;  %v8650_v53 = vsel %vm7059_vm7, %v5830_v16, %v4441_v34  ;;  %v5758_v1 = vld [vmem:[%s6729_s11 + $0xa4] sm:$0x1]  ;;  %v9789_v16 = vld [vmem:[#allocation15_spill] sm:$0xff] }
 0x12f   : > { %v1084_v39 = vpop.f32.mrf.mxu1  ;;  %v3880_v21 = vsel %vm6773_vm4, %v8629_v18, %v8564_v51  ;;  %v3916_v34 = vshrl.u32 %v5759_v22, 16  ;;  %v9791_v51 = vld [vmem:[#allocation20_spill] sm:$0xff]  ;;  %v3929_v18 = vshrl.u32 %v8655_v27, 16 }
 0x130   : > { %6345 = vmatprep.mubr.msk.bf16.mxu0 %vm702_vm3, %v9788_v33  ;;  %v8657_v54 = vadd.f32 %v6136_v2, %v1093_v40  ;;  %v1085_v13 = vadd.f32 %v1084_v39, %v8193_v12  ;;  %v1522_v15 = vpop.f32.mrf.mxu0  ;;  %v3890_v40 = vsel %vm6773_vm4, %v3885_v32, %v3889_v38  ;;  %v3898_v2 = vor.u32 %v3897_v59, %v3894_v29  ;;  %v9792_v59 = vld [vmem:[#allocation16_spill] sm:$0xff] }
 0x131   : > { %v6105_v57 = vpop.f32.mrf.mxu1  ;;  %6308 = vmatmul.mubr.msk.bf16.gmra.mxu1 %vm702_vm3, %v9789_v16  ;;  %v3919_v12 = vshll.u32 %v5759_v22, 16  ;;  %v8680_v39 = vsel %vm7059_vm7, %v4443_v63, %v4444_v6  ;;  %v3908_v32 = vor.u32 %v3907_v9, %v8652_v52  ;;  %v3911_v38 = vshll.u32 %v5758_v1, 16 }
 0x132   : > { %v8671_v11 = vadd.f32 %v1509_v30, %v1085_v13  ;;  %v1106_v23 = vadd.f32 %v6105_v57, %v9790_v35  ;;  %v6140_v14 = vpop.f32.mrf.mxu0  ;;  %6311 = vmatprep.mubr.msk.bf16.mxu1 %vm702_vm3, %v9791_v51  ;;  %v5831_v30 = vrot.slane %v5815_v62, 9  ;;  %v4450_v13 = vrot.slane %v4448_v49, 4 }
 0x133   : > { %v1097_v45 = vpop.f32.mrf.mxu1  ;;  %v4451_v57 = vrot.slane %v5758_v1, 5  ;;  %v8688_v51 = vrot.slane %v3898_v2, 4  ;;  %v3918_v6 = vrot.slane %v3916_v34, 4  ;;  %v3921_v63 = vrot.slane %v3919_v12, 5  ;;  %v8698_v1 = vld [vmem:[%s6729_s11 + $0xb0] sm:$0x1] }
 0x134   : > { %v8683_v29 = vadd.f32 %v6139_v56, %v1106_v23  ;;  %v1098_v22 = vadd.f32 %v1097_v45, %v9792_v59  ;;  %v1525_v33 = vpop.f32.mrf.mxu0  ;;  %v8700_v23 = vrot.slane %v3925_v24, 5  ;;  %v3931_v2 = vrot.slane %v3929_v18, 4  ;;  %v9794_v12 = vld [vmem:[#allocation18_spill] sm:$0xff] }
 0x135   : > { %v6106_v16 = vpop.f32.mrf.mxu1  ;;  %v8710_v43 = vrot.slane %v3908_v32, 4  ;;  %v8712_v17 = vrot.slane %v3911_v38, 5  ;;  %v8720_v58 = vsel %vm7059_vm7, %v5831_v30, %v4448_v49  ;;  %v8724_v36 = vsel %vm7059_vm7, %v4450_v13, %v4451_v57  ;;  %v8736_v30 = vld [vmem:[%s6729_s11 + $0xb8] sm:$0xf] }
 0x136   : > { %v8690_v9 = vadd.f32 %v1522_v15, %v1098_v22  ;;  %v1109_v62 = vadd.f32 %v6106_v16, %v9793_v4  ;;  %v6143_v56 = vpop.f32.mrf.mxu0  ;;  %6346 = vmatmul.mubr.msk.bf16.gmra.mxu0 %vm702_vm3, %v5842_v10  ;;  %v8706_v15 = vcombine.low %v3880_v21, %v3890_v40  ;;  %v5816_v10 = vld [vmem:[%s6729_s11 + $0xa8] sm:$0xe]  ;;  %v9795_v40 = vld [vmem:[#allocation23_spill] sm:$0xff]  ;;  %v3922_v32 = vor.u32 %v3921_v63, %v3918_v6  ;;  %v9796_v22 = vld [vmem:[#allocation13_spill] sm:$0xff] }
 0x137   : > { %v1100_v45 = vpop.f32.mrf.mxu1  ;;  %6349 = vmatprep.mubr.msk.bf16.mxu0 %vm702_vm3, %v5843_v41  ;;  %v5762_v41 = vld [vmem:[%s6729_s11 + $0xb4] sm:$0xf]  ;;  %v3935_v38 = vshll.u32 %v8698_v1, 16  ;;  %v4455_v49 = vrot.slane %v8655_v27, 5  ;;  %v3932_v16 = vor.u32 %v3931_v2, %v8700_v23  ;;  %v3914_v27 = vsel %vm6773_vm4, %v8710_v43, %v8712_v17 }
 0x138   : > { %v8715_v34 = vadd.f32 %v6140_v14, %v1109_v62  ;;  %v1101_v24 = vadd.f32 %v1100_v45, %v9794_v12  ;;  %v1538_v18 = vpop.f32.mrf.mxu0  ;;  %v5832_v62 = vrot.slane %v5816_v10, 9  ;;  %v3940_v6 = vshrl.u32 %v5762_v41, 16 }
 0x139   : > { %v6109_v21 = vpop.f32.mrf.mxu1  ;;  %6312 = vmatmul.mubr.msk.bf16.gmra.mxu1 %vm702_vm3, %v9795_v40  ;;  %v3943_v63 = vshll.u32 %v5762_v41, 16  ;;  %v3949_v2 = vshll.u32 %v8736_v30, 16  ;;  %v3953_v10 = vshrl.u32 %v8736_v30, 16  ;;  %v5765_v40 = vld [vmem:[%s6729_s11 + $0xc0] sm:$0xf]  ;;  %v3923_v4 = vrot.slane %v3922_v32, 4 }
 0x13a   : > { %v8738_v59 = vadd.f32 %v1525_v33, %v1101_v24  ;;  %v1122_v13 = vadd.f32 %v6109_v21, %v9796_v22  ;;  %v6144_v57 = vpop.f32.mrf.mxu0  ;;  %6315 = vmatprep.mubr.msk.bf16.mxu1 %vm702_vm3, %v8590_v46  ;;  %v9798_v24 = vld [vmem:[#allocation22_spill] sm:$0xff]  ;;  %v3937_v43 = vrot.slane %v3935_v38, 5  ;;  %v4457_v17 = vrot.slane %v4455_v49, 4 }
 0x13b   : > { %v1113_v45 = vpop.f32.mrf.mxu1  ;;  %v4458_v33 = vrot.slane %v8698_v1, 5  ;;  %v8766_v14 = vsel %vm7059_vm7, %v5832_v62, %v4455_v49  ;;  %v8769_v32 = vld [vmem:[%s6729_s11 + $0xc4] sm:$0xf]  ;;  %v9802_v1 = vcombine.low %v8548_v25, %v8552_v50  ;;  %v8781_v62 = vrot.slane %v3949_v2, 5 }
 0x13c   : > { %v8750_v12 = vadd.f32 %v6143_v56, %v1122_v13  ;;  %v1114_v21 = vadd.f32 %v1113_v45, %v9798_v24  ;;  %v1541_v46 = vpop.f32.mrf.mxu0  ;;  %v9800_v56 = vld [vmem:[#allocation25_spill] sm:$0xff]  ;;  %v9801_v45 = vcombine.low %v8536_v47, %v8540_v7  ;;  %v3933_v24 = vrot.slane %v3932_v16, 4  ;;  %v9803_v16 = vld [vmem:[#allocation27_spill] sm:$0xff] }
 0x13d   : > { %v6110_v22 = vpop.f32.mrf.mxu1  ;;  %v3964_v47 = vshrl.u32 %v5765_v40, 16  ;;  %v3967_v7 = vshll.u32 %v5765_v40, 16  ;;  %v3928_v25 = vsel %vm6773_vm4, %v3923_v4, %v8700_v23  ;;  %v8790_v50 = vsel %vm7059_vm7, %v4457_v17, %v4458_v33  ;;  %v5817_v40 = vld [vmem:[%s6729_s11 + $0xb4] sm:$0xe] }
 0x13e   : > { %9797 = vst [vmem:[#allocation15_spill] sm:$0xff] %v8750_v12  ;;  %v8757_v35 = vadd.f32 %v1538_v18, %v1114_v21  ;;  %v1125_v41 = vadd.f32 %v6110_v22, %v9800_v56  ;;  %v6147_v13 = vpop.f32.mrf.mxu0  ;;  %6350 = vmatmul.mubr.msk.bf16.gmra.mxu0 %vm702_vm3, %v9801_v45  ;;  %v8776_v18 = vld [vmem:[%s6729_s11 + $0xbc] sm:$0x1]  ;;  %v3942_v21 = vrot.slane %v3940_v6, 4  ;;  %v3945_v22 = vrot.slane %v3943_v63, 5 }
 0x13f   : > { %v1116_v38 = vpop.f32.mrf.mxu1  ;;  %6353 = vmatprep.mubr.msk.bf16.mxu0 %vm702_vm3, %v9802_v1  ;;  %v3977_v6 = vshrl.u32 %v8769_v32, 16  ;;  %v3959_v23 = vshll.u32 %v8776_v18, 16  ;;  %v4462_v17 = vrot.slane %v8736_v30, 5  ;;  %v9804_v1 = vld [vmem:[#allocation29_spill] sm:$0xff] }
 0x140   : > { %9799 = vst [vmem:[#allocation12_spill] sm:$0xff] %v8757_v35  ;;  %v8778_v56 = vadd.f32 %v6144_v57, %v1125_v41  ;;  %v1117_v45 = vadd.f32 %v1116_v38, %v9803_v16  ;;  %v1554_v49 = vpop.f32.mrf.mxu0  ;;  %v3955_v35 = vrot.slane %v3953_v10, 4  ;;  %v3973_v57 = vshll.u32 %v8769_v32, 16 }
 0x141   : > { %v6113_v12 = vpop.f32.mrf.mxu1  ;;  %6316 = vmatmul.mubr.msk.bf16.gmra.mxu1 %vm702_vm3, %v8592_v61  ;;  %v3938_v61 = vsel %vm6773_vm4, %v3933_v24, %v3937_v43  ;;  %v3946_v33 = vor.u32 %v3945_v22, %v3942_v21  ;;  %v3966_v41 = vrot.slane %v3964_v47, 4  ;;  %v3969_v38 = vrot.slane %v3967_v7, 5 }
 0x142   : > { %v8794_v63 = vadd.f32 %v1541_v46, %v1117_v45  ;;  %v1138_v2 = vadd.f32 %v6113_v12, %v8500_v28  ;;  %v6148_v10 = vpop.f32.mrf.mxu0  ;;  %6319 = vmatprep.mubr.msk.bf16.mxu1 %vm702_vm3, %v8598_v60  ;;  %v9805_v60 = vsel %vm6773_vm4, %v8688_v51, %v8652_v52  ;;  %v3956_v24 = vor.u32 %v3955_v35, %v8781_v62 }
 0x143   : > { %v1129_v4 = vpop.f32.mrf.mxu1  ;;  %v8812_v43 = vcombine.low %v9805_v60, %v3914_v27  ;;  %v8815_v30 = vcombine.low %v3928_v25, %v3938_v61  ;;  %v8819_v22 = vrot.slane %v3973_v57, 5  ;;  %v3979_v47 = vrot.slane %v3977_v6, 4  ;;  %v5767_v27 = vld [vmem:[%s6729_s11 + $0xc8] sm:$0x1] }
 0x144   : > { %v8804_v46 = vadd.f32 %v6147_v13, %v1138_v2  ;;  %v1130_v28 = vadd.f32 %v1129_v4, %v9804_v1  ;;  %v1557_v12 = vpop.f32.mrf.mxu0  ;;  %v5849_v13 = vcombine.low %v8766_v14, %v8790_v50  ;;  %v9806_v52 = vcombine.low %v8618_v3, %v8640_v20  ;;  %v5768_v14 = vld [vmem:[%s6729_s11 + $0xcc] sm:$0xf]  ;;  %v8840_v20 = vld [vmem:[%s6729_s11 + $0xd0] sm:$0xf]  ;;  %v5818_v4 = vld [vmem:[%s6729_s11 + $0xc0] sm:$0xe] }
 0x145   : > { %v6114_v21 = vpop.f32.mrf.mxu1  ;;  %v8828_v35 = vrot.slane %v3959_v23, 5  ;;  %v5833_v51 = vrot.slane %v5817_v40, 9  ;;  %v9807_v50 = vcombine.low %v8650_v53, %v8680_v39  ;;  %v4465_v57 = vrot.slane %v8776_v18, 5 }
 0x146   : > { %v8821_v7 = vadd.f32 %v1554_v49, %v1130_v28  ;;  %v1141_v16 = vadd.f32 %v6114_v21, %v8523_v19  ;;  %v6151_v45 = vpop.f32.mrf.mxu0  ;;  %6354 = vmatmul.mubr.msk.bf16.gmra.mxu0 %vm702_vm3, %v9806_v52  ;;  %v8836_v49 = vrot.slane %v3946_v33, 4  ;;  %v4464_v19 = vrot.slane %v4462_v17, 4 }
 0x147   : > { %v1132_v25 = vpop.f32.mrf.mxu1  ;;  %6357 = vmatprep.mubr.msk.bf16.mxu0 %vm702_vm3, %v9807_v50  ;;  %v3970_v3 = vor.u32 %v3969_v38, %v3966_v41  ;;  %v8845_v23 = vrot.slane %v3956_v24, 4  ;;  %v4469_v53 = vrot.slane %v8769_v32, 5  ;;  %v3980_v33 = vor.u32 %v3979_v47, %v8819_v22 }
 0x148   : > { %v8842_v6 = vadd.f32 %v6148_v10, %v1141_v16  ;;  %v1133_v2 = vadd.f32 %v1132_v25, %v8555_v26  ;;  %v1570_v61 = vpop.f32.mrf.mxu0  ;;  %v3983_v18 = vshll.u32 %v5767_v27, 16  ;;  %v3988_v40 = vshrl.u32 %v5768_v14, 16  ;;  %v9810_v10 = vld [vmem:[#allocation8_spill] sm:$0xff]  ;;  %v9811_v16 = vld [vmem:[#allocation7_spill] sm:$0xff] }
 0x149   : > { %v6117_v39 = vpop.f32.mrf.mxu1  ;;  %6320 = vmatmul.mubr.msk.bf16.gmra.mxu1 %vm702_vm3, %v8627_v48  ;;  %v3991_v41 = vshll.u32 %v5768_v14, 16  ;;  %v3997_v28 = vshll.u32 %v8840_v20, 16  ;;  %v4001_v32 = vshrl.u32 %v8840_v20, 16  ;;  %v4463_v48 = vsel %vm7059_vm7, %v5833_v51, %v4462_v17  ;;  %v9812_v17 = vld [vmem:[#allocation10_spill] sm:$0xff] }
 0x14a   : > { %9808 = vst [vmem:[#allocation20_spill] sm:$0xff] %v8842_v6  ;;  %v8852_v38 = vadd.f32 %v1557_v12, %v1133_v2  ;;  %v1154_v1 = vadd.f32 %v6117_v39, %v9810_v10  ;;  %v6152_v26 = vpop.f32.mrf.mxu0  ;;  %6323 = vmatprep.mubr.msk.bf16.mxu1 %vm702_vm3, %v8706_v15  ;;  %v4466_v24 = vsel %vm7059_vm7, %v4464_v19, %v4465_v57  ;;  %v3971_v21 = vrot.slane %v3970_v3, 4 }
 0x14b   : > { %v1145_v60 = vpop.f32.mrf.mxu1  ;;  %v5834_v12 = vrot.slane %v5818_v4, 9  ;;  %v4471_v25 = vrot.slane %v4469_v53, 4  ;;  %v4472_v15 = vrot.slane %v5767_v27, 5  ;;  %v3981_v2 = vrot.slane %v3980_v33, 4  ;;  %v5770_v33 = vld [vmem:[%s6729_s11 + $0xd4] sm:$0x1] }
 0x14c   : > { %9809 = vst [vmem:[#allocation16_spill] sm:$0xff] %v8852_v38  ;;  %v8863_v47 = vadd.f32 %v6151_v45, %v1154_v1  ;;  %v1146_v52 = vadd.f32 %v1145_v60, %v9811_v16  ;;  %v1573_v14 = vpop.f32.mrf.mxu0  ;;  %v3985_v39 = vrot.slane %v3983_v18, 5  ;;  %v3990_v10 = vrot.slane %v3988_v40, 4  ;;  %v9814_v18 = vld [vmem:[#allocation9_spill] sm:$0xff] }
 0x14d   : > { %v6118_v50 = vpop.f32.mrf.mxu1  ;;  %v3993_v38 = vrot.slane %v3991_v41, 5  ;;  %v9813_v45 = vcombine.low %v8720_v58, %v8724_v36  ;;  %v8873_v57 = vrot.slane %v3997_v28, 5  ;;  %v4003_v27 = vrot.slane %v4001_v32, 4 }
 0x14e   : > { %v8866_v6 = vadd.f32 %v1570_v61, %v1146_v52  ;;  %v1157_v51 = vadd.f32 %v6118_v50, %v9812_v17  ;;  %v6155_v19 = vpop.f32.mrf.mxu0  ;;  %v3952_v61 = vsel %vm6773_vm4, %v8836_v49, %v8781_v62  ;;  %v3962_v4 = vsel %vm6773_vm4, %v8845_v23, %v8828_v35  ;;  %v5819_v62 = vld [vmem:[%s6729_s11 + $0xcc] sm:$0xe] }
 0x14f   : > { %6358 = vmatmul.mubr.msk.bf16.gmra.mxu0 %vm702_vm3, %v9813_v45  ;;  %v1148_v3 = vpop.f32.mrf.mxu1  ;;  %v4476_v58 = vrot.slane %v8840_v20, 5  ;;  %v4473_v1 = vsel %vm7059_vm7, %v4471_v25, %v4472_v15  ;;  %v5850_v35 = vcombine.low %v4463_v48, %v4466_v24  ;;  %v3976_v20 = vsel %vm6773_vm4, %v3971_v21, %v8819_v22  ;;  %v9816_v25 = vld [vmem:[#allocation14_spill] sm:$0xff] }
 0x150   : > { %6361 = vmatprep.mubr.msk.bf16.mxu0 %vm702_vm3, %v5849_v13  ;;  %v8886_v36 = vadd.f32 %v6152_v26, %v1157_v51  ;;  %v1149_v40 = vadd.f32 %v1148_v3, %v9814_v18  ;;  %v1586_v41 = vpop.f32.mrf.mxu0  ;;  %v4470_v13 = vsel %vm7059_vm7, %v5834_v12, %v4469_v53  ;;  %v3986_v23 = vsel %vm6773_vm4, %v3981_v2, %v3985_v39  ;;  %v9815_v53 = vld [vmem:[#allocation11_spill] sm:$0xff] }
 0x151   : > { %v6121_v49 = vpop.f32.mrf.mxu1  ;;  %6324 = vmatmul.mubr.msk.bf16.gmra.mxu1 %vm702_vm3, %v8812_v43  ;;  %v3994_v26 = vor.u32 %v3993_v38, %v3990_v10  ;;  %v4004_v12 = vor.u32 %v4003_v27, %v8873_v57  ;;  %v4007_v43 = vshll.u32 %v5770_v33, 16  ;;  %v5851_v24 = vcombine.low %v4470_v13, %v4473_v1 }
 0x152   : > { %v8901_v28 = vadd.f32 %v1573_v14, %v1149_v40  ;;  %v1170_v32 = vadd.f32 %v6121_v49, %v9815_v53  ;;  %v6156_v60 = vpop.f32.mrf.mxu0  ;;  %6327 = vmatprep.mubr.msk.bf16.mxu1 %vm702_vm3, %v8815_v30  ;;  %v5835_v16 = vrot.slane %v5819_v62, 9  ;;  %v4478_v52 = vrot.slane %v4476_v58, 4  ;;  %v9817_v30 = vld [vmem:[#allocation17_spill] sm:$0xff] }
 0x153   : > { %v1161_v48 = vpop.f32.mrf.mxu1  ;;  %v4479_v22 = vrot.slane %v5770_v33, 5  ;;  %v5785_v50 = vcombine.low %v3952_v61, %v3962_v4  ;;  %v5786_v2 = vcombine.low %v3976_v20, %v3986_v23  ;;  %v3995_v39 = vrot.slane %v3994_v26, 4  ;;  %v9818_v33 = vld [vmem:[#allocation19_spill] sm:$0xff]  ;;  %v9819_v62 = vld [vmem:[#allocation21_spill] sm:$0xff]  ;;  %v9820_v26 = vld [vmem:[#allocation24_spill] sm:$0xff] }
 0x154   : > { %v8907_v21 = vadd.f32 %v6155_v19, %v1170_v32  ;;  %v1162_v38 = vadd.f32 %v1161_v48, %v9816_v25  ;;  %v1589_v14 = vpop.f32.mrf.mxu0  ;;  %v4005_v45 = vrot.slane %v4004_v12, 4  ;;  %v4009_v27 = vrot.slane %v4007_v43, 5  ;;  %v9821_v43 = vld [vmem:[#allocation26_spill] sm:$0xff] }
 0x155   : > { %v6122_v15 = vpop.f32.mrf.mxu1  ;;  %v4477_v19 = vsel %vm7059_vm7, %v5835_v16, %v4476_v58  ;;  %v4480_v61 = vsel %vm7059_vm7, %v4478_v52, %v4479_v22  ;;  %v4000_v13 = vsel %vm6773_vm4, %v3995_v39, %v8873_v57 }
 0x156   : > { %v8910_v10 = vadd.f32 %v1586_v41, %v1162_v38  ;;  %v1173_v17 = vadd.f32 %v6122_v15, %v9817_v30  ;;  %v6159_v51 = vpop.f32.mrf.mxu0  ;;  %v4010_v0 = vsel %vm6773_vm4, %v4005_v45, %v4009_v27 }
 0x157   : > { %6362 = vmatmul.mubr.msk.bf16.gmra.mxu0 %vm702_vm3, %v5850_v35  ;;  %v1164_v3 = vpop.f32.mrf.mxu1  ;;  %v5852_v35 = vcombine.low %v4477_v19, %v4480_v61  ;;  %v5787_v12 = vcombine.low %v4000_v13, %v4010_v0 }
 0x158   : > { %6365 = vmatprep.mubr.msk.bf16.mxu0 %vm702_vm3, %v5851_v24  ;;  %v8919_v4 = vadd.f32 %v6156_v60, %v1173_v17  ;;  %v1165_v18 = vadd.f32 %v1164_v3, %v9818_v33  ;;  %v1602_v40 = vpop.f32.mrf.mxu0 }
 0x159   : > { %v6125_v41 = vpop.f32.mrf.mxu1  ;;  %6328 = vmatmul.mubr.msk.bf16.gmra.mxu1 %vm702_vm3, %v5785_v50 }
 0x15a   : > { %v8926_v1 = vadd.f32 %v1589_v14, %v1165_v18  ;;  %v1186_v49 = vadd.f32 %v6125_v41, %v9819_v62  ;;  %v6160_v58 = vpop.f32.mrf.mxu0  ;;  %6331 = vmatprep.mubr.msk.bf16.mxu1 %vm702_vm3, %v5786_v2 }
 0x15b   : > { %v1177_v20 = vpop.f32.mrf.mxu1 }
 0x15c   : > { %v8932_v23 = vadd.f32 %v6159_v51, %v1186_v49  ;;  %v1178_v53 = vadd.f32 %v1177_v20, %v9820_v26  ;;  %v1605_v32 = vpop.f32.mrf.mxu0 }
 0x15d   : > { %v6126_v60 = vpop.f32.mrf.mxu1 }
 0x15e   : > { %v8935_v57 = vadd.f32 %v1602_v40, %v1178_v53  ;;  %v1189_v48 = vadd.f32 %v6126_v60, %v9821_v43  ;;  %v6163_v24 = vpop.f32.mrf.mxu0 }
 0x15f   : > { %6366 = vmatmul.mubr.msk.bf16.gmra.mxu0 %vm702_vm3, %v5852_v35  ;;  %v1180_v16 = vpop.f32.mrf.mxu1 }
 0x160   : > { %v8939_v52 = vadd.f32 %v6160_v58, %v1189_v48  ;;  %v1181_v22 = vadd.f32 %v1180_v16, %v9822_v31  ;;  %v1618_v25 = vpop.f32.mrf.mxu0 }
 0x161   : > { %v6129_v38 = vpop.f32.mrf.mxu1  ;;  %6332 = vmatmul.mubr.msk.bf16.gmra.mxu1 %vm702_vm3, %v5787_v12 }
 0x162   : > { %v8943_v14 = vadd.f32 %v1605_v32, %v1181_v22  ;;  %v1202_v15 = vadd.f32 %v6129_v38, %v8515_v42  ;;  %v6164_v50 = vpop.f32.mrf.mxu0 }
 0x163   : > { %v1193_v2 = vpop.f32.mrf.mxu1 }
 0x164   : > { %v8946_v39 = vadd.f32 %v6163_v24, %v1202_v15  ;;  %v1194_v30 = vadd.f32 %v1193_v2, %v8542_v44  ;;  %v1621_v17 = vpop.f32.mrf.mxu0 }
 0x165   : > { %v6130_v51 = vpop.f32.mrf.mxu1 }
 0x166   : > { %v8949_v45 = vadd.f32 %v1618_v25, %v1194_v30  ;;  %v1205_v27 = vadd.f32 %v6130_v51, %v8557_v8  ;;  %v6203_v3 = vpop.f32.mrf.mxu0  ;;  %v9823_v30 = vld [vmem:[#allocation15_spill] sm:$0xff] }
 0x167   : > { %v1196_v19 = vpop.f32.mrf.mxu1 }
 0x168   : > { %v8952_v61 = vadd.f32 %v6164_v50, %v1205_v27  ;;  %v1197_v33 = vadd.f32 %v1196_v19, %v8579_v55  ;;  %v2591_v18 = vpop.f32.mrf.mxu0 }
 0x169   : > { %v6169_v42 = vpop.f32.mrf.mxu1 }
 0x16a   : > { %v8955_v40 = vadd.f32 %v1621_v17, %v1197_v33  ;;  %v1994_v41 = vadd.f32 %v6169_v42, %v8624_v5  ;;  %v6204_v13 = vpop.f32.mrf.mxu0 }
 0x16b   : > { %v1865_v44 = vpop.f32.mrf.mxu1 }
 0x16c   : > { %v8958_v62 = vadd.f32 %v6203_v3, %v1994_v41  ;;  %v1992_v49 = vadd.f32 %v1865_v44, %v8631_v37  ;;  %v2594_v58 = vpop.f32.mrf.mxu0  ;;  %v9824_v3 = vld [vmem:[#allocation12_spill] sm:$0xff] }
 0x16d   : > { %v6170_v8 = vpop.f32.mrf.mxu1 }
 0x16e   : > { %v8961_v0 = vadd.f32 %v2591_v18, %v1992_v49  ;;  %v1995_v35 = vadd.f32 %v6170_v8, %v8657_v54  ;;  %v6207_v20 = vpop.f32.mrf.mxu0 }
 0x16f   : > { %v1868_v55 = vpop.f32.mrf.mxu1 }
 0x170   : > { %v8964_v26 = vadd.f32 %v6204_v13, %v1995_v35  ;;  %v1993_v53 = vadd.f32 %v1868_v55, %v8671_v11  ;;  %v2607_v32 = vpop.f32.mrf.mxu0 }
 0x171   : > { %v6173_v5 = vpop.f32.mrf.mxu1 }
 0x172   : > { %v8967_v60 = vadd.f32 %v2594_v58, %v1993_v53  ;;  %v1998_v12 = vadd.f32 %v6173_v5, %v8683_v29  ;;  %v6208_v43 = vpop.f32.mrf.mxu0 }
 0x173   : > { %v1881_v37 = vpop.f32.mrf.mxu1 }
 0x174   : > { %v8970_v48 = vadd.f32 %v6207_v20, %v1998_v12  ;;  %v1996_v24 = vadd.f32 %v1881_v37, %v8690_v9  ;;  %v2610_v16 = vpop.f32.mrf.mxu0 }
 0x175   : > { %v6174_v54 = vpop.f32.mrf.mxu1 }
 0x176   : > { %v8973_v31 = vadd.f32 %v2607_v32, %v1996_v24  ;;  %v1999_v22 = vadd.f32 %v6174_v54, %v8715_v34  ;;  %v6211_v25 = vpop.f32.mrf.mxu0  ;;  %v9826_v54 = vld [vmem:[#allocation16_spill] sm:$0xff] }
 0x177   : > { %v1884_v11 = vpop.f32.mrf.mxu1 }
 0x178   : > { %v8976_v38 = vadd.f32 %v6208_v43, %v1999_v22  ;;  %v1997_v15 = vadd.f32 %v1884_v11, %v8738_v59  ;;  %v2623_v50 = vpop.f32.mrf.mxu0  ;;  %v9825_v43 = vld [vmem:[#allocation20_spill] sm:$0xff] }
 0x179   : > { %v6177_v29 = vpop.f32.mrf.mxu1 }
 0x17a   : > { %v8979_v2 = vadd.f32 %v2610_v16, %v1997_v15  ;;  %v2002_v17 = vadd.f32 %v6177_v29, %v9823_v30  ;;  %v6212_v51 = vpop.f32.mrf.mxu0 }
 0x17b   : > { %v1897_v9 = vpop.f32.mrf.mxu1 }
 0x17c   : > { %v8982_v27 = vadd.f32 %v6211_v25, %v2002_v17  ;;  %v2000_v19 = vadd.f32 %v1897_v9, %v9824_v3  ;;  %v2626_v33 = vpop.f32.mrf.mxu0 }
 0x17d   : > { %v6178_v34 = vpop.f32.mrf.mxu1 }
 0x17e   : > { %v8985_v18 = vadd.f32 %v2623_v50, %v2000_v19  ;;  %v2003_v42 = vadd.f32 %v6178_v34, %v8778_v56  ;;  %v6215_v41 = vpop.f32.mrf.mxu0 }
 0x17f   : > { %v1900_v59 = vpop.f32.mrf.mxu1 }
 0x180   : > { %v8988_v13 = vadd.f32 %v6212_v51, %v2003_v42  ;;  %v2001_v44 = vadd.f32 %v1900_v59, %v8794_v63  ;;  %v2639_v49 = vpop.f32.mrf.mxu0 }
 0x181   : > { %v6181_v58 = vpop.f32.mrf.mxu1 }
 0x182   : > { %v8991_v8 = vadd.f32 %v2626_v33, %v2001_v44  ;;  %v2006_v35 = vadd.f32 %v6181_v58, %v8804_v46  ;;  %v6216_v20 = vpop.f32.mrf.mxu0 }
 0x183   : > { %v1913_v55 = vpop.f32.mrf.mxu1 }
 0x184   : > { %v8994_v53 = vadd.f32 %v6215_v41, %v2006_v35  ;;  %v2004_v32 = vadd.f32 %v1913_v55, %v8821_v7  ;;  %v2642_v5 = vpop.f32.mrf.mxu0 }
 0x185   : > { %v6182_v56 = vpop.f32.mrf.mxu1 }
 0x186   : > { %v8997_v12 = vadd.f32 %v2639_v49, %v2004_v32  ;;  %v2007_v37 = vadd.f32 %v6182_v56, %v9825_v43  ;;  %v6219_v24 = vpop.f32.mrf.mxu0 }
 0x187   : > { %v1916_v63 = vpop.f32.mrf.mxu1 }
 0x188   : > { %v9000_v16 = vadd.f32 %v6216_v20, %v2007_v37  ;;  %v2005_v22 = vadd.f32 %v1916_v63, %v9826_v54  ;;  %v2655_v25 = vpop.f32.mrf.mxu0 }
 0x189   : > { %v6185_v46 = vpop.f32.mrf.mxu1 }
 0x18a   : > { %v9003_v11 = vadd.f32 %v2642_v5, %v2005_v22  ;;  %v2010_v15 = vadd.f32 %v6185_v46, %v8863_v47  ;;  %v6220_v50 = vpop.f32.mrf.mxu0 }
 0x18b   : > { %v1929_v7 = vpop.f32.mrf.mxu1 }
 0x18c   : > { %v9006_v29 = vadd.f32 %v6219_v24, %v2010_v15  ;;  %v2008_v30 = vadd.f32 %v1929_v7, %v8866_v6  ;;  %v2658_v17 = vpop.f32.mrf.mxu0 }
 0x18d   : > { %v6186_v51 = vpop.f32.mrf.mxu1 }
 0x18e   : > { %v9009_v9 = vadd.f32 %v2655_v25, %v2008_v30  ;;  %v2011_v3 = vadd.f32 %v6186_v51, %v8886_v36  ;;  %v6223_v19 = vpop.f32.mrf.mxu0 }
 0x18f   : > { %v1932_v33 = vpop.f32.mrf.mxu1 }
 0x190   : > { %v9012_v34 = vadd.f32 %v6220_v50, %v2011_v3  ;;  %v2009_v42 = vadd.f32 %v1932_v33, %v8901_v28  ;;  %v2671_v41 = vpop.f32.mrf.mxu0 }
 0x191   : > { %v6189_v47 = vpop.f32.mrf.mxu1 }
 0x192   : > { %v9015_v59 = vadd.f32 %v2658_v17, %v2009_v42  ;;  %v2014_v44 = vadd.f32 %v6189_v47, %v8907_v21  ;;  %v6224_v49 = vpop.f32.mrf.mxu0 }
 0x193   : > { %v1945_v6 = vpop.f32.mrf.mxu1 }
 0x194   : > { %v9018_v58 = vadd.f32 %v6223_v19, %v2014_v44  ;;  %v2012_v35 = vadd.f32 %v1945_v6, %v8910_v10  ;;  %v2674_v20 = vpop.f32.mrf.mxu0 }
 0x195   : > { %v6190_v36 = vpop.f32.mrf.mxu1 }
 0x196   : > { %v9021_v55 = vadd.f32 %v2671_v41, %v2012_v35  ;;  %v2015_v32 = vadd.f32 %v6190_v36, %v8919_v4  ;;  %v6227_v5 = vpop.f32.mrf.mxu0 }
 0x197   : > { %v1948_v28 = vpop.f32.mrf.mxu1 }
 0x198   : > { %v9024_v56 = vadd.f32 %v6224_v49, %v2015_v32  ;;  %v2013_v43 = vadd.f32 %v1948_v28, %v8926_v1  ;;  %v2687_v37 = vpop.f32.mrf.mxu0 }
 0x199   : > { %v6193_v21 = vpop.f32.mrf.mxu1 }
 0x19a   : > { %v9027_v24 = vadd.f32 %v2674_v20, %v2013_v43  ;;  %v2018_v63 = vadd.f32 %v6193_v21, %v8932_v23  ;;  %v6228_v54 = vpop.f32.mrf.mxu0 }
 0x19b   : > { %v1961_v10 = vpop.f32.mrf.mxu1 }
 0x19c   : > { %v9030_v22 = vadd.f32 %v6227_v5, %v2018_v63  ;;  %v2016_v25 = vadd.f32 %v1961_v10, %v8935_v57  ;;  %v2690_v46 = vpop.f32.mrf.mxu0 }
 0x19d   : > { %v6194_v4 = vpop.f32.mrf.mxu1 }
 0x19e   : > { %v9033_v15 = vadd.f32 %v2687_v37, %v2016_v25  ;;  %v2019_v50 = vadd.f32 %v6194_v4, %v8939_v52  ;;  %v6231_v7 = vpop.f32.mrf.mxu0 }
 0x19f   : > { %v1964_v1 = vpop.f32.mrf.mxu1 }
 0x1a0   : > { %v9036_v30 = vadd.f32 %v6228_v54, %v2019_v50  ;;  %v2017_v17 = vadd.f32 %v1964_v1, %v8943_v14  ;;  %v2703_v51 = vpop.f32.mrf.mxu0 }
 0x1a1   : > { %v6197_v23 = vpop.f32.mrf.mxu1 }
 0x1a2   : > { %v9039_v3 = vadd.f32 %v2690_v46, %v2017_v17  ;;  %v2022_v19 = vadd.f32 %v6197_v23, %v8946_v39  ;;  %v6232_v33 = vpop.f32.mrf.mxu0 }
 0x1a3   : > { %v1977_v57 = vpop.f32.mrf.mxu1 }
 0x1a4   : > { %v9042_v42 = vadd.f32 %v6231_v7, %v2022_v19  ;;  %v2020_v41 = vadd.f32 %v1977_v57, %v8949_v45  ;;  %v2706_v47 = vpop.f32.mrf.mxu0 }
 0x1a5   : > { %v6198_v52 = vpop.f32.mrf.mxu1 }
 0x1a6   : > { %v9045_v44 = vadd.f32 %v2703_v51, %v2020_v41  ;;  %v2023_v49 = vadd.f32 %v6198_v52, %v8952_v61  ;;  %v6271_v6 = vpop.f32.mrf.mxu0 }
 0x1a7   : > { %v1980_v14 = vpop.f32.mrf.mxu1 }
 0x1a8   : > { %v9048_v35 = vadd.f32 %v6232_v33, %v2023_v49  ;;  %v2021_v20 = vadd.f32 %v1980_v14, %v8955_v40  ;;  %v3420_v36 = vpop.f32.mrf.mxu0 }
 0x1a9   : > { %v6237_v39 = vpop.f32.mrf.mxu1 }
 0x1aa   : > { %v9051_v32 = vadd.f32 %v2706_v47, %v2021_v20  ;;  %v3190_v5 = vadd.f32 %v6237_v39, %v8958_v62  ;;  %v6272_v28 = vpop.f32.mrf.mxu0 }
 0x1ab   : > { %v3061_v45 = vpop.f32.mrf.mxu1 }
 0x1ac   : > { %v9054_v43 = vadd.f32 %v6271_v6, %v3190_v5  ;;  %v3188_v37 = vadd.f32 %v3061_v45, %v8961_v0  ;;  %v3423_v21 = vpop.f32.mrf.mxu0 }
 0x1ad   : > { %v6238_v61 = vpop.f32.mrf.mxu1 }
 0x1ae   : > { %v9057_v63 = vadd.f32 %v3420_v36, %v3188_v37  ;;  %v3191_v54 = vadd.f32 %v6238_v61, %v8964_v26  ;;  %v6275_v10 = vpop.f32.mrf.mxu0 }
 0x1af   : > { %v3064_v40 = vpop.f32.mrf.mxu1 }
 0x1b0   : > { %v9060_v25 = vadd.f32 %v6272_v28, %v3191_v54  ;;  %v3189_v46 = vadd.f32 %v3064_v40, %v8967_v60  ;;  %v3436_v4 = vpop.f32.mrf.mxu0 }
 0x1b1   : > { %v6241_v62 = vpop.f32.mrf.mxu1 }
 0x1b2   : > { %v9063_v50 = vadd.f32 %v3423_v21, %v3189_v46  ;;  %v3194_v7 = vadd.f32 %v6241_v62, %v8970_v48  ;;  %v6276_v1 = vpop.f32.mrf.mxu0 }
 0x1b3   : > { %v3077_v0 = vpop.f32.mrf.mxu1 }
 0x1b4   : > { %v9066_v17 = vadd.f32 %v6275_v10, %v3194_v7  ;;  %v3192_v51 = vadd.f32 %v3077_v0, %v8973_v31  ;;  %v3439_v23 = vpop.f32.mrf.mxu0 }
 0x1b5   : > { %v6242_v26 = vpop.f32.mrf.mxu1 }
 0x1b6   : > { %v9069_v19 = vadd.f32 %v3436_v4, %v3192_v51  ;;  %v3195_v33 = vadd.f32 %v6242_v26, %v8976_v38  ;;  %v6279_v57 = vpop.f32.mrf.mxu0 }
 0x1b7   : > { %v3080_v60 = vpop.f32.mrf.mxu1 }
 0x1b8   : > { %v9072_v41 = vadd.f32 %v6276_v1, %v3195_v33  ;;  %v3193_v47 = vadd.f32 %v3080_v60, %v8979_v2  ;;  %v3452_v52 = vpop.f32.mrf.mxu0 }
 0x1b9   : > { %v6245_v48 = vpop.f32.mrf.mxu1 }
 0x1ba   : > { %v9075_v49 = vadd.f32 %v3439_v23, %v3193_v47  ;;  %v3198_v6 = vadd.f32 %v6245_v48, %v8982_v27  ;;  %v6280_v14 = vpop.f32.mrf.mxu0 }
 0x1bb   : > { %v3093_v31 = vpop.f32.mrf.mxu1 }
 0x1bc   : > { %v9078_v20 = vadd.f32 %v6279_v57, %v3198_v6  ;;  %v3196_v36 = vadd.f32 %v3093_v31, %v8985_v18  ;;  %v3455_v39 = vpop.f32.mrf.mxu0 }
 0x1bd   : > { %v6246_v38 = vpop.f32.mrf.mxu1 }
 0x1be   : > { %v9081_v5 = vadd.f32 %v3452_v52, %v3196_v36  ;;  %v3199_v28 = vadd.f32 %v6246_v38, %v8988_v13  ;;  %v6283_v45 = vpop.f32.mrf.mxu0 }
 0x1bf   : > { %v3096_v2 = vpop.f32.mrf.mxu1 }
 0x1c0   : > { %v9084_v37 = vadd.f32 %v6280_v14, %v3199_v28  ;;  %v3197_v21 = vadd.f32 %v3096_v2, %v8991_v8  ;;  %v3468_v61 = vpop.f32.mrf.mxu0 }
 0x1c1   : > { %v6249_v27 = vpop.f32.mrf.mxu1 }
 0x1c2   : > { %v9087_v54 = vadd.f32 %v3455_v39, %v3197_v21  ;;  %v3202_v10 = vadd.f32 %v6249_v27, %v8994_v53  ;;  %v6284_v40 = vpop.f32.mrf.mxu0 }
 0x1c3   : > { %v3109_v18 = vpop.f32.mrf.mxu1 }
 0x1c4   : > { %v9090_v46 = vadd.f32 %v6283_v45, %v3202_v10  ;;  %v3200_v4 = vadd.f32 %v3109_v18, %v8997_v12  ;;  %v3471_v62 = vpop.f32.mrf.mxu0 }
 0x1c5   : > { %v6250_v13 = vpop.f32.mrf.mxu1 }
 0x1c6   : > { %v9093_v7 = vadd.f32 %v3468_v61, %v3200_v4  ;;  %v3203_v1 = vadd.f32 %v6250_v13, %v9000_v16  ;;  %v6287_v0 = vpop.f32.mrf.mxu0 }
 0x1c7   : > { %v3112_v8 = vpop.f32.mrf.mxu1 }
 0x1c8   : > { %v9096_v51 = vadd.f32 %v6284_v40, %v3203_v1  ;;  %v3201_v23 = vadd.f32 %v3112_v8, %v9003_v11  ;;  %v3484_v26 = vpop.f32.mrf.mxu0 }
 0x1c9   : > { %v6253_v53 = vpop.f32.mrf.mxu1 }
 0x1ca   : > { %v9099_v33 = vadd.f32 %v3471_v62, %v3201_v23  ;;  %v3206_v57 = vadd.f32 %v6253_v53, %v9006_v29  ;;  %v6288_v60 = vpop.f32.mrf.mxu0 }
 0x1cb   : > { %v3125_v12 = vpop.f32.mrf.mxu1 }
 0x1cc   : > { %v9102_v47 = vadd.f32 %v6287_v0, %v3206_v57  ;;  %v3204_v52 = vadd.f32 %v3125_v12, %v9009_v9  ;;  %v3487_v48 = vpop.f32.mrf.mxu0 }
 0x1cd   : > { %v6254_v16 = vpop.f32.mrf.mxu1 }
 0x1ce   : > { %v9105_v6 = vadd.f32 %v3484_v26, %v3204_v52  ;;  %v3207_v14 = vadd.f32 %v6254_v16, %v9012_v34  ;;  %v6291_v31 = vpop.f32.mrf.mxu0 }
 0x1cf   : > { %v3128_v11 = vpop.f32.mrf.mxu1 }
 0x1d0   : > { %v9108_v36 = vadd.f32 %v6288_v60, %v3207_v14  ;;  %v3205_v39 = vadd.f32 %v3128_v11, %v9015_v59  ;;  %v3500_v38 = vpop.f32.mrf.mxu0 }
 0x1d1   : > { %v6257_v29 = vpop.f32.mrf.mxu1 }
 0x1d2   : > { %v9111_v28 = vadd.f32 %v3487_v48, %v3205_v39  ;;  %v3210_v45 = vadd.f32 %v6257_v29, %v9018_v58  ;;  %v6292_v2 = vpop.f32.mrf.mxu0 }
 0x1d3   : > { %v3141_v9 = vpop.f32.mrf.mxu1 }
 0x1d4   : > { %v9114_v21 = vadd.f32 %v6291_v31, %v3210_v45  ;;  %v3208_v61 = vadd.f32 %v3141_v9, %v9021_v55  ;;  %v3503_v27 = vpop.f32.mrf.mxu0 }
 0x1d5   : > { %v6258_v34 = vpop.f32.mrf.mxu1 }
 0x1d6   : > { %v9117_v10 = vadd.f32 %v3500_v38, %v3208_v61  ;;  %v3211_v40 = vadd.f32 %v6258_v34, %v9024_v56  ;;  %v6295_v18 = vpop.f32.mrf.mxu0 }
 0x1d7   : > { %v3144_v59 = vpop.f32.mrf.mxu1 }
 0x1d8   : > { %v9120_v4 = vadd.f32 %v6292_v2, %v3211_v40  ;;  %v3209_v62 = vadd.f32 %v3144_v59, %v9027_v24  ;;  %v3516_v13 = vpop.f32.mrf.mxu0 }
 0x1d9   : > { %v6261_v58 = vpop.f32.mrf.mxu1 }
 0x1da   : > { %v9123_v1 = vadd.f32 %v3503_v27, %v3209_v62  ;;  %v3214_v0 = vadd.f32 %v6261_v58, %v9030_v22  ;;  %v6296_v8 = vpop.f32.mrf.mxu0 }
 0x1db   : > { %v3157_v55 = vpop.f32.mrf.mxu1 }
 0x1dc   : > { %v9126_v23 = vadd.f32 %v6295_v18, %v3214_v0  ;;  %v3212_v26 = vadd.f32 %v3157_v55, %v9033_v15  ;;  %v3519_v53 = vpop.f32.mrf.mxu0 }
 0x1dd   : > { %v6262_v56 = vpop.f32.mrf.mxu1 }
 0x1de   : > { %v9129_v57 = vadd.f32 %v3516_v13, %v3212_v26  ;;  %v3215_v60 = vadd.f32 %v6262_v56, %v9036_v30  ;;  %v6299_v12 = vpop.f32.mrf.mxu0 }
 0x1df   : > { %v3160_v24 = vpop.f32.mrf.mxu1 }
 0x1e0   : > { %v9132_v52 = vadd.f32 %v6296_v8, %v3215_v60  ;;  %v3213_v48 = vadd.f32 %v3160_v24, %v9039_v3  ;;  %v3532_v16 = vpop.f32.mrf.mxu0 }
 0x1e1   : > { %v6265_v22 = vpop.f32.mrf.mxu1 }
 0x1e2   : > { %v9135_v14 = vadd.f32 %v3519_v53, %v3213_v48  ;;  %v3218_v31 = vadd.f32 %v6265_v22, %v9042_v42  ;;  %v9138_v11 = vpop.f32.mrf.mxu0 }
 0x1e3   : > { %v3173_v15 = vpop.f32.mrf.mxu1 }
 0x1e4   : > { %v9140_v39 = vadd.f32 %v6299_v12, %v3218_v31  ;;  %v3216_v38 = vadd.f32 %v3173_v15, %v9045_v44  ;;  %v9143_v30 = vpop.f32.mrf.mxu0 }
 0x1e5   : > { %v9145_v29 = vpop.f32.mrf.mxu1 }
 0x1e6   : > { %v9147_v45 = vadd.f32 %v3532_v16, %v3216_v38  ;;  %v6339_v3 = vpop.f32.mrf.mxu0 }
 0x1e7   : > { %v9149_v2 = vpop.f32.mrf.mxu1 }
 0x1e8   : > { %v4616_v9 = vpop.f32.mrf.mxu0 }
 0x1e9   : > { %v6305_v61 = vpop.f32.mrf.mxu1 }
 0x1ea   : > { %v4275_v42 = vadd.f32 %v6305_v61, %v9054_v43  ;;  %v6340_v27 = vpop.f32.mrf.mxu0 }
 0x1eb   : > { %v4146_v34 = vpop.f32.mrf.mxu1 }
 0x1ec   : > { %v9152_v40 = vadd.f32 %v6339_v3, %v4275_v42  ;;  %v4273_v18 = vadd.f32 %v4146_v34, %v9057_v63  ;;  %v4619_v44 = vpop.f32.mrf.mxu0 }
 0x1ed   : > { %v6306_v59 = vpop.f32.mrf.mxu1 }
 0x1ee   : > { %v9155_v62 = vadd.f32 %v4616_v9, %v4273_v18  ;;  %v4276_v13 = vadd.f32 %v6306_v59, %v9060_v25  ;;  %v6343_v58 = vpop.f32.mrf.mxu0 }
 0x1ef   : > { %v4149_v0 = vpop.f32.mrf.mxu1 }
 0x1f0   : > { %v9158_v8 = vadd.f32 %v6340_v27, %v4276_v13  ;;  %v4274_v55 = vadd.f32 %v4149_v0, %v9063_v50  ;;  %v4632_v26 = vpop.f32.mrf.mxu0 }
 0x1f1   : > { %v6309_v43 = vpop.f32.mrf.mxu1 }
 0x1f2   : > { %v9161_v53 = vadd.f32 %v4619_v44, %v4274_v55  ;;  %v4279_v56 = vadd.f32 %v6309_v43, %v9066_v17  ;;  %v6344_v60 = vpop.f32.mrf.mxu0 }
 0x1f3   : > { %v4162_v63 = vpop.f32.mrf.mxu1 }
 0x1f4   : > { %v9164_v12 = vadd.f32 %v6343_v58, %v4279_v56  ;;  %v4277_v24 = vadd.f32 %v4162_v63, %v9069_v19  ;;  %v4635_v48 = vpop.f32.mrf.mxu0 }
 0x1f5   : > { %v6310_v25 = vpop.f32.mrf.mxu1 }
 0x1f6   : > { %v9167_v16 = vadd.f32 %v4632_v26, %v4277_v24  ;;  %v4280_v22 = vadd.f32 %v6310_v25, %v9072_v41  ;;  %v6347_v31 = vpop.f32.mrf.mxu0 }
 0x1f7   : > { %v4165_v50 = vpop.f32.mrf.mxu1 }
 0x1f8   : > { %v9170_v15 = vadd.f32 %v6344_v60, %v4280_v22  ;;  %v4278_v38 = vadd.f32 %v4165_v50, %v9075_v49  ;;  %v4648_v3 = vpop.f32.mrf.mxu0 }
 0x1f9   : > { %v6313_v17 = vpop.f32.mrf.mxu1 }
 0x1fa   : > { %v9173_v9 = vadd.f32 %v4635_v48, %v4278_v38  ;;  %v4283_v61 = vadd.f32 %v6313_v17, %v9078_v20  ;;  %v6348_v42 = vpop.f32.mrf.mxu0 }
 0x1fb   : > { %v4178_v19 = vpop.f32.mrf.mxu1 }
 0x1fc   : > { %v9176_v27 = vadd.f32 %v6347_v31, %v4283_v61  ;;  %v4281_v34 = vadd.f32 %v4178_v19, %v9081_v5  ;;  %v4651_v18 = vpop.f32.mrf.mxu0 }
 0x1fd   : > { %v6314_v41 = vpop.f32.mrf.mxu1 }
 0x1fe   : > { %v9179_v44 = vadd.f32 %v4648_v3, %v4281_v34  ;;  %v4284_v59 = vadd.f32 %v6314_v41, %v9084_v37  ;;  %v6351_v13 = vpop.f32.mrf.mxu0 }
 0x1ff   : > { %v4181_v49 = vpop.f32.mrf.mxu1 }
 0x200   : > { %v9182_v58 = vadd.f32 %v6348_v42, %v4284_v59  ;;  %v4282_v0 = vadd.f32 %v4181_v49, %v9087_v54  ;;  %v4664_v55 = vpop.f32.mrf.mxu0 }
 0x201   : > { %v6317_v20 = vpop.f32.mrf.mxu1 }
 0x202   : > { %v9185_v26 = vadd.f32 %v4651_v18, %v4282_v0  ;;  %v4287_v43 = vadd.f32 %v6317_v20, %v9090_v46  ;;  %v6352_v56 = vpop.f32.mrf.mxu0 }
 0x203   : > { %v4194_v5 = vpop.f32.mrf.mxu1 }
 0x204   : > { %v9188_v60 = vadd.f32 %v6351_v13, %v4287_v43  ;;  %v4285_v63 = vadd.f32 %v4194_v5, %v9093_v7  ;;  %v4667_v24 = vpop.f32.mrf.mxu0 }
 0x205   : > { %v6318_v37 = vpop.f32.mrf.mxu1 }
 0x206   : > { %v9191_v48 = vadd.f32 %v4664_v55, %v4285_v63  ;;  %v4288_v25 = vadd.f32 %v6318_v37, %v9096_v51  ;;  %v6355_v22 = vpop.f32.mrf.mxu0 }
 0x207   : > { %v4197_v54 = vpop.f32.mrf.mxu1 }
 0x208   : > { %v9194_v31 = vadd.f32 %v6352_v56, %v4288_v25  ;;  %v4286_v50 = vadd.f32 %v4197_v54, %v9099_v33  ;;  %v4680_v38 = vpop.f32.mrf.mxu0 }
 0x209   : > { %v6321_v46 = vpop.f32.mrf.mxu1 }
 0x20a   : > { %v9197_v3 = vadd.f32 %v4667_v24, %v4286_v50  ;;  %v4291_v17 = vadd.f32 %v6321_v46, %v9102_v47  ;;  %v6356_v61 = vpop.f32.mrf.mxu0 }
 0x20b   : > { %v4210_v7 = vpop.f32.mrf.mxu1 }
 0x20c   : > { %v9200_v42 = vadd.f32 %v6355_v22, %v4291_v17  ;;  %v4289_v19 = vadd.f32 %v4210_v7, %v9105_v6  ;;  %v4683_v34 = vpop.f32.mrf.mxu0 }
 0x20d   : > { %v6322_v51 = vpop.f32.mrf.mxu1 }
 0x20e   : > { %v9203_v18 = vadd.f32 %v4680_v38, %v4289_v19  ;;  %v4292_v41 = vadd.f32 %v6322_v51, %v9108_v36 }
 0x20f   : > { %v6359_v59 = vpop.f32.mrf.mxu0  ;;  %v4213_v33 = vpop.f32.mrf.mxu1 }
 0x210   : > { %v9206_v13 = vadd.f32 %v6356_v61, %v4292_v41  ;;  %v4290_v49 = vadd.f32 %v4213_v33, %v9111_v28 }
 0x211   : > { %v4696_v0 = vpop.f32.mrf.mxu0  ;;  %v6325_v47 = vpop.f32.mrf.mxu1 }
 0x212   : > { %v9209_v55 = vadd.f32 %v4683_v34, %v4290_v49  ;;  %v4295_v20 = vadd.f32 %v6325_v47, %v9114_v21 }
 0x213   : > { %v6360_v43 = vpop.f32.mrf.mxu0  ;;  %v4226_v6 = vpop.f32.mrf.mxu1 }
 0x214   : > { %v9212_v56 = vadd.f32 %v6359_v59, %v4295_v20  ;;  %v4293_v5 = vadd.f32 %v4226_v6, %v9117_v10  ;;  %v3219_v59 = vadd.f32 %v9145_v29, %v9048_v35 }
 0x215   : > { %v4699_v63 = vpop.f32.mrf.mxu0  ;;  %v6326_v36 = vpop.f32.mrf.mxu1 }
 0x216   : > { %v9215_v24 = vadd.f32 %v4696_v0, %v4293_v5  ;;  %v4296_v37 = vadd.f32 %v6326_v36, %v9120_v4 }
 0x217   : > { %v6363_v25 = vpop.f32.mrf.mxu0  ;;  %v4229_v28 = vpop.f32.mrf.mxu1 }
 0x218   : > { %v9218_v22 = vadd.f32 %v6360_v43, %v4296_v37  ;;  %v4294_v54 = vadd.f32 %v4229_v28, %v9123_v1 }
 0x219   : > { %v4712_v50 = vpop.f32.mrf.mxu0  ;;  %v6329_v21 = vpop.f32.mrf.mxu1 }
 0x21a   : > { %v9221_v38 = vadd.f32 %v4699_v63, %v4294_v54  ;;  %v4299_v46 = vadd.f32 %v6329_v21, %v9126_v23 }
 0x21b   : > { %v6364_v17 = vpop.f32.mrf.mxu0  ;;  %v4242_v10 = vpop.f32.mrf.mxu1 }
 0x21c   : > { %v9224_v61 = vadd.f32 %v6363_v25, %v4299_v46  ;;  %v4297_v7 = vadd.f32 %v4242_v10, %v9129_v57  ;;  %v3217_v57 = vadd.f32 %v9149_v2, %v9051_v32 }
 0x21d   : > { %v4715_v19 = vpop.f32.mrf.mxu0  ;;  %v6330_v4 = vpop.f32.mrf.mxu1 }
 0x21e   : > { %v9227_v34 = vadd.f32 %v4712_v50, %v4297_v7  ;;  %v4300_v51 = vadd.f32 %v6330_v4, %v9132_v52  ;;  %v3578_v52 = vadd.f32 %v9138_v11, %v3219_v59 }
 0x21f   : > { %v6367_v41 = vpop.f32.mrf.mxu0  ;;  %v4245_v1 = vpop.f32.mrf.mxu1 }
 0x220   : > { %v9232_v33 = vadd.f32 %v6364_v17, %v4300_v51  ;;  %v4298_v23 = vadd.f32 %v4245_v1, %v9135_v14  ;;  %v3576_v14 = vadd.f32 %v9143_v30, %v3217_v57 }
 0x221   : > { %v6333_v49 = vpop.f32.mrf.mxu1  ;;  %v4728_v0 = vpop.f32.mrf.mxu0 }
 0x222   : > { %v9237_v47 = vadd.f32 %v4715_v19, %v4298_v23  ;;  %v4303_v20 = vadd.f32 %v6333_v49, %v9140_v39 }
 0x223   : > { %v4258_v43 = vpop.f32.mrf.mxu1  ;;  %v6368_v5 = vpop.f32.mrf.mxu0 }
 0x224   : > { %v9241_v6 = vadd.f32 %v6367_v41, %v4303_v20  ;;  %v4301_v35 = vadd.f32 %v4258_v43, %v9147_v45 }
 0x225   : > { %v6334_v29 = vpop.f32.mrf.mxu1  ;;  %v4731_v25 = vpop.f32.mrf.mxu0 }
 0x226   : > { %v9245_v63 = vadd.f32 %v4728_v0, %v4301_v35  ;;  %v4304_v36 = vadd.f32 %v6334_v29, %v3578_v52  ;;  %4778 = sbr.rel (%p5869_p7) target bundleno = 677 (0x2a5), region = 40 }
 0x227   : > { %v4261_v37 = vpop.f32.mrf.mxu1 }
 0x228   : > { %v9247_v32 = vadd.f32 %v6368_v5, %v4304_v36  ;;  %v4302_v2 = vadd.f32 %v4261_v37, %v3576_v14 }
 0x22a   : > { %v9249_v39 = vadd.f32 %v4731_v25, %v4302_v2 }
 0x22b   : > { %4782 = sbr.rel (%p5870_p8) target bundleno = 562 (0x232), region = 44 }
 0x230   : > { %v6643_v11 = vmov 0.0  }
 0x231   : > { %4783 = vst [vmem:[#allocation2] sm:$0x1] %v6643_v11  ;;  %4784 = vst [vmem:[#allocation3] sm:$0x1] %v6643_v11 }
 0x232 PF: > { %v4786_v30 = vadd.f32 %v9161_v53, %v9155_v62  ;;  %v4826_v54 = vmul.f32 %v9155_v62, %v9155_v62  ;;  %v4827_v50 = vmul.f32 %v9161_v53, %v9161_v53  ;;  %v4828_v46 = vmul.f32 %v9152_v40, %v9152_v40  ;;  %p5871_p9 = scmp.ne.s32.totalorder %s6625_s15, 1 }
 0x233   : > { %v4829_v10 = vmul.f32 %v9158_v8, %v9158_v8  ;;  %v4830_v4 = vmul.f32 %v9167_v16, %v9167_v16  ;;  %v4831_v1 = vmul.f32 %v9173_v9, %v9173_v9  ;;  %v4832_v49 = vmul.f32 %v9164_v12, %v9164_v12 }
 0x234   : > { %v4787_v45 = vadd.f32 %v4786_v30, %v9152_v40  ;;  %v4858_v7 = vadd.f32 %v4827_v50, %v4826_v54  ;;  %v4833_v20 = vmul.f32 %v9170_v15, %v9170_v15  ;;  %v4834_v35 = vmul.f32 %v9179_v44, %v9179_v44 }
 0x235   : > { %v4835_v14 = vmul.f32 %v9185_v26, %v9185_v26  ;;  %v4836_v2 = vmul.f32 %v9176_v27, %v9176_v27  ;;  %v4837_v30 = vmul.f32 %v9182_v58, %v9182_v58  ;;  %v4838_v54 = vmul.f32 %v9191_v48, %v9191_v48 }
 0x236   : > { %v4788_v28 = vadd.f32 %v4787_v45, %v9158_v8  ;;  %v4859_v51 = vadd.f32 %v4858_v7, %v4828_v46  ;;  %v4839_v46 = vmul.f32 %v9197_v3, %v9197_v3  ;;  %v4840_v7 = vmul.f32 %v9188_v60, %v9188_v60 }
 0x238   : > { %v4789_v21 = vadd.f32 %v4788_v28, %v9167_v16  ;;  %v4860_v59 = vadd.f32 %v4859_v51, %v4829_v10  ;;  %v4841_v51 = vmul.f32 %v9194_v31, %v9194_v31 }
 0x23a   : > { %v4790_v17 = vadd.f32 %v4789_v21, %v9173_v9  ;;  %v4861_v0 = vadd.f32 %v4860_v59, %v4830_v4  ;;  %v4842_v59 = vmul.f32 %v9203_v18, %v9203_v18 }
 0x23c   : > { %v4791_v19 = vadd.f32 %v4790_v17, %v9164_v12  ;;  %v4862_v43 = vadd.f32 %v4861_v0, %v4831_v1  ;;  %v4843_v0 = vmul.f32 %v9209_v55, %v9209_v55 }
 0x23e   : > { %v4792_v41 = vadd.f32 %v4791_v19, %v9170_v15  ;;  %v4863_v29 = vadd.f32 %v4862_v43, %v4832_v49  ;;  %v4844_v43 = vmul.f32 %v9200_v42, %v9200_v42 }
 0x240   : > { %v4793_v23 = vadd.f32 %v4792_v41, %v9179_v44  ;;  %v4864_v36 = vadd.f32 %v4863_v29, %v4833_v20  ;;  %v4845_v29 = vmul.f32 %v9206_v13, %v9206_v13 }
 0x242   : > { %v4794_v57 = vadd.f32 %v4793_v23, %v9185_v26  ;;  %v4865_v25 = vadd.f32 %v4864_v36, %v4834_v35  ;;  %v4846_v36 = vmul.f32 %v9215_v24, %v9215_v24 }
 0x244   : > { %v4795_v52 = vadd.f32 %v4794_v57, %v9176_v27  ;;  %v4866_v45 = vadd.f32 %v4865_v25, %v4835_v14  ;;  %v4847_v25 = vmul.f32 %v9221_v38, %v9221_v38 }
 0x246   : > { %v4796_v5 = vadd.f32 %v4795_v52, %v9182_v58  ;;  %v4867_v50 = vadd.f32 %v4866_v45, %v4836_v2  ;;  %v4848_v45 = vmul.f32 %v9212_v56, %v9212_v56 }
 0x248   : > { %v4797_v37 = vadd.f32 %v4796_v5, %v9191_v48  ;;  %v4868_v17 = vadd.f32 %v4867_v50, %v4837_v30  ;;  %v4849_v50 = vmul.f32 %v9218_v22, %v9218_v22 }
 0x24a   : > { %v4798_v11 = vadd.f32 %v4797_v37, %v9197_v3  ;;  %v4869_v19 = vadd.f32 %v4868_v17, %v4838_v54  ;;  %v4850_v17 = vmul.f32 %v9227_v34, %v9227_v34 }
 0x24c   : > { %v4799_v28 = vadd.f32 %v4798_v11, %v9188_v60  ;;  %v4870_v41 = vadd.f32 %v4869_v19, %v4839_v46  ;;  %v4851_v19 = vmul.f32 %v9237_v47, %v9237_v47 }
 0x24e   : > { %v4800_v21 = vadd.f32 %v4799_v28, %v9194_v31  ;;  %v4871_v23 = vadd.f32 %v4870_v41, %v4840_v7  ;;  %v4852_v41 = vmul.f32 %v9224_v61, %v9224_v61 }
 0x250   : > { %v4801_v10 = vadd.f32 %v4800_v21, %v9203_v18  ;;  %v4872_v57 = vadd.f32 %v4871_v23, %v4841_v51  ;;  %v4853_v23 = vmul.f32 %v9232_v33, %v9232_v33 }
 0x252   : > { %v4802_v4 = vadd.f32 %v4801_v10, %v9209_v55  ;;  %v4873_v52 = vadd.f32 %v4872_v57, %v4842_v59  ;;  %v4854_v57 = vmul.f32 %v9245_v63, %v9245_v63 }
 0x254   : > { %v4803_v1 = vadd.f32 %v4802_v4, %v9200_v42  ;;  %v4874_v5 = vadd.f32 %v4873_v52, %v4843_v0  ;;  %v4855_v52 = vmul.f32 %v9249_v39, %v9249_v39 }
 0x256   : > { %v4804_v49 = vadd.f32 %v4803_v1, %v9206_v13  ;;  %v4875_v37 = vadd.f32 %v4874_v5, %v4844_v43  ;;  %v4856_v5 = vmul.f32 %v9241_v6, %v9241_v6 }
 0x258   : > { %v4805_v20 = vadd.f32 %v4804_v49, %v9215_v24  ;;  %v4876_v11 = vadd.f32 %v4875_v37, %v4845_v29  ;;  %v4857_v37 = vmul.f32 %v9247_v32, %v9247_v32 }
 0x25a   : > { %v4806_v35 = vadd.f32 %v4805_v20, %v9221_v38  ;;  %v4877_v28 = vadd.f32 %v4876_v11, %v4846_v36 }
 0x25c   : > { %v4807_v14 = vadd.f32 %v4806_v35, %v9212_v56  ;;  %v4878_v21 = vadd.f32 %v4877_v28, %v4847_v25 }
 0x25e   : > { %v4808_v2 = vadd.f32 %v4807_v14, %v9218_v22  ;;  %v4879_v10 = vadd.f32 %v4878_v21, %v4848_v45 }
 0x260   : > { %v4809_v30 = vadd.f32 %v4808_v2, %v9227_v34  ;;  %v4880_v4 = vadd.f32 %v4879_v10, %v4849_v50 }
 0x262   : > { %v4810_v54 = vadd.f32 %v4809_v30, %v9237_v47  ;;  %v4881_v1 = vadd.f32 %v4880_v4, %v4850_v17  ;;  %v4825_v4 = vld [vmem:[#allocation3] sm:$0x1] }
 0x264   : > { %v4811_v46 = vadd.f32 %v4810_v54, %v9224_v61  ;;  %v4882_v49 = vadd.f32 %v4881_v1, %v4851_v19  ;;  %v4785_v54 = vld [vmem:[#allocation2] sm:$0x1] }
 0x266   : > { %v4812_v7 = vadd.f32 %v4811_v46, %v9232_v33  ;;  %v4883_v20 = vadd.f32 %v4882_v49, %v4852_v41 }
 0x268   : > { %v4813_v51 = vadd.f32 %v4812_v7, %v9245_v63  ;;  %v4884_v35 = vadd.f32 %v4883_v20, %v4853_v23 }
 0x26a   : > { %v4814_v59 = vadd.f32 %v4813_v51, %v9249_v39  ;;  %v4885_v14 = vadd.f32 %v4884_v35, %v4854_v57 }
 0x26c   : > { %v4815_v0 = vadd.f32 %v4814_v59, %v9241_v6  ;;  %v4886_v2 = vadd.f32 %v4885_v14, %v4855_v52 }
 0x26e   : > { %v4816_v43 = vadd.f32 %v4815_v0, %v9247_v32  ;;  %v4887_v11 = vadd.f32 %v4886_v2, %v4856_v5 }
 0x270   : > { %v4817_v29 = vrot.slane %v4816_v43, 4  ;;  %v4888_v45 = vadd.f32 %v4887_v11, %v4857_v37 }
 0x272   : > { %v4818_v36 = vadd.f32 %v4817_v29, %v4816_v43  ;;  %v4889_v50 = vrot.slane %v4888_v45, 4 }
 0x274   : > { %v4819_v25 = vrot.slane %v4818_v36, 2  ;;  %v4890_v46 = vadd.f32 %v4889_v50, %v4888_v45 }
 0x276   : > { %v4820_v30 = vadd.f32 %v4819_v25, %v4818_v36  ;;  %v4891_v10 = vrot.slane %v4890_v46, 2 }
 0x278   : > { %v4821_v28 = vrot.slane %v4820_v30, 1  ;;  %v4892_v7 = vadd.f32 %v4891_v10, %v4890_v46 }
 0x27a   : > { %v4822_v21 = vadd.f32 %v4821_v28, %v4820_v30  ;;  %v4893_v19 = vrot.slane %v4892_v7, 1 }
 0x27c   : > { %v4823_v17 = vadd.f32 %v4822_v21, %v4785_v54  ;;  %v4894_v51 = vadd.f32 %v4893_v19, %v4892_v7  ;;  %4900 = sbr.rel (%p5871_p9) target bundleno = 677 (0x2a5), region = 48 }
 0x27e   : > { %4824 = vst [vmem:[#allocation2] sm:$0x1] %v4823_v17  ;;  %v4895_v41 = vadd.f32 %v4894_v51, %v4825_v4 }
 0x280   : > { %4896 = vst [vmem:[#allocation3] sm:$0x1] %v4895_v41 }
 0x281   : > { %v4908_v52 = vld [vmem:[%s9634_s2] sm:$0x1] }
 0x282   : > { %v4913_v5 = vld [vmem:[%s9635_s3] sm:$0x1] }
 0x285   : > { %v4901_v1 = vld [vmem:[#allocation2] sm:$0x1] }
 0x286   : > { %v4902_v23 = vmul.f32 0.001953125, %v4901_v1 }
 0x287   : > { %v4903_v59 = vld [vmem:[#allocation3] sm:$0x1] }
 0x288   : > { %v4904_v49 = vmul.f32 0.001953125, %v4903_v59  ;;  %v4905_v0 = vmul.f32 %v4902_v23, %v4902_v23 }
 0x28a   : > { %v4906_v57 = vsub.f32 %v4904_v49, %v4905_v0 }
 0x28c   : > { %v4907_v20 = vmax.f32 %v4906_v57, 0.0 }
 0x28e   : > { %v4909_v43 = vadd.f32 1e-05, %v4907_v20 }
 0x290   : > { %6473 = vrsqrt.f32 %v4909_v43 }
 0x29d   : > { %v6474_v35 = vpop.eup %6473 }
 0x29e   : > { %v4911_v29 = vmul.f32 %v6474_v35, %v4908_v52 }
 0x2a0   : > { %4912 = vst [vmem:[#allocation4] sm:$0x1] %v4911_v29  ;;  %v4914_v14 = vmul.f32 %v4911_v29, %v4902_v23 }
 0x2a2   : > { %v4915_v36 = vsub.f32 %v4913_v5, %v4914_v14 }
 0x2a4   : > { %4916 = vst [vmem:[#allocation5] sm:$0x1] %v4915_v36 }
 0x2a5 PF: > { %p5872_p10 = scmp.ne.s32.totalorder %s6629_s16, 1 }
 0x2a7   : > { %4920 = sbr.rel (%p5872_p10) target bundleno = 771 (0x303), region = 52 }
 0x2ac   : > { %v9357_v37 = vld [vmem:[#allocation4] ss:$0 sm:$0xff]  ;;  %v9359_v2 = vld [vmem:[#allocation5] ss:$0 sm:$0xff] }
 0x2ad   : > { %v4928_v25 = vmul.f32 %v9357_v37, %v9155_v62  ;;  %v4929_v11 = vmul.f32 %v9357_v37, %v9161_v53  ;;  %v4930_v30 = vmul.f32 %v9357_v37, %v9152_v40  ;;  %v4931_v45 = vmul.f32 %v9357_v37, %v9158_v8 }
 0x2ae   : > { %v4932_v28 = vmul.f32 %v9357_v37, %v9167_v16  ;;  %v4933_v54 = vmul.f32 %v9357_v37, %v9173_v9  ;;  %v4934_v50 = vmul.f32 %v9357_v37, %v9164_v12  ;;  %v4935_v62 = vmul.f32 %v9357_v37, %v9170_v15 }
 0x2af   : > { %v9378_v53 = vadd.f32 %v9359_v2, %v4928_v25  ;;  %v9381_v40 = vadd.f32 %v9359_v2, %v4929_v11  ;;  %v9384_v8 = vadd.f32 %v9359_v2, %v4930_v30  ;;  %v9387_v16 = vadd.f32 %v9359_v2, %v4931_v45 }
 0x2b0   : > { %v9390_v9 = vadd.f32 %v9359_v2, %v4932_v28  ;;  %v9393_v12 = vadd.f32 %v9359_v2, %v4933_v54  ;;  %v9396_v15 = vadd.f32 %v9359_v2, %v4934_v50  ;;  %v4936_v10 = vmul.f32 %v9357_v37, %v9179_v44 }
 0x2b1   : > { %v5875_v21 = vmul.f32 -1.442695, %v9378_v53  ;;  %v5876_v46 = vmul.f32 -1.442695, %v9381_v40  ;;  %v5877_v17 = vmul.f32 -1.442695, %v9384_v8  ;;  %v9405_v19 = vadd.f32 %v9359_v2, %v4935_v62 }
 0x2b2   : > { %v5878_v7 = vmul.f32 -1.442695, %v9387_v16  ;;  %v4937_v4 = vmul.f32 %v9357_v37, %v9185_v26  ;;  %v5879_v51 = vmul.f32 -1.442695, %v9390_v9  ;;  %v5880_v41 = vmul.f32 -1.442695, %v9393_v12 }
 0x2b3   : > { %6475 = vpow2.f32 %v5875_v21  ;;  %v9412_v1 = vadd.f32 %v9359_v2, %v4936_v10  ;;  %v4938_v44 = vmul.f32 %v9357_v37, %v9176_v27  ;;  %v4939_v23 = vmul.f32 %v9357_v37, %v9182_v58 }
 0x2b4   : > { %6477 = vpow2.f32 %v5876_v46  ;;  %v9415_v59 = vadd.f32 %v9359_v2, %v4937_v4  ;;  %v5881_v26 = vmul.f32 -1.442695, %v9396_v15  ;;  %v4940_v49 = vmul.f32 %v9357_v37, %v9191_v48 }
 0x2b5   : > { %6479 = vpow2.f32 %v5877_v17  ;;  %v4941_v0 = vmul.f32 %v9357_v37, %v9197_v3  ;;  %v5882_v57 = vmul.f32 -1.442695, %v9405_v19  ;;  %v9428_v20 = vadd.f32 %v9359_v2, %v4938_v44 }
 0x2b6   : > { %6481 = vpow2.f32 %v5878_v7  ;;  %v9431_v27 = vadd.f32 %v9359_v2, %v4939_v23  ;;  %v5883_v58 = vmul.f32 -1.442695, %v9412_v1  ;;  %v9435_v43 = vadd.f32 %v9359_v2, %v4940_v49 }
 0x2b7   : > { %6483 = vpow2.f32 %v5879_v51  ;;  %v4942_v48 = vmul.f32 %v9357_v37, %v9188_v60  ;;  %v5884_v3 = vmul.f32 -1.442695, %v9415_v59  ;;  %v9441_v52 = vadd.f32 %v9359_v2, %v4941_v0 }
 0x2b8   : > { %6485 = vpow2.f32 %v5880_v41  ;;  %v4943_v35 = vmul.f32 %v9357_v37, %v9194_v31  ;;  %v5885_v29 = vmul.f32 -1.442695, %v9428_v20  ;;  %v5886_v14 = vmul.f32 -1.442695, %v9431_v27 }
 0x2b9   : > { %6487 = vpow2.f32 %v5881_v26  ;;  %v9447_v5 = vadd.f32 %v9359_v2, %v4942_v48  ;;  %v5887_v36 = vmul.f32 -1.442695, %v9435_v43  ;;  %v5888_v25 = vmul.f32 -1.442695, %v9441_v52 }
 0x2ba   : > { %6489 = vpow2.f32 %v5882_v57  ;;  %v9451_v60 = vadd.f32 %v9359_v2, %v4943_v35  ;;  %v4944_v62 = vmul.f32 %v9357_v37, %v9203_v18  ;;  %v4945_v7 = vmul.f32 %v9357_v37, %v9209_v55 }
 0x2bb   : > { %6491 = vpow2.f32 %v5883_v58  ;;  %v5889_v31 = vmul.f32 -1.442695, %v9447_v5  ;;  %v4946_v41 = vmul.f32 %v9357_v37, %v9200_v42  ;;  %v4947_v44 = vmul.f32 %v9357_v37, %v9206_v13 }
 0x2bc   : > { %6493 = vpow2.f32 %v5884_v3  ;;  %v5890_v11 = vmul.f32 -1.442695, %v9451_v60  ;;  %v9466_v26 = vadd.f32 %v9359_v2, %v4944_v62  ;;  %v4948_v55 = vmul.f32 %v9357_v37, %v9215_v24 }
 0x2bd   : > { %6495 = vpow2.f32 %v5885_v29  ;;  %v9471_v42 = vadd.f32 %v9359_v2, %v4945_v7  ;;  %v4949_v13 = vmul.f32 %v9357_v37, %v9221_v38  ;;  %v9476_v35 = vadd.f32 %v9359_v2, %v4946_v41 }
 0x2be   : > { %6497 = vpow2.f32 %v5886_v14  ;;  %v9479_v29 = vadd.f32 %v9359_v2, %v4947_v44 }
 0x2bf   : > { %6499 = vpow2.f32 %v5887_v36  ;;  %v5891_v36 = vmul.f32 -1.442695, %v9466_v26 }
 0x2c0   : > { %v6476_v30 = vpop.eup %6475  ;;  %6501 = vpow2.f32 %v5888_v25  ;;  %v4950_v25 = vmul.f32 %v9357_v37, %v9212_v56 }
 0x2c1   : > { %v6478_v45 = vpop.eup %6477  ;;  %v5095_v28 = vadd.f32 1.0, %v6476_v30  ;;  %6503 = vpow2.f32 %v5889_v31  ;;  %v4951_v30 = vmul.f32 %v9357_v37, %v9218_v22  ;;  %v5894_v22 = vmul.f32 -1.442695, %v9479_v29 }
 0x2c2   : > { %v6480_v54 = vpop.eup %6479  ;;  %v5096_v50 = vadd.f32 1.0, %v6478_v45  ;;  %6505 = vpow2.f32 %v5890_v11  ;;  %v9485_v11 = vadd.f32 %v9359_v2, %v4948_v55  ;;  %v9498_v7 = vadd.f32 %v9359_v2, %v4950_v25 }
 0x2c3   : > { %v6482_v21 = vpop.eup %6481  ;;  %6507 = vrcp.f32 %v5095_v28  ;;  %v5097_v46 = vadd.f32 1.0, %v6480_v54  ;;  %v5892_v54 = vmul.f32 -1.442695, %v9471_v42  ;;  %v9502_v44 = vadd.f32 %v9359_v2, %v4951_v30 }
 0x2c4   : > { %v6484_v17 = vpop.eup %6483  ;;  %6509 = vrcp.f32 %v5096_v50  ;;  %v5098_v10 = vadd.f32 1.0, %v6482_v21  ;;  %v9491_v50 = vadd.f32 %v9359_v2, %v4949_v13  ;;  %v5893_v21 = vmul.f32 -1.442695, %v9476_v35 }
 0x2c5   : > { %v6486_v4 = vpop.eup %6485  ;;  %6511 = vrcp.f32 %v5097_v46  ;;  %v5099_v51 = vadd.f32 1.0, %v6484_v17  ;;  %v4952_v46 = vmul.f32 %v9357_v37, %v9227_v34  ;;  %v5895_v41 = vmul.f32 -1.442695, %v9485_v11 }
 0x2c6   : > { %v6488_v23 = vpop.eup %6487  ;;  %6513 = vrcp.f32 %v5098_v10  ;;  %v5100_v18 = vadd.f32 1.0, %v6486_v4 }
 0x2c7   : > { %v6490_v49 = vpop.eup %6489  ;;  %6515 = vrcp.f32 %v5099_v51  ;;  %v5101_v0 = vadd.f32 1.0, %v6488_v23 }
 0x2c8   : > { %v6492_v57 = vpop.eup %6491  ;;  %6517 = vrcp.f32 %v5100_v18  ;;  %v5102_v58 = vadd.f32 1.0, %v6490_v49  ;;  %v5896_v18 = vmul.f32 -1.442695, %v9491_v50  ;;  %v4953_v49 = vmul.f32 %v9357_v37, %v9237_v47 }
 0x2c9   : > { %v6494_v48 = vpop.eup %6493  ;;  %6519 = vrcp.f32 %v5101_v0  ;;  %v5103_v3 = vadd.f32 1.0, %v6492_v57  ;;  %v9509_v57 = vadd.f32 %v9359_v2, %v4952_v46  ;;  %v4955_v47 = vmul.f32 %v9357_v37, %v9232_v33 }
 0x2ca   : > { %v6496_v14 = vpop.eup %6495  ;;  %6521 = vrcp.f32 %v5102_v58  ;;  %v5104_v24 = vadd.f32 1.0, %v6494_v48  ;;  %v4954_v58 = vmul.f32 %v9357_v37, %v9224_v61  ;;  %v4956_v61 = vmul.f32 %v9357_v37, %v9245_v63 }
 0x2cb   : > { %v6498_v31 = vpop.eup %6497  ;;  %6523 = vrcp.f32 %v5103_v3  ;;  %v5105_v38 = vadd.f32 1.0, %v6496_v14  ;;  %v5897_v3 = vmul.f32 -1.442695, %v9498_v7  ;;  %v4957_v33 = vmul.f32 %v9357_v37, %v9249_v39 }
 0x2cc   : > { %v6500_v45 = vpop.eup %6499  ;;  %6525 = vrcp.f32 %v5104_v24  ;;  %v5106_v28 = vadd.f32 1.0, %v6498_v31  ;;  %v5898_v24 = vmul.f32 -1.442695, %v9502_v44  ;;  %v9525_v31 = vadd.f32 %v9359_v2, %v4953_v49 }
 0x2cd   : > { %v6502_v62 = vpop.eup %6501  ;;  %6527 = vrcp.f32 %v5105_v38  ;;  %v5107_v56 = vadd.f32 1.0, %v6500_v45  ;;  %v9532_v63 = vadd.f32 %v9359_v2, %v4954_v58  ;;  %v9539_v39 = vadd.f32 %v9359_v2, %v4955_v47 }
 0x2ce   : > { %v6504_v17 = vpop.eup %6503  ;;  %6529 = vrcp.f32 %v5106_v28  ;;  %v5108_v10 = vadd.f32 1.0, %v6502_v62 }
 0x2cf   : > { %v6506_v4 = vpop.eup %6505  ;;  %6531 = vrcp.f32 %v5107_v56  ;;  %v5109_v51 = vadd.f32 1.0, %v6504_v17  ;;  %v5900_v56 = vmul.f32 -1.442695, %v9525_v31 }
 0x2d0   : > { %v6508_v23 = vpop.eup %6507  ;;  %6533 = vrcp.f32 %v5108_v10  ;;  %v5110_v34 = vadd.f32 1.0, %v6506_v4  ;;  %v5902_v10 = vmul.f32 -1.442695, %v9539_v39 }
 0x2d1   : > { %v6510_v0 = vpop.eup %6509  ;;  %v5191_v55 = vmul.f32 %v6508_v23, %v9378_v53  ;;  %6535 = vrcp.f32 %v5109_v51 }
 0x2d2   : > { %v6512_v13 = vpop.eup %6511  ;;  %v5192_v48 = vmul.f32 %v6510_v0, %v9381_v40  ;;  %6537 = vrcp.f32 %v5110_v34 }
 0x2d3   : > { %v6514_v14 = vpop.eup %6513  ;;  %5223 = vst [vmem:[%s6724_s8] sm:$0xff] %v5191_v55  ;;  %v5193_v53 = vmul.f32 %v6512_v13, %v9384_v8  ;;  %6539 = vpow2.f32 %v5891_v36 }
 0x2d4   : > { %v6516_v25 = vpop.eup %6515  ;;  %5224 = vst [vmem:[%s6724_s8 + $0x8] sm:$0xff] %v5192_v48  ;;  %v5194_v40 = vmul.f32 %v6514_v14, %v9387_v16  ;;  %6541 = vpow2.f32 %v5892_v54  ;;  %v4958_v16 = vmul.f32 %v9357_v37, %v9241_v6  ;;  %v5899_v6 = vmul.f32 -1.442695, %v9509_v57 }
 0x2d5   : > { %v6518_v8 = vpop.eup %6517  ;;  %5225 = vst [vmem:[%s6724_s8 + $0x10] sm:$0xff] %v5193_v53  ;;  %v5195_v36 = vmul.f32 %v6516_v25, %v9390_v9  ;;  %6543 = vpow2.f32 %v5893_v21  ;;  %v4959_v9 = vmul.f32 %v9357_v37, %v9247_v32  ;;  %v9547_v54 = vadd.f32 %v9359_v2, %v4956_v61 }
 0x2d6   : > { %v6520_v38 = vpop.eup %6519  ;;  %5226 = vst [vmem:[%s6724_s8 + $0x18] sm:$0xff] %v5194_v40  ;;  %v5196_v30 = vmul.f32 %v6518_v8, %v9393_v12  ;;  %6545 = vpow2.f32 %v5894_v22  ;;  %v9553_v32 = vadd.f32 %v9359_v2, %v4957_v33  ;;  %v5901_v21 = vmul.f32 -1.442695, %v9532_v63 }
 0x2d7   : > { %v6522_v45 = vpop.eup %6521  ;;  %5227 = vst [vmem:[%s6724_s8 + $0x20] sm:$0xff] %v5195_v36  ;;  %v5197_v28 = vmul.f32 %v6520_v38, %v9396_v15  ;;  %6547 = vpow2.f32 %v5895_v41  ;;  %v9559_v46 = vadd.f32 %v9359_v2, %v4958_v16  ;;  %v9565_v22 = vadd.f32 %v9359_v2, %v4959_v9 }
 0x2d8   : > { %v6524_v12 = vpop.eup %6523  ;;  %5228 = vst [vmem:[%s6724_s8 + $0x28] sm:$0xff] %v5196_v30  ;;  %v5198_v62 = vmul.f32 %v6522_v45, %v9405_v19  ;;  %6549 = vpow2.f32 %v5896_v18  ;;  %v5903_v51 = vmul.f32 -1.442695, %v9547_v54 }
 0x2d9   : > { %v6526_v37 = vpop.eup %6525  ;;  %5229 = vst [vmem:[%s6724_s8 + $0x30] sm:$0xff] %v5197_v28  ;;  %v5199_v15 = vmul.f32 %v6524_v12, %v9412_v1  ;;  %6551 = vpow2.f32 %v5897_v3 }
 0x2da   : > { %v6528_v17 = vpop.eup %6527  ;;  %5230 = vst [vmem:[%s6724_s8 + $0x38] sm:$0xff] %v5198_v62  ;;  %v5200_v19 = vmul.f32 %v6526_v37, %v9415_v59  ;;  %6553 = vpow2.f32 %v5898_v24  ;;  %v5904_v59 = vmul.f32 -1.442695, %v9553_v32 }
 0x2db   : > { %v6530_v4 = vpop.eup %6529  ;;  %5231 = vst [vmem:[%s6724_s8 + $0x40] sm:$0xff] %v5199_v15  ;;  %v5201_v1 = vmul.f32 %v6528_v17, %v9428_v20  ;;  %6555 = vpow2.f32 %v5899_v6  ;;  %v5905_v20 = vmul.f32 -1.442695, %v9559_v46 }
 0x2dc   : > { %v6532_v41 = vpop.eup %6531  ;;  %5232 = vst [vmem:[%s6724_s8 + $0x48] sm:$0xff] %v5200_v19  ;;  %v5202_v23 = vmul.f32 %v6530_v4, %v9431_v27  ;;  %6557 = vpow2.f32 %v5900_v56  ;;  %v5906_v27 = vmul.f32 -1.442695, %v9565_v22 }
 0x2dd   : > { %v6534_v34 = vpop.eup %6533  ;;  %5233 = vst [vmem:[%s6724_s8 + $0x50] sm:$0xff] %v5201_v1  ;;  %v5203_v2 = vmul.f32 %v6532_v41, %v9435_v43  ;;  %6559 = vpow2.f32 %v5901_v21 }
 0x2de   : > { %v6536_v18 = vpop.eup %6535  ;;  %5234 = vst [vmem:[%s6724_s8 + $0x58] sm:$0xff] %v5202_v23  ;;  %v5204_v49 = vmul.f32 %v6534_v34, %v9441_v52  ;;  %6561 = vpow2.f32 %v5902_v10 }
 0x2df   : > { %v6538_v0 = vpop.eup %6537  ;;  %5235 = vst [vmem:[%s6724_s8 + $0x60] sm:$0xff] %v5203_v2  ;;  %v5205_v55 = vmul.f32 %v6536_v18, %v9447_v5  ;;  %6563 = vpow2.f32 %v5903_v51 }
 0x2e0   : > { %v6540_v58 = vpop.eup %6539  ;;  %5236 = vst [vmem:[%s6724_s8 + $0x68] sm:$0xff] %v5204_v49  ;;  %v5206_v43 = vmul.f32 %v6538_v0, %v9451_v60  ;;  %6565 = vpow2.f32 %v5904_v59 }
 0x2e1   : > { %v6542_v13 = vpop.eup %6541  ;;  %5237 = vst [vmem:[%s6724_s8 + $0x70] sm:$0xff] %v5205_v55  ;;  %v5111_v48 = vadd.f32 1.0, %v6540_v58  ;;  %6567 = vpow2.f32 %v5905_v20 }
 0x2e2   : > { %v6544_v3 = vpop.eup %6543  ;;  %5238 = vst [vmem:[%s6724_s8 + $0x78] sm:$0xff] %v5206_v43  ;;  %v5112_v52 = vadd.f32 1.0, %v6542_v13  ;;  %6569 = vpow2.f32 %v5906_v27 }
 0x2e3   : > { %v6546_v47 = vpop.eup %6545  ;;  %6571 = vrcp.f32 %v5111_v48  ;;  %v5113_v14 = vadd.f32 1.0, %v6544_v3 }
 0x2e4   : > { %v6548_v53 = vpop.eup %6547  ;;  %6573 = vrcp.f32 %v5112_v52  ;;  %v5114_v5 = vadd.f32 1.0, %v6546_v47 }
 0x2e5   : > { %v6550_v24 = vpop.eup %6549  ;;  %6575 = vrcp.f32 %v5113_v14  ;;  %v5115_v61 = vadd.f32 1.0, %v6548_v53 }
 0x2e6   : > { %v6552_v25 = vpop.eup %6551  ;;  %6577 = vrcp.f32 %v5114_v5  ;;  %v5116_v60 = vadd.f32 1.0, %v6550_v24 }
 0x2e7   : > { %v6554_v40 = vpop.eup %6553  ;;  %6579 = vrcp.f32 %v5115_v61  ;;  %v5117_v33 = vadd.f32 1.0, %v6552_v25 }
 0x2e8   : > { %v6556_v8 = vpop.eup %6555  ;;  %6581 = vrcp.f32 %v5116_v60  ;;  %v5118_v36 = vadd.f32 1.0, %v6554_v40 }
 0x2e9   : > { %v6558_v16 = vpop.eup %6557  ;;  %6583 = vrcp.f32 %v5117_v33  ;;  %v5119_v38 = vadd.f32 1.0, %v6556_v8 }
 0x2ea   : > { %v6560_v30 = vpop.eup %6559  ;;  %6585 = vrcp.f32 %v5118_v36  ;;  %v5120_v9 = vadd.f32 1.0, %v6558_v16 }
 0x2eb   : > { %v6562_v45 = vpop.eup %6561  ;;  %6587 = vrcp.f32 %v5119_v38  ;;  %v5121_v28 = vadd.f32 1.0, %v6560_v30 }
 0x2ec   : > { %v6564_v6 = vpop.eup %6563  ;;  %6589 = vrcp.f32 %v5120_v9  ;;  %v5122_v12 = vadd.f32 1.0, %v6562_v45 }
 0x2ed   : > { %v6566_v62 = vpop.eup %6565  ;;  %6591 = vrcp.f32 %v5121_v28  ;;  %v5123_v56 = vadd.f32 1.0, %v6564_v6 }
 0x2ee   : > { %v6568_v37 = vpop.eup %6567  ;;  %6593 = vrcp.f32 %v5122_v12  ;;  %v5124_v15 = vadd.f32 1.0, %v6566_v62 }
 0x2ef   : > { %v6570_v21 = vpop.eup %6569  ;;  %6595 = vrcp.f32 %v5123_v56  ;;  %v5125_v17 = vadd.f32 1.0, %v6568_v37 }
 0x2f0   : > { %v6572_v19 = vpop.eup %6571  ;;  %6597 = vrcp.f32 %v5124_v15  ;;  %v5126_v10 = vadd.f32 1.0, %v6570_v21 }
 0x2f1   : > { %v6574_v4 = vpop.eup %6573  ;;  %v5207_v1 = vmul.f32 %v6572_v19, %v9466_v26  ;;  %6599 = vrcp.f32 %v5125_v17 }
 0x2f2   : > { %v6576_v51 = vpop.eup %6575  ;;  %v5208_v41 = vmul.f32 %v6574_v4, %v9471_v42  ;;  %6601 = vrcp.f32 %v5126_v10 }
 0x2f3   : > { %v6578_v23 = vpop.eup %6577  ;;  %5239 = vst [vmem:[%s6724_s8 + $0x80] sm:$0xff] %v5207_v1  ;;  %v5209_v59 = vmul.f32 %v6576_v51, %v9476_v35 }
 0x2f4   : > { %v6580_v34 = vpop.eup %6579  ;;  %5240 = vst [vmem:[%s6724_s8 + $0x88] sm:$0xff] %v5208_v41  ;;  %v5210_v2 = vmul.f32 %v6578_v23, %v9479_v29 }
 0x2f5   : > { %v6582_v20 = vpop.eup %6581  ;;  %5241 = vst [vmem:[%s6724_s8 + $0x90] sm:$0xff] %v5209_v59  ;;  %v5211_v26 = vmul.f32 %v6580_v34, %v9485_v11 }
 0x2f6   : > { %v6584_v18 = vpop.eup %6583  ;;  %5242 = vst [vmem:[%s6724_s8 + $0x98] sm:$0xff] %v5210_v2  ;;  %v5212_v42 = vmul.f32 %v6582_v20, %v9491_v50 }
 0x2f7   : > { %v6586_v49 = vpop.eup %6585  ;;  %5243 = vst [vmem:[%s6724_s8 + $0xa0] sm:$0xff] %v5211_v26  ;;  %v5213_v35 = vmul.f32 %v6584_v18, %v9498_v7 }
 0x2f8   : > { %v6588_v27 = vpop.eup %6587  ;;  %5244 = vst [vmem:[%s6724_s8 + $0xa8] sm:$0xff] %v5212_v42  ;;  %v5214_v29 = vmul.f32 %v6586_v49, %v9502_v44 }
 0x2f9   : > { %v6590_v0 = vpop.eup %6589  ;;  %5245 = vst [vmem:[%s6724_s8 + $0xb0] sm:$0xff] %v5213_v35  ;;  %v5215_v11 = vmul.f32 %v6588_v27, %v9509_v57 }
 0x2fa   : > { %v6592_v55 = vpop.eup %6591  ;;  %5246 = vst [vmem:[%s6724_s8 + $0xb8] sm:$0xff] %v5214_v29  ;;  %v5216_v50 = vmul.f32 %v6590_v0, %v9525_v31 }
 0x2fb   : > { %v6594_v58 = vpop.eup %6593  ;;  %5247 = vst [vmem:[%s6724_s8 + $0xc0] sm:$0xff] %v5215_v11  ;;  %v5217_v7 = vmul.f32 %v6592_v55, %v9532_v63 }
 0x2fc   : > { %v6596_v43 = vpop.eup %6595  ;;  %5248 = vst [vmem:[%s6724_s8 + $0xc8] sm:$0xff] %v5216_v50  ;;  %v5218_v44 = vmul.f32 %v6594_v58, %v9539_v39 }
 0x2fd   : > { %v6598_v13 = vpop.eup %6597  ;;  %5249 = vst [vmem:[%s6724_s8 + $0xd0] sm:$0xff] %v5217_v7  ;;  %v5219_v57 = vmul.f32 %v6596_v43, %v9547_v54 }
 0x2fe   : > { %v6600_v48 = vpop.eup %6599  ;;  %5250 = vst [vmem:[%s6724_s8 + $0xd8] sm:$0xff] %v5218_v44  ;;  %v5220_v3 = vmul.f32 %v6598_v13, %v9553_v32 }
 0x2ff   : > { %v6602_v31 = vpop.eup %6601  ;;  %5251 = vst [vmem:[%s6724_s8 + $0xe0] sm:$0xff] %v5219_v57  ;;  %v5221_v52 = vmul.f32 %v6600_v48, %v9559_v46 }
 0x300   : > { %5252 = vst [vmem:[%s6724_s8 + $0xe8] sm:$0xff] %v5220_v3  ;;  %v5222_v63 = vmul.f32 %v6602_v31, %v9565_v22 }
 0x301   : > { %5253 = vst [vmem:[%s6724_s8 + $0xf0] sm:$0xff] %v5221_v52 }
 0x302   : > { %5254 = vst [vmem:[%s6724_s8 + $0xf8] sm:$0xff] %v5222_v63 }
 0x303 PF: > { %s14_s19 = sadd.s32 1, %s6641_s19   ;;  %s9827_s15 = smov %s6633_s17 }
 0x304   : > { %p11_p11 = scmp.ge.s32.totalorder %s14_s19, 6   ;;  %s9828_s16 = smov %s6637_s18 }
 0x305   : > { %s9829_s17 = smov %s9832_s20  ;;  %s9830_s18 = smov %s9836_s21 }
 0x306   :  { %13 = sbr.rel (!%p11_p11) target bundleno = 3 (0x3), region = 92 }

</bundles_post_ra>
